<compile_context>
chip_gen: v5e
topology: v5e:2x2
jax: 0.10.0
libtpu: 0.0.40
codegen_flags: <defaults>
</compile_context>

<pallas_src>
import functools

import jax
import jax.numpy as jnp
from jax.experimental import pallas as pl
from jax.experimental.pallas import tpu as pltpu


_EPS = 1e-5
_SLOPE = 0.2
_TCO = 128                        # lane-dense output-channel tile
_VMEM_LIMIT = 48 * 1024 * 1024    # safe on v7x (64 MiB/TC) and v5e/v6e (128 MiB)

_CONV_CP = pltpu.CompilerParams(
    dimension_semantics=("parallel", "parallel"),
    vmem_limit_bytes=_VMEM_LIMIT,
)
_AFFINE_CP = pltpu.CompilerParams(
    dimension_semantics=("parallel",),
    vmem_limit_bytes=_VMEM_LIMIT,
)


def _round_up(x, m):
    return (x + m - 1) // m * m


# ----------------------------- Pallas kernels ---------------------------------
def _tap_accum(x_ref, w_ref, *, kk, iwp, p_full):
    """In-kernel im2col: sum of kk*kk tap matmuls over contiguous, statically
    offset slices of the row-major flattened padded activation.
    bf16 x bf16 operands, f32 accumulation on the MXU."""
    acc = None
    for a in range(kk):
        for b in range(kk):
            start = a * iwp + b                       # static offset
            xt = x_ref[0, start:start + p_full, :]    # (p_full, cg) bf16
            y = jnp.dot(xt, w_ref[a * kk + b],
                        preferred_element_type=jnp.float32)
            acc = y if acc is None else acc + y
    return acc                                        # (p_full, TCO) f32


def _conv_bias_act_kernel(x_ref, w_ref, b_ref, o_ref, *, kk, iwp, p_full,
                          use_bias, use_lrelu):
    """Conv (+ bias) (+ LeakyReLU)."""
    acc = _tap_accum(x_ref, w_ref, kk=kk, iwp=iwp, p_full=p_full)
    if use_bias:
        acc = acc + b_ref[...]
    if use_lrelu:
        acc = jnp.where(acc >= 0.0, acc, _SLOPE * acc)
    o_ref[0] = acc.astype(o_ref.dtype)


def _conv_stats_kernel(x_ref, w_ref, o_ref, stats_ref, *, kk, iwp, ow, p_full):
    """Conv; also emit per-(image, cout-block) (sum, sumsq) partials in f32."""
    acc = _tap_accum(x_ref, w_ref, kk=kk, iwp=iwp, p_full=p_full)
    # Mask the (kk-1) flattened-row "overhang" columns out of the BatchNorm
    # statistics; those junk outputs themselves are sliced away in XLA glue.
    col = jax.lax.broadcasted_iota(jnp.int32, (p_full, 1), 0) % iwp
    acc_m = jnp.where(col < ow, acc, 0.0)
    stats_ref[0, 0:1, :] = jnp.sum(acc_m, axis=0, keepdims=True)
    stats_ref[0, 1:2, :] = jnp.sum(acc_m * acc_m, axis=0, keepdims=True)
    o_ref[0] = acc.astype(o_ref.dtype)


def _affine_lrelu_kernel(y_ref, scale_ref, shift_ref, o_ref, *, use_lrelu):
    """Folded BatchNorm (y*scale + shift) fused with LeakyReLU; bf16 in/out."""
    scale = scale_ref[...][:, None, :]
    shift = shift_ref[...][:, None, :]
    y = y_ref[...].astype(jnp.float32) * scale + shift
    if use_lrelu:
        y = jnp.where(y >= 0.0, y, _SLOPE * y)
    o_ref[...] = y.astype(o_ref.dtype)


# ------------------------------- JAX glue --------------------------------------
def _pack_input(x_nhwc, stride):
    """Pad (p=1) and, for stride 2, fold the 2x2 phases into channels so every
    layer becomes a stride-1 kk x kk conv (kk = 2 for stride 2, 4 for stride 1).
    Returns the row-major flattened bf16 activation plus the geometry."""
    N, H, W, C = x_nhwc.shape
    x = x_nhwc.astype(jnp.bfloat16)
    if stride == 2:
        assert H % 2 == 0 and W % 2 == 0, "stride-2 layers require even H/W"
        kk, OH, OW = 2, H // 2, W // 2
        xp = jnp.pad(x, ((0, 0), (1, 1), (1, 1), (0, 0)))
        hp, wp = H + 2, W + 2
        x4 = xp.reshape(N, hp // 2, 2, wp // 2, 2, C)
        x4 = x4.transpose(0, 1, 3, 2, 4, 5).reshape(N, hp // 2, wp // 2, 4 * C)
    else:
        kk, OH, OW = 4, H - 1, W - 1
        x4 = jnp.pad(x, ((0, 0), (1, 1), (1, 1), (0, 0)))
    ih, iwp, cg = x4.shape[1], x4.shape[2], x4.shape[3]
    assert ih == OH + kk - 1 and iwp == OW + kk - 1
    # One extra padded row so the last tap's flat slice stays in bounds.
    x4 = jnp.pad(x4, ((0, 0), (0, 1), (0, 0), (0, 0)))
    x_flat = x4.reshape(N, (ih + 1) * iwp, cg)
    return x_flat, kk, OH, OW, iwp, cg


def _pack_weights(w_oihw, stride, coutp):
    """PyTorch (Cout, Cin, 4, 4) -> (kk*kk, cg, coutp) bf16 tap matrices that
    match the input packing above."""
    cout, cin = w_oihw.shape[0], w_oihw.shape[1]
    wk = jnp.transpose(w_oihw, (2, 3, 1, 0))              # (kh, kw, cin, cout)
    if stride == 2:
        w2 = wk.reshape(2, 2, 2, 2, cin, cout)             # (a, p, b, q, ci, co)
        w2 = w2.transpose(0, 2, 1, 3, 4, 5)                # (a, b, p, q, ci, co)
        w2 = w2.reshape(4, 4 * cin, cout)
    else:
        w2 = wk.reshape(16, cin, cout)
    if coutp != cout:
        w2 = jnp.pad(w2, ((0, 0), (0, 0), (0, coutp - cout)))
    return w2.astype(jnp.bfloat16)


def conv_layer(x_nhwc, w_oihw, bias, gamma, beta, *, stride, use_bias, use_bn,
               use_lrelu, out_f32=False):
    """Conv2d(k=4, p=1, stride in {1,2}) [+ BatchNorm2d] [+ LeakyReLU(0.2)]."""
    N = x_nhwc.shape[0]
    cout = w_oihw.shape[0]
    coutp = max(_TCO, _round_up(cout, _TCO))
    ncb = coutp // _TCO

    x_flat, kk, OH, OW, iwp, cg = _pack_input(x_nhwc, stride)
    w2 = _pack_weights(w_oihw, stride, coutp)
    p_full = OH * iwp                # OH full padded rows (incl. kk-1 junk cols)
    flat_len = x_flat.shape[1]

    grid = (N, ncb)
    # Activation block is constant over the fast cout-block axis -> VMEM
    # resident across it.  Weight / vector blocks have constant-in-n maps.
    # (On v7x, pipeline_mode=pl.Buffered(1) could single-buffer them; default
    #  double-buffering is kept here for portability.)
    x_spec = pl.BlockSpec((1, flat_len, cg), lambda n, j: (n, 0, 0))
    w_spec = pl.BlockSpec((kk * kk, cg, _TCO), lambda n, j: (0, 0, j))
    vec_spec = pl.BlockSpec((1, _TCO), lambda n, j: (0, j))
    o_spec = pl.BlockSpec((1, p_full, _TCO), lambda n, j: (n, 0, j))

    if use_bn:
        stats_spec = pl.BlockSpec((1, 2, _TCO), lambda n, j: (n, 0, j))
        y, stats = pl.pallas_call(
            functools.partial(_conv_stats_kernel, kk=kk, iwp=iwp, ow=OW,
                              p_full=p_full),
            grid=grid,
            in_specs=[x_spec, w_spec],
            out_specs=(o_spec, stats_spec),
            out_shape=(jax.ShapeDtypeStruct((N, p_full, coutp), jnp.bfloat16),
                       jax.ShapeDtypeStruct((N, 2, coutp), jnp.float32)),
            compiler_params=_CONV_CP,
        )(x_flat, w2)

        # Tiny per-channel fold of the batch statistics (biased variance, as in
        # PyTorch BatchNorm2d training mode) into a scale/shift.
        # Note: E[x^2]-E[x]^2 can cancel when |mean| >> std; fine at GAN
        # discriminator activation scales (weights ~ N(0, 0.02)).
        m = N * OH * OW
        mean = jnp.sum(stats[:, 0, :], axis=0) / m
        var = jnp.maximum(jnp.sum(stats[:, 1, :], axis=0) / m - mean * mean, 0.0)
        gamma_p = jnp.pad(gamma.astype(jnp.float32), (0, coutp - cout))
        beta_p = jnp.pad(beta.astype(jnp.float32), (0, coutp - cout))
        scale = gamma_p * jax.lax.rsqrt(var + _EPS)
        shift = beta_p - mean * scale

        out = pl.pallas_call(
            functools.partial(_affine_lrelu_kernel, use_lrelu=use_lrelu),
            grid=(N,),
            in_specs=[pl.BlockSpec((1, p_full, coutp), lambda n: (n, 0, 0)),
                      pl.BlockSpec((1, coutp), lambda n: (0, 0)),
                      pl.BlockSpec((1, coutp), lambda n: (0, 0))],
            out_specs=pl.BlockSpec((1, p_full, coutp), lambda n: (n, 0, 0)),
            out_shape=jax.ShapeDtypeStruct((N, p_full, coutp), jnp.bfloat16),
            compiler_params=_AFFINE_CP,
        )(y, scale.reshape(1, coutp), shift.reshape(1, coutp))
    else:
        bias_p = jnp.pad(bias.astype(jnp.float32),
                         (0, coutp - cout)).reshape(1, coutp)
        out = pl.pallas_call(
            functools.partial(_conv_bias_act_kernel, kk=kk, iwp=iwp,
                              p_full=p_full, use_bias=use_bias,
                              use_lrelu=use_lrelu),
            grid=grid,
            in_specs=[x_spec, w_spec, vec_spec],
            out_specs=o_spec,
            out_shape=jax.ShapeDtypeStruct(
                (N, p_full, coutp),
                jnp.float32 if out_f32 else jnp.bfloat16),
            compiler_params=_CONV_CP,
        )(x_flat, w2, bias_p)

    # Drop the junk columns and padded channels (the channel slice is a no-op
    # for the interior layers where cout % 128 == 0).
    out = out.reshape(N, OH, iwp, coutp)[:, :, :OW, :cout]
    return out


# ----------------------- Parameter construction --------------------------------
def init_nlayer_discriminator_params(key, input_nc, ndf=64, n_layers=3):
    """Mirror NLayerDiscriminator.__init__ with norm_layer=BatchNorm2d
    (=> use_bias=False on the normalized conv layers)."""
    kw = 4
    defs = [dict(cin=input_nc, cout=ndf, stride=2, bias=True, bn=False, lrelu=True)]
    nf_mult = 1
    for n in range(1, n_layers):
        nf_mult_prev, nf_mult = nf_mult, min(2 ** n, 8)
        defs.append(dict(cin=ndf * nf_mult_prev, cout=ndf * nf_mult, stride=2,
                         bias=False, bn=True, lrelu=True))
    nf_mult_prev, nf_mult = nf_mult, min(2 ** n_layers, 8)
    defs.append(dict(cin=ndf * nf_mult_prev, cout=ndf * nf_mult, stride=1,
                     bias=False, bn=True, lrelu=True))
    defs.append(dict(cin=ndf * nf_mult, cout=1, stride=1, bias=True, bn=False,
                     lrelu=False))

    params = []
    for d in defs:
        key, k_w, k_b = jax.random.split(key, 3)
        w = 0.02 * jax.random.normal(k_w, (d['cout'], d['cin'], kw, kw), jnp.float32)
        b = (0.02 * jax.random.normal(k_b, (d['cout'],), jnp.float32)
             if d['bias'] else jnp.zeros((d['cout'],), jnp.float32))
        params.append(dict(w=w, b=b,
                           gamma=jnp.ones((d['cout'],), jnp.float32),
                           beta=jnp.zeros((d['cout'],), jnp.float32),
                           stride=d['stride'], bias_flag=d['bias'],
                           bn=d['bn'], lrelu=d['lrelu']))
    return params


def nlayer_discriminator_forward(x_nchw, params):
    """Forward pass.  Input NCHW, output NCHW (patch logits)."""
    x = jnp.transpose(x_nchw, (0, 2, 3, 1))        # NCHW -> NHWC
    for i, p in enumerate(params):
        x = conv_layer(x, p['w'], p['b'], p['gamma'], p['beta'],
                       stride=p['stride'], use_bias=p['bias_flag'],
                       use_bn=p['bn'], use_lrelu=p['lrelu'],
                       out_f32=(i == len(params) - 1))
    return jnp.transpose(x, (0, 3, 1, 2))          # NHWC -> NCHW


# --------------------------- Pure-JAX f32 reference ----------------------------
def _reference_forward(x_nchw, params):
    x = jnp.transpose(x_nchw, (0, 2, 3, 1)).astype(jnp.float32)
    for p in params:
        w = jnp.transpose(p['w'], (2, 3, 1, 0)).astype(jnp.float32)  # HWIO
        y = jax.lax.conv_general_dilated(
            x, w, window_strides=(p['stride'], p['stride']),
            padding=((1, 1), (1, 1)),
            dimension_numbers=('NHWC', 'HWIO', 'NHWC'),
            precision=jax.lax.Precision.HIGHEST)
        if p['bias_flag']:
            y = y + p['b']
        if p['bn']:
            mean = jnp.mean(y, axis=(0, 1, 2))
            var = jnp.mean((y - mean) ** 2, axis=(0, 1, 2))
            y = (y - mean) * jax.lax.rsqrt(var + _EPS) * p['gamma'] + p['beta']
        if p['lrelu']:
            y = jnp.where(y >= 0.0, y, _SLOPE * y)
        x = y
    return jnp.transpose(x, (0, 3, 1, 2))


# --------------------------------- main -----------------------------------------
if __name__ == "__main__":
    input_nc, ndf, n_layers = 3, 8, 3
    N, H, W = 2, 32, 32   # 32x32 so the two final stride-1 k=4 convs stay valid

    key = jax.random.PRNGKey(0)
    key_x, key_p = jax.random.split(key)
    x = jax.random.normal(key_x, (N, input_nc, H, W), jnp.float32)

    params = init_nlayer_discriminator_params(key_p, input_nc, ndf=ndf,
                                               n_layers=n_layers)

    fwd = jax.jit(lambda inp: nlayer_discriminator_forward(inp, params))
    out = fwd(x)
    jax.block_until_ready(out)

    # PatchGAN logit map: 32 -> 16 -> 8 -> 4 -> 3 -> 2 spatial, 1 channel.
    assert out.shape == (N, 1, 2, 2), out.shape
    assert bool(jnp.all(jnp.isfinite(out)))

    # bf16 conv / f32-accumulation kernel vs pure f32 XLA reference.
    ref = _reference_forward(x, params)
    max_err = float(jnp.max(jnp.abs(out.astype(jnp.float32) - ref)))
    assert max_err < 0.15, f"max abs err vs f32 reference: {max_err}"

    print("KERNEL_OK")
</pallas_src>

<mosaic_0001>
module attributes {stable_mosaic.version = 11 : i64} {
  func.func @_conv_bias_act_kernel(%arg0: i32, %arg1: i32, %arg2: memref<1x306x12xbf16, #tpu.memory_space<vmem>>, %arg3: memref<4x12x128xbf16, #tpu.memory_space<vmem>>, %arg4: memref<1x128xf32, #tpu.memory_space<vmem>>, %arg5: memref<1x272x128xbf16, #tpu.memory_space<vmem>>) attributes {dimension_semantics = [#tpu.dimension_semantics<parallel>, #tpu.dimension_semantics<parallel>], iteration_bounds = array<i64: 2, 1>, scalar_prefetch = 0 : i64, scratch_operands = 0 : i64, tpu.core_type = #tpu.core_type<tc>, window_params = [{transform_indices = @transform_0, window_bounds = array<i64: 1, 306, 12>}, {transform_indices = @transform_1, window_bounds = array<i64: 4, 12, 128>}, {transform_indices = @transform_2, window_bounds = array<i64: 1, 128>}, {transform_indices = @transform_3, window_bounds = array<i64: 1, 272, 128>}]} {
    %c0 = arith.constant 0 : index
    %c0_0 = arith.constant 0 : index
    %c0_1 = arith.constant 0 : index
    %0 = vector.load %arg2[%c0, %c0_0, %c0_1] : memref<1x306x12xbf16, #tpu.memory_space<vmem>>, vector<1x272x12xbf16>
    %1 = vector.shape_cast %0 : vector<1x272x12xbf16> to vector<272x12xbf16>
    %c0_2 = arith.constant 0 : index
    %c0_3 = arith.constant 0 : index
    %c0_4 = arith.constant 0 : index
    %2 = vector.load %arg3[%c0_2, %c0_3, %c0_4] : memref<4x12x128xbf16, #tpu.memory_space<vmem>>, vector<1x12x128xbf16>
    %3 = vector.shape_cast %2 : vector<1x12x128xbf16> to vector<12x128xbf16>
    %cst = arith.constant dense<0.000000e+00> : vector<272x128xf32>
    %4 = tpu.matmul %1, %3, %cst {dimension_numbers = #tpu.dot_dimension_numbers<[1], [0], [0], [1], [0, 0, 1, 1], [], []>} : vector<272x12xbf16>, vector<12x128xbf16>, vector<272x128xf32> -> vector<272x128xf32>
    %c0_5 = arith.constant 0 : index
    %c1 = arith.constant 1 : index
    %c0_6 = arith.constant 0 : index
    %5 = vector.load %arg2[%c0_5, %c1, %c0_6] : memref<1x306x12xbf16, #tpu.memory_space<vmem>>, vector<1x272x12xbf16>
    %6 = vector.shape_cast %5 : vector<1x272x12xbf16> to vector<272x12xbf16>
    %c1_7 = arith.constant 1 : index
    %c0_8 = arith.constant 0 : index
    %c0_9 = arith.constant 0 : index
    %7 = vector.load %arg3[%c1_7, %c0_8, %c0_9] : memref<4x12x128xbf16, #tpu.memory_space<vmem>>, vector<1x12x128xbf16>
    %8 = vector.shape_cast %7 : vector<1x12x128xbf16> to vector<12x128xbf16>
    %cst_10 = arith.constant dense<0.000000e+00> : vector<272x128xf32>
    %9 = tpu.matmul %6, %8, %cst_10 {dimension_numbers = #tpu.dot_dimension_numbers<[1], [0], [0], [1], [0, 0, 1, 1], [], []>} : vector<272x12xbf16>, vector<12x128xbf16>, vector<272x128xf32> -> vector<272x128xf32>
    %10 = arith.addf %4, %9 : vector<272x128xf32>
    %c0_11 = arith.constant 0 : index
    %c17 = arith.constant 17 : index
    %c0_12 = arith.constant 0 : index
    %11 = vector.load %arg2[%c0_11, %c17, %c0_12] : memref<1x306x12xbf16, #tpu.memory_space<vmem>>, vector<1x272x12xbf16>
    %12 = vector.shape_cast %11 : vector<1x272x12xbf16> to vector<272x12xbf16>
    %c2 = arith.constant 2 : index
    %c0_13 = arith.constant 0 : index
    %c0_14 = arith.constant 0 : index
    %13 = vector.load %arg3[%c2, %c0_13, %c0_14] : memref<4x12x128xbf16, #tpu.memory_space<vmem>>, vector<1x12x128xbf16>
    %14 = vector.shape_cast %13 : vector<1x12x128xbf16> to vector<12x128xbf16>
    %cst_15 = arith.constant dense<0.000000e+00> : vector<272x128xf32>
    %15 = tpu.matmul %12, %14, %cst_15 {dimension_numbers = #tpu.dot_dimension_numbers<[1], [0], [0], [1], [0, 0, 1, 1], [], []>} : vector<272x12xbf16>, vector<12x128xbf16>, vector<272x128xf32> -> vector<272x128xf32>
    %16 = arith.addf %10, %15 : vector<272x128xf32>
    %c0_16 = arith.constant 0 : index
    %c18 = arith.constant 18 : index
    %c0_17 = arith.constant 0 : index
    %17 = vector.load %arg2[%c0_16, %c18, %c0_17] : memref<1x306x12xbf16, #tpu.memory_space<vmem>>, vector<1x272x12xbf16>
    %18 = vector.shape_cast %17 : vector<1x272x12xbf16> to vector<272x12xbf16>
    %c3 = arith.constant 3 : index
    %c0_18 = arith.constant 0 : index
    %c0_19 = arith.constant 0 : index
    %19 = vector.load %arg3[%c3, %c0_18, %c0_19] : memref<4x12x128xbf16, #tpu.memory_space<vmem>>, vector<1x12x128xbf16>
    %20 = vector.shape_cast %19 : vector<1x12x128xbf16> to vector<12x128xbf16>
    %cst_20 = arith.constant dense<0.000000e+00> : vector<272x128xf32>
    %21 = tpu.matmul %18, %20, %cst_20 {dimension_numbers = #tpu.dot_dimension_numbers<[1], [0], [0], [1], [0, 0, 1, 1], [], []>} : vector<272x12xbf16>, vector<12x128xbf16>, vector<272x128xf32> -> vector<272x128xf32>
    %22 = arith.addf %16, %21 : vector<272x128xf32>
    %c0_21 = arith.constant 0 : index
    %c0_22 = arith.constant 0 : index
    %23 = vector.load %arg4[%c0_21, %c0_22] : memref<1x128xf32, #tpu.memory_space<vmem>>, vector<1x128xf32>
    %24 = vector.broadcast %23 : vector<1x128xf32> to vector<272x128xf32>
    %25 = arith.addf %22, %24 : vector<272x128xf32>
    %cst_23 = arith.constant 0.000000e+00 : f32
    %26 = vector.broadcast %cst_23 : f32 to vector<272x128xf32>
    %27 = arith.cmpf oge, %25, %26 : vector<272x128xf32>
    %cst_24 = arith.constant 2.000000e-01 : f32
    %28 = vector.broadcast %cst_24 : f32 to vector<272x128xf32>
    %29 = arith.mulf %28, %25 : vector<272x128xf32>
    %30 = arith.select %27, %25, %29 : vector<272x128xi1>, vector<272x128xf32>
    %31 = arith.truncf %30 : vector<272x128xf32> to vector<272x128xbf16>
    %c0_25 = arith.constant 0 : index
    %c0_26 = arith.constant 0 : index
    %c0_27 = arith.constant 0 : index
    %32 = vector.load %arg5[%c0_25, %c0_26, %c0_27] : memref<1x272x128xbf16, #tpu.memory_space<vmem>>, vector<1x272x128xbf16>
    %33 = vector.shape_cast %32 : vector<1x272x128xbf16> to vector<272x128xbf16>
    %34 = vector.shape_cast %31 : vector<272x128xbf16> to vector<1x272x128xbf16>
    tpu.vector_store %arg5[%c0_25, %c0_26, %c0_27], %34 {strides = array<i32>} : memref<1x272x128xbf16, #tpu.memory_space<vmem>>, vector<1x272x128xbf16>,
    return
  }
  func.func @transform_0(%arg0: i32, %arg1: i32) -> (i32, i32, i32) {
    %c0_i32 = arith.constant 0 : i32
    %c0_i32_0 = arith.constant 0 : i32
    %c0_i32_1 = arith.constant 0 : i32
    return %arg0, %c0_i32, %c0_i32_0 : i32, i32, i32
  }
  func.func @transform_1(%arg0: i32, %arg1: i32) -> (i32, i32, i32) {
    %c0_i32 = arith.constant 0 : i32
    %c0_i32_0 = arith.constant 0 : i32
    %c0_i32_1 = arith.constant 0 : i32
    return %c0_i32, %c0_i32_0, %arg1 : i32, i32, i32
  }
  func.func @transform_2(%arg0: i32, %arg1: i32) -> (i32, i32) {
    %c0_i32 = arith.constant 0 : i32
    %c0_i32_0 = arith.constant 0 : i32
    return %c0_i32, %arg1 : i32, i32
  }
  func.func @transform_3(%arg0: i32, %arg1: i32) -> (i32, i32, i32) {
    %c0_i32 = arith.constant 0 : i32
    %c0_i32_0 = arith.constant 0 : i32
    return %arg0, %c0_i32, %arg1 : i32, i32, i32
  }
}

module attributes {stable_mosaic.version = 11 : i64} {
  func.func @_conv_stats_kernel(%arg0: i32, %arg1: i32, %arg2: memref<1x90x32xbf16, #tpu.memory_space<vmem>>, %arg3: memref<4x32x128xbf16, #tpu.memory_space<vmem>>, %arg4: memref<1x72x128xbf16, #tpu.memory_space<vmem>>, %arg5: memref<1x2x128xf32, #tpu.memory_space<vmem>>) attributes {dimension_semantics = [#tpu.dimension_semantics<parallel>, #tpu.dimension_semantics<parallel>], iteration_bounds = array<i64: 2, 1>, scalar_prefetch = 0 : i64, scratch_operands = 0 : i64, tpu.core_type = #tpu.core_type<tc>, window_params = [{transform_indices = @transform_0, window_bounds = array<i64: 1, 90, 32>}, {transform_indices = @transform_1, window_bounds = array<i64: 4, 32, 128>}, {transform_indices = @transform_2, window_bounds = array<i64: 1, 72, 128>}, {transform_indices = @transform_3, window_bounds = array<i64: 1, 2, 128>}]} {
    %c0 = arith.constant 0 : index
    %c0_0 = arith.constant 0 : index
    %c0_1 = arith.constant 0 : index
    %0 = vector.load %arg2[%c0, %c0_0, %c0_1] : memref<1x90x32xbf16, #tpu.memory_space<vmem>>, vector<1x72x32xbf16>
    %1 = vector.shape_cast %0 : vector<1x72x32xbf16> to vector<72x32xbf16>
    %c0_2 = arith.constant 0 : index
    %c0_3 = arith.constant 0 : index
    %c0_4 = arith.constant 0 : index
    %2 = vector.load %arg3[%c0_2, %c0_3, %c0_4] : memref<4x32x128xbf16, #tpu.memory_space<vmem>>, vector<1x32x128xbf16>
    %3 = vector.shape_cast %2 : vector<1x32x128xbf16> to vector<32x128xbf16>
    %cst = arith.constant dense<0.000000e+00> : vector<72x128xf32>
    %4 = tpu.matmul %1, %3, %cst {dimension_numbers = #tpu.dot_dimension_numbers<[1], [0], [0], [1], [0, 0, 1, 1], [], []>} : vector<72x32xbf16>, vector<32x128xbf16>, vector<72x128xf32> -> vector<72x128xf32>
    %c0_5 = arith.constant 0 : index
    %c1 = arith.constant 1 : index
    %c0_6 = arith.constant 0 : index
    %5 = vector.load %arg2[%c0_5, %c1, %c0_6] : memref<1x90x32xbf16, #tpu.memory_space<vmem>>, vector<1x72x32xbf16>
    %6 = vector.shape_cast %5 : vector<1x72x32xbf16> to vector<72x32xbf16>
    %c1_7 = arith.constant 1 : index
    %c0_8 = arith.constant 0 : index
    %c0_9 = arith.constant 0 : index
    %7 = vector.load %arg3[%c1_7, %c0_8, %c0_9] : memref<4x32x128xbf16, #tpu.memory_space<vmem>>, vector<1x32x128xbf16>
    %8 = vector.shape_cast %7 : vector<1x32x128xbf16> to vector<32x128xbf16>
    %cst_10 = arith.constant dense<0.000000e+00> : vector<72x128xf32>
    %9 = tpu.matmul %6, %8, %cst_10 {dimension_numbers = #tpu.dot_dimension_numbers<[1], [0], [0], [1], [0, 0, 1, 1], [], []>} : vector<72x32xbf16>, vector<32x128xbf16>, vector<72x128xf32> -> vector<72x128xf32>
    %10 = arith.addf %4, %9 : vector<72x128xf32>
    %c0_11 = arith.constant 0 : index
    %c9 = arith.constant 9 : index
    %c0_12 = arith.constant 0 : index
    %11 = vector.load %arg2[%c0_11, %c9, %c0_12] : memref<1x90x32xbf16, #tpu.memory_space<vmem>>, vector<1x72x32xbf16>
    %12 = vector.shape_cast %11 : vector<1x72x32xbf16> to vector<72x32xbf16>
    %c2 = arith.constant 2 : index
    %c0_13 = arith.constant 0 : index
    %c0_14 = arith.constant 0 : index
    %13 = vector.load %arg3[%c2, %c0_13, %c0_14] : memref<4x32x128xbf16, #tpu.memory_space<vmem>>, vector<1x32x128xbf16>
    %14 = vector.shape_cast %13 : vector<1x32x128xbf16> to vector<32x128xbf16>
    %cst_15 = arith.constant dense<0.000000e+00> : vector<72x128xf32>
    %15 = tpu.matmul %12, %14, %cst_15 {dimension_numbers = #tpu.dot_dimension_numbers<[1], [0], [0], [1], [0, 0, 1, 1], [], []>} : vector<72x32xbf16>, vector<32x128xbf16>, vector<72x128xf32> -> vector<72x128xf32>
    %16 = arith.addf %10, %15 : vector<72x128xf32>
    %c0_16 = arith.constant 0 : index
    %c10 = arith.constant 10 : index
    %c0_17 = arith.constant 0 : index
    %17 = vector.load %arg2[%c0_16, %c10, %c0_17] : memref<1x90x32xbf16, #tpu.memory_space<vmem>>, vector<1x72x32xbf16>
    %18 = vector.shape_cast %17 : vector<1x72x32xbf16> to vector<72x32xbf16>
    %c3 = arith.constant 3 : index
    %c0_18 = arith.constant 0 : index
    %c0_19 = arith.constant 0 : index
    %19 = vector.load %arg3[%c3, %c0_18, %c0_19] : memref<4x32x128xbf16, #tpu.memory_space<vmem>>, vector<1x32x128xbf16>
    %20 = vector.shape_cast %19 : vector<1x32x128xbf16> to vector<32x128xbf16>
    %cst_20 = arith.constant dense<0.000000e+00> : vector<72x128xf32>
    %21 = tpu.matmul %18, %20, %cst_20 {dimension_numbers = #tpu.dot_dimension_numbers<[1], [0], [0], [1], [0, 0, 1, 1], [], []>} : vector<72x32xbf16>, vector<32x128xbf16>, vector<72x128xf32> -> vector<72x128xf32>
    %22 = arith.addf %16, %21 : vector<72x128xf32>
    %23 = tpu.iota {dimensions = array<i32: 0>} : vector<72x1xi32>
    %c9_i32 = arith.constant 9 : i32
    %c0_i32 = arith.constant 0 : i32
    %24 = arith.cmpi eq, %c9_i32, %c0_i32 : i32
    %c1_i32 = arith.constant 1 : i32
    %25 = arith.select %24, %c1_i32, %c9_i32 : i32
    %26 = vector.broadcast %25 : i32 to vector<72x1xi32>
    %27 = arith.remsi %23, %26 : vector<72x1xi32>
    %c0_i32_21 = arith.constant 0 : i32
    %28 = vector.broadcast %c0_i32_21 : i32 to vector<72x1xi32>
    %29 = arith.cmpi ne, %27, %28 : vector<72x1xi32>
    %c0_i32_22 = arith.constant 0 : i32
    %30 = vector.broadcast %c0_i32_22 : i32 to vector<72x1xi32>
    %31 = arith.cmpi slt, %27, %30 : vector<72x1xi32>
    %c0_i32_23 = arith.constant 0 : i32
    %32 = arith.cmpi slt, %25, %c0_i32_23 : i32
    %33 = vector.broadcast %32 : i1 to vector<72x1xi1>
    %34 = vector.broadcast %33 : vector<72x1xi1> to vector<72x1xi1>
    %35 = arith.xori %31, %34 : vector<72x1xi1>
    %36 = arith.andi %35, %29 : vector<72x1xi1>
    %37 = vector.broadcast %25 : i32 to vector<72x1xi32>
    %38 = arith.addi %27, %37 : vector<72x1xi32>
    %39 = arith.select %36, %38, %27 : vector<72x1xi1>, vector<72x1xi32>
    %c8_i32 = arith.constant 8 : i32
    %40 = vector.broadcast %c8_i32 : i32 to vector<72x1xi32>
    %41 = arith.cmpi slt, %39, %40 : vector<72x1xi32>
    %cst_24 = arith.constant 0.000000e+00 : f32
    %42 = vector.shape_cast %41 : vector<72x1xi1> to vector<72x1xi1>
    %43 = vector.broadcast %42 : vector<72x1xi1> to vector<72x128xi1>
    %44 = vector.broadcast %cst_24 : f32 to vector<72x128xf32>
    %45 = arith.select %43, %22, %44 : vector<72x128xi1>, vector<72x128xf32>
    %cst_25 = arith.constant dense<0.000000e+00> : vector<128xf32>
    %46 = vector.multi_reduction <add>, %45, %cst_25 [0] : vector<72x128xf32> to vector<128xf32>
    %47 = vector.shape_cast %46 : vector<128xf32> to vector<1x128xf32>
    %c0_26 = arith.constant 0 : index
    %c0_27 = arith.constant 0 : index
    %c0_28 = arith.constant 0 : index
    %48 = vector.load %arg5[%c0_26, %c0_27, %c0_28] : memref<1x2x128xf32, #tpu.memory_space<vmem>>, vector<1x1x128xf32>
    %49 = vector.shape_cast %48 : vector<1x1x128xf32> to vector<1x128xf32>
    %50 = vector.shape_cast %47 : vector<1x128xf32> to vector<1x1x128xf32>
    tpu.vector_store %arg5[%c0_26, %c0_27, %c0_28], %50 {strides = array<i32>} : memref<1x2x128xf32, #tpu.memory_space<vmem>>, vector<1x1x128xf32>,
    %51 = arith.mulf %45, %45 : vector<72x128xf32>
    %cst_29 = arith.constant dense<0.000000e+00> : vector<128xf32>
    %52 = vector.multi_reduction <add>, %51, %cst_29 [0] : vector<72x128xf32> to vector<128xf32>
    %53 = vector.shape_cast %52 : vector<128xf32> to vector<1x128xf32>
    %c0_30 = arith.constant 0 : index
    %c1_31 = arith.constant 1 : index
    %c0_32 = arith.constant 0 : index
    %54 = vector.load %arg5[%c0_30, %c1_31, %c0_32] : memref<1x2x128xf32, #tpu.memory_space<vmem>>, vector<1x1x128xf32>
    %55 = vector.shape_cast %54 : vector<1x1x128xf32> to vector<1x128xf32>
    %56 = vector.shape_cast %53 : vector<1x128xf32> to vector<1x1x128xf32>
    tpu.vector_store %arg5[%c0_30, %c1_31, %c0_32], %56 {strides = array<i32>} : memref<1x2x128xf32, #tpu.memory_space<vmem>>, vector<1x1x128xf32>,
    %57 = arith.truncf %22 : vector<72x128xf32> to vector<72x128xbf16>
    %c0_33 = arith.constant 0 : index
    %c0_34 = arith.constant 0 : index
    %c0_35 = arith.constant 0 : index
    %58 = vector.load %arg4[%c0_33, %c0_34, %c0_35] : memref<1x72x128xbf16, #tpu.memory_space<vmem>>, vector<1x72x128xbf16>
    %59 = vector.shape_cast %58 : vector<1x72x128xbf16> to vector<72x128xbf16>
    %60 = vector.shape_cast %57 : vector<72x128xbf16> to vector<1x72x128xbf16>
    tpu.vector_store %arg4[%c0_33, %c0_34, %c0_35], %60 {strides = array<i32>} : memref<1x72x128xbf16, #tpu.memory_space<vmem>>, vector<1x72x128xbf16>,
    return
  }
  func.func @transform_0(%arg0: i32, %arg1: i32) -> (i32, i32, i32) {
    %c0_i32 = arith.constant 0 : i32
    %c0_i32_0 = arith.constant 0 : i32
    %c0_i32_1 = arith.constant 0 : i32
    return %arg0, %c0_i32, %c0_i32_0 : i32, i32, i32
  }
  func.func @transform_1(%arg0: i32, %arg1: i32) -> (i32, i32, i32) {
    %c0_i32 = arith.constant 0 : i32
    %c0_i32_0 = arith.constant 0 : i32
    %c0_i32_1 = arith.constant 0 : i32
    return %c0_i32, %c0_i32_0, %arg1 : i32, i32, i32
  }
  func.func @transform_2(%arg0: i32, %arg1: i32) -> (i32, i32, i32) {
    %c0_i32 = arith.constant 0 : i32
    %c0_i32_0 = arith.constant 0 : i32
    return %arg0, %c0_i32, %arg1 : i32, i32, i32
  }
  func.func @transform_3(%arg0: i32, %arg1: i32) -> (i32, i32, i32) {
    %c0_i32 = arith.constant 0 : i32
    %c0_i32_0 = arith.constant 0 : i32
    return %arg0, %c0_i32, %arg1 : i32, i32, i32
  }
}

module attributes {stable_mosaic.version = 11 : i64} {
  func.func @_affine_lrelu_kernel(%arg0: i32, %arg1: memref<1x72x128xbf16, #tpu.memory_space<vmem>>, %arg2: memref<1x128xf32, #tpu.memory_space<vmem>>, %arg3: memref<1x128xf32, #tpu.memory_space<vmem>>, %arg4: memref<1x72x128xbf16, #tpu.memory_space<vmem>>) attributes {dimension_semantics = [#tpu.dimension_semantics<parallel>], iteration_bounds = array<i64: 2>, scalar_prefetch = 0 : i64, scratch_operands = 0 : i64, tpu.core_type = #tpu.core_type<tc>, window_params = [{transform_indices = @transform_0, window_bounds = array<i64: 1, 72, 128>}, {pipeline_mode = #tpu.pipeline_mode<synchronous>, transform_indices = @transform_1, window_bounds = array<i64: 1, 128>}, {pipeline_mode = #tpu.pipeline_mode<synchronous>, transform_indices = @transform_2, window_bounds = array<i64: 1, 128>}, {transform_indices = @transform_3, window_bounds = array<i64: 1, 72, 128>}]} {
    %c0 = arith.constant 0 : index
    %c0_0 = arith.constant 0 : index
    %0 = vector.load %arg2[%c0, %c0_0] : memref<1x128xf32, #tpu.memory_space<vmem>>, vector<1x128xf32>
    %1 = vector.shape_cast %0 : vector<1x128xf32> to vector<1x1x128xf32>
    %c0_1 = arith.constant 0 : index
    %c0_2 = arith.constant 0 : index
    %2 = vector.load %arg3[%c0_1, %c0_2] : memref<1x128xf32, #tpu.memory_space<vmem>>, vector<1x128xf32>
    %3 = vector.shape_cast %2 : vector<1x128xf32> to vector<1x1x128xf32>
    %c0_3 = arith.constant 0 : index
    %c0_4 = arith.constant 0 : index
    %c0_5 = arith.constant 0 : index
    %4 = vector.load %arg1[%c0_3, %c0_4, %c0_5] : memref<1x72x128xbf16, #tpu.memory_space<vmem>>, vector<1x72x128xbf16>
    %5 = arith.extf %4 : vector<1x72x128xbf16> to vector<1x72x128xf32>
    %6 = vector.broadcast %1 : vector<1x1x128xf32> to vector<1x72x128xf32>
    %7 = arith.mulf %5, %6 : vector<1x72x128xf32>
    %8 = vector.broadcast %3 : vector<1x1x128xf32> to vector<1x72x128xf32>
    %9 = arith.addf %7, %8 : vector<1x72x128xf32>
    %cst = arith.constant 0.000000e+00 : f32
    %10 = vector.broadcast %cst : f32 to vector<1x72x128xf32>
    %11 = arith.cmpf oge, %9, %10 : vector<1x72x128xf32>
    %cst_6 = arith.constant 2.000000e-01 : f32
    %12 = vector.broadcast %cst_6 : f32 to vector<1x72x128xf32>
    %13 = arith.mulf %12, %9 : vector<1x72x128xf32>
    %14 = arith.select %11, %9, %13 : vector<1x72x128xi1>, vector<1x72x128xf32>
    %15 = arith.truncf %14 : vector<1x72x128xf32> to vector<1x72x128xbf16>
    %c0_7 = arith.constant 0 : index
    %c0_8 = arith.constant 0 : index
    %c0_9 = arith.constant 0 : index
    %16 = vector.load %arg4[%c0_7, %c0_8, %c0_9] : memref<1x72x128xbf16, #tpu.memory_space<vmem>>, vector<1x72x128xbf16>
    tpu.vector_store %arg4[%c0_7, %c0_8, %c0_9], %15 {strides = array<i32>} : memref<1x72x128xbf16, #tpu.memory_space<vmem>>, vector<1x72x128xbf16>,
    return
  }
  func.func @transform_0(%arg0: i32) -> (i32, i32, i32) {
    %c0_i32 = arith.constant 0 : i32
    %c0_i32_0 = arith.constant 0 : i32
    %c0_i32_1 = arith.constant 0 : i32
    return %arg0, %c0_i32, %c0_i32_0 : i32, i32, i32
  }
  func.func @transform_1(%arg0: i32) -> (i32, i32) {
    %c0_i32 = arith.constant 0 : i32
    %c0_i32_0 = arith.constant 0 : i32
    %c0_i32_1 = arith.constant 0 : i32
    return %c0_i32, %c0_i32_0 : i32, i32
  }
  func.func @transform_2(%arg0: i32) -> (i32, i32) {
    %c0_i32 = arith.constant 0 : i32
    %c0_i32_0 = arith.constant 0 : i32
    %c0_i32_1 = arith.constant 0 : i32
    return %c0_i32, %c0_i32_0 : i32, i32
  }
  func.func @transform_3(%arg0: i32) -> (i32, i32, i32) {
    %c0_i32 = arith.constant 0 : i32
    %c0_i32_0 = arith.constant 0 : i32
    %c0_i32_1 = arith.constant 0 : i32
    return %arg0, %c0_i32, %c0_i32_0 : i32, i32, i32
  }
}

module attributes {stable_mosaic.version = 11 : i64} {
  func.func @_affine_lrelu_kernel(%arg0: i32, %arg1: memref<1x20x128xbf16, #tpu.memory_space<vmem>>, %arg2: memref<1x128xf32, #tpu.memory_space<vmem>>, %arg3: memref<1x128xf32, #tpu.memory_space<vmem>>, %arg4: memref<1x20x128xbf16, #tpu.memory_space<vmem>>) attributes {dimension_semantics = [#tpu.dimension_semantics<parallel>], iteration_bounds = array<i64: 2>, scalar_prefetch = 0 : i64, scratch_operands = 0 : i64, tpu.core_type = #tpu.core_type<tc>, window_params = [{transform_indices = @transform_0, window_bounds = array<i64: 1, 20, 128>}, {pipeline_mode = #tpu.pipeline_mode<synchronous>, transform_indices = @transform_1, window_bounds = array<i64: 1, 128>}, {pipeline_mode = #tpu.pipeline_mode<synchronous>, transform_indices = @transform_2, window_bounds = array<i64: 1, 128>}, {transform_indices = @transform_3, window_bounds = array<i64: 1, 20, 128>}]} {
    %c0 = arith.constant 0 : index
    %c0_0 = arith.constant 0 : index
    %0 = vector.load %arg2[%c0, %c0_0] : memref<1x128xf32, #tpu.memory_space<vmem>>, vector<1x128xf32>
    %1 = vector.shape_cast %0 : vector<1x128xf32> to vector<1x1x128xf32>
    %c0_1 = arith.constant 0 : index
    %c0_2 = arith.constant 0 : index
    %2 = vector.load %arg3[%c0_1, %c0_2] : memref<1x128xf32, #tpu.memory_space<vmem>>, vector<1x128xf32>
    %3 = vector.shape_cast %2 : vector<1x128xf32> to vector<1x1x128xf32>
    %c0_3 = arith.constant 0 : index
    %c0_4 = arith.constant 0 : index
    %c0_5 = arith.constant 0 : index
    %4 = vector.load %arg1[%c0_3, %c0_4, %c0_5] : memref<1x20x128xbf16, #tpu.memory_space<vmem>>, vector<1x20x128xbf16>
    %5 = arith.extf %4 : vector<1x20x128xbf16> to vector<1x20x128xf32>
    %6 = vector.broadcast %1 : vector<1x1x128xf32> to vector<1x20x128xf32>
    %7 = arith.mulf %5, %6 : vector<1x20x128xf32>
    %8 = vector.broadcast %3 : vector<1x1x128xf32> to vector<1x20x128xf32>
    %9 = arith.addf %7, %8 : vector<1x20x128xf32>
    %cst = arith.constant 0.000000e+00 : f32
    %10 = vector.broadcast %cst : f32 to vector<1x20x128xf32>
    %11 = arith.cmpf oge, %9, %10 : vector<1x20x128xf32>
    %cst_6 = arith.constant 2.000000e-01 : f32
    %12 = vector.broadcast %cst_6 : f32 to vector<1x20x128xf32>
    %13 = arith.mulf %12, %9 : vector<1x20x128xf32>
    %14 = arith.select %11, %9, %13 : vector<1x20x128xi1>, vector<1x20x128xf32>
    %15 = arith.truncf %14 : vector<1x20x128xf32> to vector<1x20x128xbf16>
    %c0_7 = arith.constant 0 : index
    %c0_8 = arith.constant 0 : index
    %c0_9 = arith.constant 0 : index
    %16 = vector.load %arg4[%c0_7, %c0_8, %c0_9] : memref<1x20x128xbf16, #tpu.memory_space<vmem>>, vector<1x20x128xbf16>
    tpu.vector_store %arg4[%c0_7, %c0_8, %c0_9], %15 {strides = array<i32>} : memref<1x20x128xbf16, #tpu.memory_space<vmem>>, vector<1x20x128xbf16>,
    return
  }
  func.func @transform_0(%arg0: i32) -> (i32, i32, i32) {
    %c0_i32 = arith.constant 0 : i32
    %c0_i32_0 = arith.constant 0 : i32
    %c0_i32_1 = arith.constant 0 : i32
    return %arg0, %c0_i32, %c0_i32_0 : i32, i32, i32
  }
  func.func @transform_1(%arg0: i32) -> (i32, i32) {
    %c0_i32 = arith.constant 0 : i32
    %c0_i32_0 = arith.constant 0 : i32
    %c0_i32_1 = arith.constant 0 : i32
    return %c0_i32, %c0_i32_0 : i32, i32
  }
  func.func @transform_2(%arg0: i32) -> (i32, i32) {
    %c0_i32 = arith.constant 0 : i32
    %c0_i32_0 = arith.constant 0 : i32
    %c0_i32_1 = arith.constant 0 : i32
    return %c0_i32, %c0_i32_0 : i32, i32
  }
  func.func @transform_3(%arg0: i32) -> (i32, i32, i32) {
    %c0_i32 = arith.constant 0 : i32
    %c0_i32_0 = arith.constant 0 : i32
    %c0_i32_1 = arith.constant 0 : i32
    return %arg0, %c0_i32, %c0_i32_0 : i32, i32, i32
  }
}

module attributes {stable_mosaic.version = 11 : i64} {
  func.func @_conv_stats_kernel(%arg0: i32, %arg1: i32, %arg2: memref<1x30x64xbf16, #tpu.memory_space<vmem>>, %arg3: memref<4x64x128xbf16, #tpu.memory_space<vmem>>, %arg4: memref<1x20x128xbf16, #tpu.memory_space<vmem>>, %arg5: memref<1x2x128xf32, #tpu.memory_space<vmem>>) attributes {dimension_semantics = [#tpu.dimension_semantics<parallel>, #tpu.dimension_semantics<parallel>], iteration_bounds = array<i64: 2, 1>, scalar_prefetch = 0 : i64, scratch_operands = 0 : i64, tpu.core_type = #tpu.core_type<tc>, window_params = [{transform_indices = @transform_0, window_bounds = array<i64: 1, 30, 64>}, {transform_indices = @transform_1, window_bounds = array<i64: 4, 64, 128>}, {transform_indices = @transform_2, window_bounds = array<i64: 1, 20, 128>}, {transform_indices = @transform_3, window_bounds = array<i64: 1, 2, 128>}]} {
    %c0 = arith.constant 0 : index
    %c0_0 = arith.constant 0 : index
    %c0_1 = arith.constant 0 : index
    %0 = vector.load %arg2[%c0, %c0_0, %c0_1] : memref<1x30x64xbf16, #tpu.memory_space<vmem>>, vector<1x20x64xbf16>
    %1 = vector.shape_cast %0 : vector<1x20x64xbf16> to vector<20x64xbf16>
    %c0_2 = arith.constant 0 : index
    %c0_3 = arith.constant 0 : index
    %c0_4 = arith.constant 0 : index
    %2 = vector.load %arg3[%c0_2, %c0_3, %c0_4] : memref<4x64x128xbf16, #tpu.memory_space<vmem>>, vector<1x64x128xbf16>
    %3 = vector.shape_cast %2 : vector<1x64x128xbf16> to vector<64x128xbf16>
    %cst = arith.constant dense<0.000000e+00> : vector<20x128xf32>
    %4 = tpu.matmul %1, %3, %cst {dimension_numbers = #tpu.dot_dimension_numbers<[1], [0], [0], [1], [0, 0, 1, 1], [], []>} : vector<20x64xbf16>, vector<64x128xbf16>, vector<20x128xf32> -> vector<20x128xf32>
    %c0_5 = arith.constant 0 : index
    %c1 = arith.constant 1 : index
    %c0_6 = arith.constant 0 : index
    %5 = vector.load %arg2[%c0_5, %c1, %c0_6] : memref<1x30x64xbf16, #tpu.memory_space<vmem>>, vector<1x20x64xbf16>
    %6 = vector.shape_cast %5 : vector<1x20x64xbf16> to vector<20x64xbf16>
    %c1_7 = arith.constant 1 : index
    %c0_8 = arith.constant 0 : index
    %c0_9 = arith.constant 0 : index
    %7 = vector.load %arg3[%c1_7, %c0_8, %c0_9] : memref<4x64x128xbf16, #tpu.memory_space<vmem>>, vector<1x64x128xbf16>
    %8 = vector.shape_cast %7 : vector<1x64x128xbf16> to vector<64x128xbf16>
    %cst_10 = arith.constant dense<0.000000e+00> : vector<20x128xf32>
    %9 = tpu.matmul %6, %8, %cst_10 {dimension_numbers = #tpu.dot_dimension_numbers<[1], [0], [0], [1], [0, 0, 1, 1], [], []>} : vector<20x64xbf16>, vector<64x128xbf16>, vector<20x128xf32> -> vector<20x128xf32>
    %10 = arith.addf %4, %9 : vector<20x128xf32>
    %c0_11 = arith.constant 0 : index
    %c5 = arith.constant 5 : index
    %c0_12 = arith.constant 0 : index
    %11 = vector.load %arg2[%c0_11, %c5, %c0_12] : memref<1x30x64xbf16, #tpu.memory_space<vmem>>, vector<1x20x64xbf16>
    %12 = vector.shape_cast %11 : vector<1x20x64xbf16> to vector<20x64xbf16>
    %c2 = arith.constant 2 : index
    %c0_13 = arith.constant 0 : index
    %c0_14 = arith.constant 0 : index
    %13 = vector.load %arg3[%c2, %c0_13, %c0_14] : memref<4x64x128xbf16, #tpu.memory_space<vmem>>, vector<1x64x128xbf16>
    %14 = vector.shape_cast %13 : vector<1x64x128xbf16> to vector<64x128xbf16>
    %cst_15 = arith.constant dense<0.000000e+00> : vector<20x128xf32>
    %15 = tpu.matmul %12, %14, %cst_15 {dimension_numbers = #tpu.dot_dimension_numbers<[1], [0], [0], [1], [0, 0, 1, 1], [], []>} : vector<20x64xbf16>, vector<64x128xbf16>, vector<20x128xf32> -> vector<20x128xf32>
    %16 = arith.addf %10, %15 : vector<20x128xf32>
    %c0_16 = arith.constant 0 : index
    %c6 = arith.constant 6 : index
    %c0_17 = arith.constant 0 : index
    %17 = vector.load %arg2[%c0_16, %c6, %c0_17] : memref<1x30x64xbf16, #tpu.memory_space<vmem>>, vector<1x20x64xbf16>
    %18 = vector.shape_cast %17 : vector<1x20x64xbf16> to vector<20x64xbf16>
    %c3 = arith.constant 3 : index
    %c0_18 = arith.constant 0 : index
    %c0_19 = arith.constant 0 : index
    %19 = vector.load %arg3[%c3, %c0_18, %c0_19] : memref<4x64x128xbf16, #tpu.memory_space<vmem>>, vector<1x64x128xbf16>
    %20 = vector.shape_cast %19 : vector<1x64x128xbf16> to vector<64x128xbf16>
    %cst_20 = arith.constant dense<0.000000e+00> : vector<20x128xf32>
    %21 = tpu.matmul %18, %20, %cst_20 {dimension_numbers = #tpu.dot_dimension_numbers<[1], [0], [0], [1], [0, 0, 1, 1], [], []>} : vector<20x64xbf16>, vector<64x128xbf16>, vector<20x128xf32> -> vector<20x128xf32>
    %22 = arith.addf %16, %21 : vector<20x128xf32>
    %23 = tpu.iota {dimensions = array<i32: 0>} : vector<20x1xi32>
    %c5_i32 = arith.constant 5 : i32
    %c0_i32 = arith.constant 0 : i32
    %24 = arith.cmpi eq, %c5_i32, %c0_i32 : i32
    %c1_i32 = arith.constant 1 : i32
    %25 = arith.select %24, %c1_i32, %c5_i32 : i32
    %26 = vector.broadcast %25 : i32 to vector<20x1xi32>
    %27 = arith.remsi %23, %26 : vector<20x1xi32>
    %c0_i32_21 = arith.constant 0 : i32
    %28 = vector.broadcast %c0_i32_21 : i32 to vector<20x1xi32>
    %29 = arith.cmpi ne, %27, %28 : vector<20x1xi32>
    %c0_i32_22 = arith.constant 0 : i32
    %30 = vector.broadcast %c0_i32_22 : i32 to vector<20x1xi32>
    %31 = arith.cmpi slt, %27, %30 : vector<20x1xi32>
    %c0_i32_23 = arith.constant 0 : i32
    %32 = arith.cmpi slt, %25, %c0_i32_23 : i32
    %33 = vector.broadcast %32 : i1 to vector<20x1xi1>
    %34 = vector.broadcast %33 : vector<20x1xi1> to vector<20x1xi1>
    %35 = arith.xori %31, %34 : vector<20x1xi1>
    %36 = arith.andi %35, %29 : vector<20x1xi1>
    %37 = vector.broadcast %25 : i32 to vector<20x1xi32>
    %38 = arith.addi %27, %37 : vector<20x1xi32>
    %39 = arith.select %36, %38, %27 : vector<20x1xi1>, vector<20x1xi32>
    %c4_i32 = arith.constant 4 : i32
    %40 = vector.broadcast %c4_i32 : i32 to vector<20x1xi32>
    %41 = arith.cmpi slt, %39, %40 : vector<20x1xi32>
    %cst_24 = arith.constant 0.000000e+00 : f32
    %42 = vector.shape_cast %41 : vector<20x1xi1> to vector<20x1xi1>
    %43 = vector.broadcast %42 : vector<20x1xi1> to vector<20x128xi1>
    %44 = vector.broadcast %cst_24 : f32 to vector<20x128xf32>
    %45 = arith.select %43, %22, %44 : vector<20x128xi1>, vector<20x128xf32>
    %cst_25 = arith.constant dense<0.000000e+00> : vector<128xf32>
    %46 = vector.multi_reduction <add>, %45, %cst_25 [0] : vector<20x128xf32> to vector<128xf32>
    %47 = vector.shape_cast %46 : vector<128xf32> to vector<1x128xf32>
    %c0_26 = arith.constant 0 : index
    %c0_27 = arith.constant 0 : index
    %c0_28 = arith.constant 0 : index
    %48 = vector.load %arg5[%c0_26, %c0_27, %c0_28] : memref<1x2x128xf32, #tpu.memory_space<vmem>>, vector<1x1x128xf32>
    %49 = vector.shape_cast %48 : vector<1x1x128xf32> to vector<1x128xf32>
    %50 = vector.shape_cast %47 : vector<1x128xf32> to vector<1x1x128xf32>
    tpu.vector_store %arg5[%c0_26, %c0_27, %c0_28], %50 {strides = array<i32>} : memref<1x2x128xf32, #tpu.memory_space<vmem>>, vector<1x1x128xf32>,
    %51 = arith.mulf %45, %45 : vector<20x128xf32>
    %cst_29 = arith.constant dense<0.000000e+00> : vector<128xf32>
    %52 = vector.multi_reduction <add>, %51, %cst_29 [0] : vector<20x128xf32> to vector<128xf32>
    %53 = vector.shape_cast %52 : vector<128xf32> to vector<1x128xf32>
    %c0_30 = arith.constant 0 : index
    %c1_31 = arith.constant 1 : index
    %c0_32 = arith.constant 0 : index
    %54 = vector.load %arg5[%c0_30, %c1_31, %c0_32] : memref<1x2x128xf32, #tpu.memory_space<vmem>>, vector<1x1x128xf32>
    %55 = vector.shape_cast %54 : vector<1x1x128xf32> to vector<1x128xf32>
    %56 = vector.shape_cast %53 : vector<1x128xf32> to vector<1x1x128xf32>
    tpu.vector_store %arg5[%c0_30, %c1_31, %c0_32], %56 {strides = array<i32>} : memref<1x2x128xf32, #tpu.memory_space<vmem>>, vector<1x1x128xf32>,
    %57 = arith.truncf %22 : vector<20x128xf32> to vector<20x128xbf16>
    %c0_33 = arith.constant 0 : index
    %c0_34 = arith.constant 0 : index
    %c0_35 = arith.constant 0 : index
    %58 = vector.load %arg4[%c0_33, %c0_34, %c0_35] : memref<1x20x128xbf16, #tpu.memory_space<vmem>>, vector<1x20x128xbf16>
    %59 = vector.shape_cast %58 : vector<1x20x128xbf16> to vector<20x128xbf16>
    %60 = vector.shape_cast %57 : vector<20x128xbf16> to vector<1x20x128xbf16>
    tpu.vector_store %arg4[%c0_33, %c0_34, %c0_35], %60 {strides = array<i32>} : memref<1x20x128xbf16, #tpu.memory_space<vmem>>, vector<1x20x128xbf16>,
    return
  }
  func.func @transform_0(%arg0: i32, %arg1: i32) -> (i32, i32, i32) {
    %c0_i32 = arith.constant 0 : i32
    %c0_i32_0 = arith.constant 0 : i32
    %c0_i32_1 = arith.constant 0 : i32
    return %arg0, %c0_i32, %c0_i32_0 : i32, i32, i32
  }
  func.func @transform_1(%arg0: i32, %arg1: i32) -> (i32, i32, i32) {
    %c0_i32 = arith.constant 0 : i32
    %c0_i32_0 = arith.constant 0 : i32
    %c0_i32_1 = arith.constant 0 : i32
    return %c0_i32, %c0_i32_0, %arg1 : i32, i32, i32
  }
  func.func @transform_2(%arg0: i32, %arg1: i32) -> (i32, i32, i32) {
    %c0_i32 = arith.constant 0 : i32
    %c0_i32_0 = arith.constant 0 : i32
    return %arg0, %c0_i32, %arg1 : i32, i32, i32
  }
  func.func @transform_3(%arg0: i32, %arg1: i32) -> (i32, i32, i32) {
    %c0_i32 = arith.constant 0 : i32
    %c0_i32_0 = arith.constant 0 : i32
    return %arg0, %c0_i32, %arg1 : i32, i32, i32
  }
}

module attributes {stable_mosaic.version = 11 : i64} {
  func.func @_affine_lrelu_kernel(%arg0: i32, %arg1: memref<1x18x128xbf16, #tpu.memory_space<vmem>>, %arg2: memref<1x128xf32, #tpu.memory_space<vmem>>, %arg3: memref<1x128xf32, #tpu.memory_space<vmem>>, %arg4: memref<1x18x128xbf16, #tpu.memory_space<vmem>>) attributes {dimension_semantics = [#tpu.dimension_semantics<parallel>], iteration_bounds = array<i64: 2>, scalar_prefetch = 0 : i64, scratch_operands = 0 : i64, tpu.core_type = #tpu.core_type<tc>, window_params = [{transform_indices = @transform_0, window_bounds = array<i64: 1, 18, 128>}, {pipeline_mode = #tpu.pipeline_mode<synchronous>, transform_indices = @transform_1, window_bounds = array<i64: 1, 128>}, {pipeline_mode = #tpu.pipeline_mode<synchronous>, transform_indices = @transform_2, window_bounds = array<i64: 1, 128>}, {transform_indices = @transform_3, window_bounds = array<i64: 1, 18, 128>}]} {
    %c0 = arith.constant 0 : index
    %c0_0 = arith.constant 0 : index
    %0 = vector.load %arg2[%c0, %c0_0] : memref<1x128xf32, #tpu.memory_space<vmem>>, vector<1x128xf32>
    %1 = vector.shape_cast %0 : vector<1x128xf32> to vector<1x1x128xf32>
    %c0_1 = arith.constant 0 : index
    %c0_2 = arith.constant 0 : index
    %2 = vector.load %arg3[%c0_1, %c0_2] : memref<1x128xf32, #tpu.memory_space<vmem>>, vector<1x128xf32>
    %3 = vector.shape_cast %2 : vector<1x128xf32> to vector<1x1x128xf32>
    %c0_3 = arith.constant 0 : index
    %c0_4 = arith.constant 0 : index
    %c0_5 = arith.constant 0 : index
    %4 = vector.load %arg1[%c0_3, %c0_4, %c0_5] : memref<1x18x128xbf16, #tpu.memory_space<vmem>>, vector<1x18x128xbf16>
    %5 = arith.extf %4 : vector<1x18x128xbf16> to vector<1x18x128xf32>
    %6 = vector.broadcast %1 : vector<1x1x128xf32> to vector<1x18x128xf32>
    %7 = arith.mulf %5, %6 : vector<1x18x128xf32>
    %8 = vector.broadcast %3 : vector<1x1x128xf32> to vector<1x18x128xf32>
    %9 = arith.addf %7, %8 : vector<1x18x128xf32>
    %cst = arith.constant 0.000000e+00 : f32
    %10 = vector.broadcast %cst : f32 to vector<1x18x128xf32>
    %11 = arith.cmpf oge, %9, %10 : vector<1x18x128xf32>
    %cst_6 = arith.constant 2.000000e-01 : f32
    %12 = vector.broadcast %cst_6 : f32 to vector<1x18x128xf32>
    %13 = arith.mulf %12, %9 : vector<1x18x128xf32>
    %14 = arith.select %11, %9, %13 : vector<1x18x128xi1>, vector<1x18x128xf32>
    %15 = arith.truncf %14 : vector<1x18x128xf32> to vector<1x18x128xbf16>
    %c0_7 = arith.constant 0 : index
    %c0_8 = arith.constant 0 : index
    %c0_9 = arith.constant 0 : index
    %16 = vector.load %arg4[%c0_7, %c0_8, %c0_9] : memref<1x18x128xbf16, #tpu.memory_space<vmem>>, vector<1x18x128xbf16>
    tpu.vector_store %arg4[%c0_7, %c0_8, %c0_9], %15 {strides = array<i32>} : memref<1x18x128xbf16, #tpu.memory_space<vmem>>, vector<1x18x128xbf16>,
    return
  }
  func.func @transform_0(%arg0: i32) -> (i32, i32, i32) {
    %c0_i32 = arith.constant 0 : i32
    %c0_i32_0 = arith.constant 0 : i32
    %c0_i32_1 = arith.constant 0 : i32
    return %arg0, %c0_i32, %c0_i32_0 : i32, i32, i32
  }
  func.func @transform_1(%arg0: i32) -> (i32, i32) {
    %c0_i32 = arith.constant 0 : i32
    %c0_i32_0 = arith.constant 0 : i32
    %c0_i32_1 = arith.constant 0 : i32
    return %c0_i32, %c0_i32_0 : i32, i32
  }
  func.func @transform_2(%arg0: i32) -> (i32, i32) {
    %c0_i32 = arith.constant 0 : i32
    %c0_i32_0 = arith.constant 0 : i32
    %c0_i32_1 = arith.constant 0 : i32
    return %c0_i32, %c0_i32_0 : i32, i32
  }
  func.func @transform_3(%arg0: i32) -> (i32, i32, i32) {
    %c0_i32 = arith.constant 0 : i32
    %c0_i32_0 = arith.constant 0 : i32
    %c0_i32_1 = arith.constant 0 : i32
    return %arg0, %c0_i32, %c0_i32_0 : i32, i32, i32
  }
}

module attributes {stable_mosaic.version = 11 : i64} {
  func.func @_conv_stats_kernel(%arg0: i32, %arg1: i32, %arg2: memref<1x42x32xbf16, #tpu.memory_space<vmem>>, %arg3: memref<16x32x128xbf16, #tpu.memory_space<vmem>>, %arg4: memref<1x18x128xbf16, #tpu.memory_space<vmem>>, %arg5: memref<1x2x128xf32, #tpu.memory_space<vmem>>) attributes {dimension_semantics = [#tpu.dimension_semantics<parallel>, #tpu.dimension_semantics<parallel>], iteration_bounds = array<i64: 2, 1>, scalar_prefetch = 0 : i64, scratch_operands = 0 : i64, tpu.core_type = #tpu.core_type<tc>, window_params = [{transform_indices = @transform_0, window_bounds = array<i64: 1, 42, 32>}, {transform_indices = @transform_1, window_bounds = array<i64: 16, 32, 128>}, {transform_indices = @transform_2, window_bounds = array<i64: 1, 18, 128>}, {transform_indices = @transform_3, window_bounds = array<i64: 1, 2, 128>}]} {
    %c0 = arith.constant 0 : index
    %c0_0 = arith.constant 0 : index
    %c0_1 = arith.constant 0 : index
    %0 = vector.load %arg2[%c0, %c0_0, %c0_1] : memref<1x42x32xbf16, #tpu.memory_space<vmem>>, vector<1x18x32xbf16>
    %1 = vector.shape_cast %0 : vector<1x18x32xbf16> to vector<18x32xbf16>
    %c0_2 = arith.constant 0 : index
    %c0_3 = arith.constant 0 : index
    %c0_4 = arith.constant 0 : index
    %2 = vector.load %arg3[%c0_2, %c0_3, %c0_4] : memref<16x32x128xbf16, #tpu.memory_space<vmem>>, vector<1x32x128xbf16>
    %3 = vector.shape_cast %2 : vector<1x32x128xbf16> to vector<32x128xbf16>
    %cst = arith.constant dense<0.000000e+00> : vector<18x128xf32>
    %4 = tpu.matmul %1, %3, %cst {dimension_numbers = #tpu.dot_dimension_numbers<[1], [0], [0], [1], [0, 0, 1, 1], [], []>} : vector<18x32xbf16>, vector<32x128xbf16>, vector<18x128xf32> -> vector<18x128xf32>
    %c0_5 = arith.constant 0 : index
    %c1 = arith.constant 1 : index
    %c0_6 = arith.constant 0 : index
    %5 = vector.load %arg2[%c0_5, %c1, %c0_6] : memref<1x42x32xbf16, #tpu.memory_space<vmem>>, vector<1x18x32xbf16>
    %6 = vector.shape_cast %5 : vector<1x18x32xbf16> to vector<18x32xbf16>
    %c1_7 = arith.constant 1 : index
    %c0_8 = arith.constant 0 : index
    %c0_9 = arith.constant 0 : index
    %7 = vector.load %arg3[%c1_7, %c0_8, %c0_9] : memref<16x32x128xbf16, #tpu.memory_space<vmem>>, vector<1x32x128xbf16>
    %8 = vector.shape_cast %7 : vector<1x32x128xbf16> to vector<32x128xbf16>
    %cst_10 = arith.constant dense<0.000000e+00> : vector<18x128xf32>
    %9 = tpu.matmul %6, %8, %cst_10 {dimension_numbers = #tpu.dot_dimension_numbers<[1], [0], [0], [1], [0, 0, 1, 1], [], []>} : vector<18x32xbf16>, vector<32x128xbf16>, vector<18x128xf32> -> vector<18x128xf32>
    %10 = arith.addf %4, %9 : vector<18x128xf32>
    %c0_11 = arith.constant 0 : index
    %c2 = arith.constant 2 : index
    %c0_12 = arith.constant 0 : index
    %11 = vector.load %arg2[%c0_11, %c2, %c0_12] : memref<1x42x32xbf16, #tpu.memory_space<vmem>>, vector<1x18x32xbf16>
    %12 = vector.shape_cast %11 : vector<1x18x32xbf16> to vector<18x32xbf16>
    %c2_13 = arith.constant 2 : index
    %c0_14 = arith.constant 0 : index
    %c0_15 = arith.constant 0 : index
    %13 = vector.load %arg3[%c2_13, %c0_14, %c0_15] : memref<16x32x128xbf16, #tpu.memory_space<vmem>>, vector<1x32x128xbf16>
    %14 = vector.shape_cast %13 : vector<1x32x128xbf16> to vector<32x128xbf16>
    %cst_16 = arith.constant dense<0.000000e+00> : vector<18x128xf32>
    %15 = tpu.matmul %12, %14, %cst_16 {dimension_numbers = #tpu.dot_dimension_numbers<[1], [0], [0], [1], [0, 0, 1, 1], [], []>} : vector<18x32xbf16>, vector<32x128xbf16>, vector<18x128xf32> -> vector<18x128xf32>
    %16 = arith.addf %10, %15 : vector<18x128xf32>
    %c0_17 = arith.constant 0 : index
    %c3 = arith.constant 3 : index
    %c0_18 = arith.constant 0 : index
    %17 = vector.load %arg2[%c0_17, %c3, %c0_18] : memref<1x42x32xbf16, #tpu.memory_space<vmem>>, vector<1x18x32xbf16>
    %18 = vector.shape_cast %17 : vector<1x18x32xbf16> to vector<18x32xbf16>
    %c3_19 = arith.constant 3 : index
    %c0_20 = arith.constant 0 : index
    %c0_21 = arith.constant 0 : index
    %19 = vector.load %arg3[%c3_19, %c0_20, %c0_21] : memref<16x32x128xbf16, #tpu.memory_space<vmem>>, vector<1x32x128xbf16>
    %20 = vector.shape_cast %19 : vector<1x32x128xbf16> to vector<32x128xbf16>
    %cst_22 = arith.constant dense<0.000000e+00> : vector<18x128xf32>
    %21 = tpu.matmul %18, %20, %cst_22 {dimension_numbers = #tpu.dot_dimension_numbers<[1], [0], [0], [1], [0, 0, 1, 1], [], []>} : vector<18x32xbf16>, vector<32x128xbf16>, vector<18x128xf32> -> vector<18x128xf32>
    %22 = arith.addf %16, %21 : vector<18x128xf32>
    %c0_23 = arith.constant 0 : index
    %c6 = arith.constant 6 : index
    %c0_24 = arith.constant 0 : index
    %23 = vector.load %arg2[%c0_23, %c6, %c0_24] : memref<1x42x32xbf16, #tpu.memory_space<vmem>>, vector<1x18x32xbf16>
    %24 = vector.shape_cast %23 : vector<1x18x32xbf16> to vector<18x32xbf16>
    %c4 = arith.constant 4 : index
    %c0_25 = arith.constant 0 : index
    %c0_26 = arith.constant 0 : index
    %25 = vector.load %arg3[%c4, %c0_25, %c0_26] : memref<16x32x128xbf16, #tpu.memory_space<vmem>>, vector<1x32x128xbf16>
    %26 = vector.shape_cast %25 : vector<1x32x128xbf16> to vector<32x128xbf16>
    %cst_27 = arith.constant dense<0.000000e+00> : vector<18x128xf32>
    %27 = tpu.matmul %24, %26, %cst_27 {dimension_numbers = #tpu.dot_dimension_numbers<[1], [0], [0], [1], [0, 0, 1, 1], [], []>} : vector<18x32xbf16>, vector<32x128xbf16>, vector<18x128xf32> -> vector<18x128xf32>
    %28 = arith.addf %22, %27 : vector<18x128xf32>
    %c0_28 = arith.constant 0 : index
    %c7 = arith.constant 7 : index
    %c0_29 = arith.constant 0 : index
    %29 = vector.load %arg2[%c0_28, %c7, %c0_29] : memref<1x42x32xbf16, #tpu.memory_space<vmem>>, vector<1x18x32xbf16>
    %30 = vector.shape_cast %29 : vector<1x18x32xbf16> to vector<18x32xbf16>
    %c5 = arith.constant 5 : index
    %c0_30 = arith.constant 0 : index
    %c0_31 = arith.constant 0 : index
    %31 = vector.load %arg3[%c5, %c0_30, %c0_31] : memref<16x32x128xbf16, #tpu.memory_space<vmem>>, vector<1x32x128xbf16>
    %32 = vector.shape_cast %31 : vector<1x32x128xbf16> to vector<32x128xbf16>
    %cst_32 = arith.constant dense<0.000000e+00> : vector<18x128xf32>
    %33 = tpu.matmul %30, %32, %cst_32 {dimension_numbers = #tpu.dot_dimension_numbers<[1], [0], [0], [1], [0, 0, 1, 1], [], []>} : vector<18x32xbf16>, vector<32x128xbf16>, vector<18x128xf32> -> vector<18x128xf32>
    %34 = arith.addf %28, %33 : vector<18x128xf32>
    %c0_33 = arith.constant 0 : index
    %c8 = arith.constant 8 : index
    %c0_34 = arith.constant 0 : index
    %35 = vector.load %arg2[%c0_33, %c8, %c0_34] : memref<1x42x32xbf16, #tpu.memory_space<vmem>>, vector<1x18x32xbf16>
    %36 = vector.shape_cast %35 : vector<1x18x32xbf16> to vector<18x32xbf16>
    %c6_35 = arith.constant 6 : index
    %c0_36 = arith.constant 0 : index
    %c0_37 = arith.constant 0 : index
    %37 = vector.load %arg3[%c6_35, %c0_36, %c0_37] : memref<16x32x128xbf16, #tpu.memory_space<vmem>>, vector<1x32x128xbf16>
    %38 = vector.shape_cast %37 : vector<1x32x128xbf16> to vector<32x128xbf16>
    %cst_38 = arith.constant dense<0.000000e+00> : vector<18x128xf32>
    %39 = tpu.matmul %36, %38, %cst_38 {dimension_numbers = #tpu.dot_dimension_numbers<[1], [0], [0], [1], [0, 0, 1, 1], [], []>} : vector<18x32xbf16>, vector<32x128xbf16>, vector<18x128xf32> -> vector<18x128xf32>
    %40 = arith.addf %34, %39 : vector<18x128xf32>
    %c0_39 = arith.constant 0 : index
    %c9 = arith.constant 9 : index
    %c0_40 = arith.constant 0 : index
    %41 = vector.load %arg2[%c0_39, %c9, %c0_40] : memref<1x42x32xbf16, #tpu.memory_space<vmem>>, vector<1x18x32xbf16>
    %42 = vector.shape_cast %41 : vector<1x18x32xbf16> to vector<18x32xbf16>
    %c7_41 = arith.constant 7 : index
    %c0_42 = arith.constant 0 : index
    %c0_43 = arith.constant 0 : index
    %43 = vector.load %arg3[%c7_41, %c0_42, %c0_43] : memref<16x32x128xbf16, #tpu.memory_space<vmem>>, vector<1x32x128xbf16>
    %44 = vector.shape_cast %43 : vector<1x32x128xbf16> to vector<32x128xbf16>
    %cst_44 = arith.constant dense<0.000000e+00> : vector<18x128xf32>
    %45 = tpu.matmul %42, %44, %cst_44 {dimension_numbers = #tpu.dot_dimension_numbers<[1], [0], [0], [1], [0, 0, 1, 1], [], []>} : vector<18x32xbf16>, vector<32x128xbf16>, vector<18x128xf32> -> vector<18x128xf32>
    %46 = arith.addf %40, %45 : vector<18x128xf32>
    %c0_45 = arith.constant 0 : index
    %c12 = arith.constant 12 : index
    %c0_46 = arith.constant 0 : index
    %47 = vector.load %arg2[%c0_45, %c12, %c0_46] : memref<1x42x32xbf16, #tpu.memory_space<vmem>>, vector<1x18x32xbf16>
    %48 = vector.shape_cast %47 : vector<1x18x32xbf16> to vector<18x32xbf16>
    %c8_47 = arith.constant 8 : index
    %c0_48 = arith.constant 0 : index
    %c0_49 = arith.constant 0 : index
    %49 = vector.load %arg3[%c8_47, %c0_48, %c0_49] : memref<16x32x128xbf16, #tpu.memory_space<vmem>>, vector<1x32x128xbf16>
    %50 = vector.shape_cast %49 : vector<1x32x128xbf16> to vector<32x128xbf16>
    %cst_50 = arith.constant dense<0.000000e+00> : vector<18x128xf32>
    %51 = tpu.matmul %48, %50, %cst_50 {dimension_numbers = #tpu.dot_dimension_numbers<[1], [0], [0], [1], [0, 0, 1, 1], [], []>} : vector<18x32xbf16>, vector<32x128xbf16>, vector<18x128xf32> -> vector<18x128xf32>
    %52 = arith.addf %46, %51 : vector<18x128xf32>
    %c0_51 = arith.constant 0 : index
    %c13 = arith.constant 13 : index
    %c0_52 = arith.constant 0 : index
    %53 = vector.load %arg2[%c0_51, %c13, %c0_52] : memref<1x42x32xbf16, #tpu.memory_space<vmem>>, vector<1x18x32xbf16>
    %54 = vector.shape_cast %53 : vector<1x18x32xbf16> to vector<18x32xbf16>
    %c9_53 = arith.constant 9 : index
    %c0_54 = arith.constant 0 : index
    %c0_55 = arith.constant 0 : index
    %55 = vector.load %arg3[%c9_53, %c0_54, %c0_55] : memref<16x32x128xbf16, #tpu.memory_space<vmem>>, vector<1x32x128xbf16>
    %56 = vector.shape_cast %55 : vector<1x32x128xbf16> to vector<32x128xbf16>
    %cst_56 = arith.constant dense<0.000000e+00> : vector<18x128xf32>
    %57 = tpu.matmul %54, %56, %cst_56 {dimension_numbers = #tpu.dot_dimension_numbers<[1], [0], [0], [1], [0, 0, 1, 1], [], []>} : vector<18x32xbf16>, vector<32x128xbf16>, vector<18x128xf32> -> vector<18x128xf32>
    %58 = arith.addf %52, %57 : vector<18x128xf32>
    %c0_57 = arith.constant 0 : index
    %c14 = arith.constant 14 : index
    %c0_58 = arith.constant 0 : index
    %59 = vector.load %arg2[%c0_57, %c14, %c0_58] : memref<1x42x32xbf16, #tpu.memory_space<vmem>>, vector<1x18x32xbf16>
    %60 = vector.shape_cast %59 : vector<1x18x32xbf16> to vector<18x32xbf16>
    %c10 = arith.constant 10 : index
    %c0_59 = arith.constant 0 : index
    %c0_60 = arith.constant 0 : index
    %61 = vector.load %arg3[%c10, %c0_59, %c0_60] : memref<16x32x128xbf16, #tpu.memory_space<vmem>>, vector<1x32x128xbf16>
    %62 = vector.shape_cast %61 : vector<1x32x128xbf16> to vector<32x128xbf16>
    %cst_61 = arith.constant dense<0.000000e+00> : vector<18x128xf32>
    %63 = tpu.matmul %60, %62, %cst_61 {dimension_numbers = #tpu.dot_dimension_numbers<[1], [0], [0], [1], [0, 0, 1, 1], [], []>} : vector<18x32xbf16>, vector<32x128xbf16>, vector<18x128xf32> -> vector<18x128xf32>
    %64 = arith.addf %58, %63 : vector<18x128xf32>
    %c0_62 = arith.constant 0 : index
    %c15 = arith.constant 15 : index
    %c0_63 = arith.constant 0 : index
    %65 = vector.load %arg2[%c0_62, %c15, %c0_63] : memref<1x42x32xbf16, #tpu.memory_space<vmem>>, vector<1x18x32xbf16>
    %66 = vector.shape_cast %65 : vector<1x18x32xbf16> to vector<18x32xbf16>
    %c11 = arith.constant 11 : index
    %c0_64 = arith.constant 0 : index
    %c0_65 = arith.constant 0 : index
    %67 = vector.load %arg3[%c11, %c0_64, %c0_65] : memref<16x32x128xbf16, #tpu.memory_space<vmem>>, vector<1x32x128xbf16>
    %68 = vector.shape_cast %67 : vector<1x32x128xbf16> to vector<32x128xbf16>
    %cst_66 = arith.constant dense<0.000000e+00> : vector<18x128xf32>
    %69 = tpu.matmul %66, %68, %cst_66 {dimension_numbers = #tpu.dot_dimension_numbers<[1], [0], [0], [1], [0, 0, 1, 1], [], []>} : vector<18x32xbf16>, vector<32x128xbf16>, vector<18x128xf32> -> vector<18x128xf32>
    %70 = arith.addf %64, %69 : vector<18x128xf32>
    %c0_67 = arith.constant 0 : index
    %c18 = arith.constant 18 : index
    %c0_68 = arith.constant 0 : index
    %71 = vector.load %arg2[%c0_67, %c18, %c0_68] : memref<1x42x32xbf16, #tpu.memory_space<vmem>>, vector<1x18x32xbf16>
    %72 = vector.shape_cast %71 : vector<1x18x32xbf16> to vector<18x32xbf16>
    %c12_69 = arith.constant 12 : index
    %c0_70 = arith.constant 0 : index
    %c0_71 = arith.constant 0 : index
    %73 = vector.load %arg3[%c12_69, %c0_70, %c0_71] : memref<16x32x128xbf16, #tpu.memory_space<vmem>>, vector<1x32x128xbf16>
    %74 = vector.shape_cast %73 : vector<1x32x128xbf16> to vector<32x128xbf16>
    %cst_72 = arith.constant dense<0.000000e+00> : vector<18x128xf32>
    %75 = tpu.matmul %72, %74, %cst_72 {dimension_numbers = #tpu.dot_dimension_numbers<[1], [0], [0], [1], [0, 0, 1, 1], [], []>} : vector<18x32xbf16>, vector<32x128xbf16>, vector<18x128xf32> -> vector<18x128xf32>
    %76 = arith.addf %70, %75 : vector<18x128xf32>
    %c0_73 = arith.constant 0 : index
    %c19 = arith.constant 19 : index
    %c0_74 = arith.constant 0 : index
    %77 = vector.load %arg2[%c0_73, %c19, %c0_74] : memref<1x42x32xbf16, #tpu.memory_space<vmem>>, vector<1x18x32xbf16>
    %78 = vector.shape_cast %77 : vector<1x18x32xbf16> to vector<18x32xbf16>
    %c13_75 = arith.constant 13 : index
    %c0_76 = arith.constant 0 : index
    %c0_77 = arith.constant 0 : index
    %79 = vector.load %arg3[%c13_75, %c0_76, %c0_77] : memref<16x32x128xbf16, #tpu.memory_space<vmem>>, vector<1x32x128xbf16>
    %80 = vector.shape_cast %79 : vector<1x32x128xbf16> to vector<32x128xbf16>
    %cst_78 = arith.constant dense<0.000000e+00> : vector<18x128xf32>
    %81 = tpu.matmul %78, %80, %cst_78 {dimension_numbers = #tpu.dot_dimension_numbers<[1], [0], [0], [1], [0, 0, 1, 1], [], []>} : vector<18x32xbf16>, vector<32x128xbf16>, vector<18x128xf32> -> vector<18x128xf32>
    %82 = arith.addf %76, %81 : vector<18x128xf32>
    %c0_79 = arith.constant 0 : index
    %c20 = arith.constant 20 : index
    %c0_80 = arith.constant 0 : index
    %83 = vector.load %arg2[%c0_79, %c20, %c0_80] : memref<1x42x32xbf16, #tpu.memory_space<vmem>>, vector<1x18x32xbf16>
    %84 = vector.shape_cast %83 : vector<1x18x32xbf16> to vector<18x32xbf16>
    %c14_81 = arith.constant 14 : index
    %c0_82 = arith.constant 0 : index
    %c0_83 = arith.constant 0 : index
    %85 = vector.load %arg3[%c14_81, %c0_82, %c0_83] : memref<16x32x128xbf16, #tpu.memory_space<vmem>>, vector<1x32x128xbf16>
    %86 = vector.shape_cast %85 : vector<1x32x128xbf16> to vector<32x128xbf16>
    %cst_84 = arith.constant dense<0.000000e+00> : vector<18x128xf32>
    %87 = tpu.matmul %84, %86, %cst_84 {dimension_numbers = #tpu.dot_dimension_numbers<[1], [0], [0], [1], [0, 0, 1, 1], [], []>} : vector<18x32xbf16>, vector<32x128xbf16>, vector<18x128xf32> -> vector<18x128xf32>
    %88 = arith.addf %82, %87 : vector<18x128xf32>
    %c0_85 = arith.constant 0 : index
    %c21 = arith.constant 21 : index
    %c0_86 = arith.constant 0 : index
    %89 = vector.load %arg2[%c0_85, %c21, %c0_86] : memref<1x42x32xbf16, #tpu.memory_space<vmem>>, vector<1x18x32xbf16>
    %90 = vector.shape_cast %89 : vector<1x18x32xbf16> to vector<18x32xbf16>
    %c15_87 = arith.constant 15 : index
    %c0_88 = arith.constant 0 : index
    %c0_89 = arith.constant 0 : index
    %91 = vector.load %arg3[%c15_87, %c0_88, %c0_89] : memref<16x32x128xbf16, #tpu.memory_space<vmem>>, vector<1x32x128xbf16>
    %92 = vector.shape_cast %91 : vector<1x32x128xbf16> to vector<32x128xbf16>
    %cst_90 = arith.constant dense<0.000000e+00> : vector<18x128xf32>
    %93 = tpu.matmul %90, %92, %cst_90 {dimension_numbers = #tpu.dot_dimension_numbers<[1], [0], [0], [1], [0, 0, 1, 1], [], []>} : vector<18x32xbf16>, vector<32x128xbf16>, vector<18x128xf32> -> vector<18x128xf32>
    %94 = arith.addf %88, %93 : vector<18x128xf32>
    %95 = tpu.iota {dimensions = array<i32: 0>} : vector<18x1xi32>
    %c6_i32 = arith.constant 6 : i32
    %c0_i32 = arith.constant 0 : i32
    %96 = arith.cmpi eq, %c6_i32, %c0_i32 : i32
    %c1_i32 = arith.constant 1 : i32
    %97 = arith.select %96, %c1_i32, %c6_i32 : i32
    %98 = vector.broadcast %97 : i32 to vector<18x1xi32>
    %99 = arith.remsi %95, %98 : vector<18x1xi32>
    %c0_i32_91 = arith.constant 0 : i32
    %100 = vector.broadcast %c0_i32_91 : i32 to vector<18x1xi32>
    %101 = arith.cmpi ne, %99, %100 : vector<18x1xi32>
    %c0_i32_92 = arith.constant 0 : i32
    %102 = vector.broadcast %c0_i32_92 : i32 to vector<18x1xi32>
    %103 = arith.cmpi slt, %99, %102 : vector<18x1xi32>
    %c0_i32_93 = arith.constant 0 : i32
    %104 = arith.cmpi slt, %97, %c0_i32_93 : i32
    %105 = vector.broadcast %104 : i1 to vector<18x1xi1>
    %106 = vector.broadcast %105 : vector<18x1xi1> to vector<18x1xi1>
    %107 = arith.xori %103, %106 : vector<18x1xi1>
    %108 = arith.andi %107, %101 : vector<18x1xi1>
    %109 = vector.broadcast %97 : i32 to vector<18x1xi32>
    %110 = arith.addi %99, %109 : vector<18x1xi32>
    %111 = arith.select %108, %110, %99 : vector<18x1xi1>, vector<18x1xi32>
    %c3_i32 = arith.constant 3 : i32
    %112 = vector.broadcast %c3_i32 : i32 to vector<18x1xi32>
    %113 = arith.cmpi slt, %111, %112 : vector<18x1xi32>
    %cst_94 = arith.constant 0.000000e+00 : f32
    %114 = vector.shape_cast %113 : vector<18x1xi1> to vector<18x1xi1>
    %115 = vector.broadcast %114 : vector<18x1xi1> to vector<18x128xi1>
    %116 = vector.broadcast %cst_94 : f32 to vector<18x128xf32>
    %117 = arith.select %115, %94, %116 : vector<18x128xi1>, vector<18x128xf32>
    %cst_95 = arith.constant dense<0.000000e+00> : vector<128xf32>
    %118 = vector.multi_reduction <add>, %117, %cst_95 [0] : vector<18x128xf32> to vector<128xf32>
    %119 = vector.shape_cast %118 : vector<128xf32> to vector<1x128xf32>
    %c0_96 = arith.constant 0 : index
    %c0_97 = arith.constant 0 : index
    %c0_98 = arith.constant 0 : index
    %120 = vector.load %arg5[%c0_96, %c0_97, %c0_98] : memref<1x2x128xf32, #tpu.memory_space<vmem>>, vector<1x1x128xf32>
    %121 = vector.shape_cast %120 : vector<1x1x128xf32> to vector<1x128xf32>
    %122 = vector.shape_cast %119 : vector<1x128xf32> to vector<1x1x128xf32>
    tpu.vector_store %arg5[%c0_96, %c0_97, %c0_98], %122 {strides = array<i32>} : memref<1x2x128xf32, #tpu.memory_space<vmem>>, vector<1x1x128xf32>,
    %123 = arith.mulf %117, %117 : vector<18x128xf32>
    %cst_99 = arith.constant dense<0.000000e+00> : vector<128xf32>
    %124 = vector.multi_reduction <add>, %123, %cst_99 [0] : vector<18x128xf32> to vector<128xf32>
    %125 = vector.shape_cast %124 : vector<128xf32> to vector<1x128xf32>
    %c0_100 = arith.constant 0 : index
    %c1_101 = arith.constant 1 : index
    %c0_102 = arith.constant 0 : index
    %126 = vector.load %arg5[%c0_100, %c1_101, %c0_102] : memref<1x2x128xf32, #tpu.memory_space<vmem>>, vector<1x1x128xf32>
    %127 = vector.shape_cast %126 : vector<1x1x128xf32> to vector<1x128xf32>
    %128 = vector.shape_cast %125 : vector<1x128xf32> to vector<1x1x128xf32>
    tpu.vector_store %arg5[%c0_100, %c1_101, %c0_102], %128 {strides = array<i32>} : memref<1x2x128xf32, #tpu.memory_space<vmem>>, vector<1x1x128xf32>,
    %129 = arith.truncf %94 : vector<18x128xf32> to vector<18x128xbf16>
    %c0_103 = arith.constant 0 : index
    %c0_104 = arith.constant 0 : index
    %c0_105 = arith.constant 0 : index
    %130 = vector.load %arg4[%c0_103, %c0_104, %c0_105] : memref<1x18x128xbf16, #tpu.memory_space<vmem>>, vector<1x18x128xbf16>
    %131 = vector.shape_cast %130 : vector<1x18x128xbf16> to vector<18x128xbf16>
    %132 = vector.shape_cast %129 : vector<18x128xbf16> to vector<1x18x128xbf16>
    tpu.vector_store %arg4[%c0_103, %c0_104, %c0_105], %132 {strides = array<i32>} : memref<1x18x128xbf16, #tpu.memory_space<vmem>>, vector<1x18x128xbf16>,
    return
  }
  func.func @transform_0(%arg0: i32, %arg1: i32) -> (i32, i32, i32) {
    %c0_i32 = arith.constant 0 : i32
    %c0_i32_0 = arith.constant 0 : i32
    %c0_i32_1 = arith.constant 0 : i32
    return %arg0, %c0_i32, %c0_i32_0 : i32, i32, i32
  }
  func.func @transform_1(%arg0: i32, %arg1: i32) -> (i32, i32, i32) {
    %c0_i32 = arith.constant 0 : i32
    %c0_i32_0 = arith.constant 0 : i32
    %c0_i32_1 = arith.constant 0 : i32
    return %c0_i32, %c0_i32_0, %arg1 : i32, i32, i32
  }
  func.func @transform_2(%arg0: i32, %arg1: i32) -> (i32, i32, i32) {
    %c0_i32 = arith.constant 0 : i32
    %c0_i32_0 = arith.constant 0 : i32
    return %arg0, %c0_i32, %arg1 : i32, i32, i32
  }
  func.func @transform_3(%arg0: i32, %arg1: i32) -> (i32, i32, i32) {
    %c0_i32 = arith.constant 0 : i32
    %c0_i32_0 = arith.constant 0 : i32
    return %arg0, %c0_i32, %arg1 : i32, i32, i32
  }
}

module attributes {stable_mosaic.version = 11 : i64} {
  func.func @_conv_bias_act_kernel(%arg0: i32, %arg1: i32, %arg2: memref<1x30x64xbf16, #tpu.memory_space<vmem>>, %arg3: memref<16x64x128xbf16, #tpu.memory_space<vmem>>, %arg4: memref<1x128xf32, #tpu.memory_space<vmem>>, %arg5: memref<1x10x128xf32, #tpu.memory_space<vmem>>) attributes {dimension_semantics = [#tpu.dimension_semantics<parallel>, #tpu.dimension_semantics<parallel>], iteration_bounds = array<i64: 2, 1>, scalar_prefetch = 0 : i64, scratch_operands = 0 : i64, tpu.core_type = #tpu.core_type<tc>, window_params = [{transform_indices = @transform_0, window_bounds = array<i64: 1, 30, 64>}, {transform_indices = @transform_1, window_bounds = array<i64: 16, 64, 128>}, {transform_indices = @transform_2, window_bounds = array<i64: 1, 128>}, {transform_indices = @transform_3, window_bounds = array<i64: 1, 10, 128>}]} {
    %c0 = arith.constant 0 : index
    %c0_0 = arith.constant 0 : index
    %c0_1 = arith.constant 0 : index
    %0 = vector.load %arg2[%c0, %c0_0, %c0_1] : memref<1x30x64xbf16, #tpu.memory_space<vmem>>, vector<1x10x64xbf16>
    %1 = vector.shape_cast %0 : vector<1x10x64xbf16> to vector<10x64xbf16>
    %c0_2 = arith.constant 0 : index
    %c0_3 = arith.constant 0 : index
    %c0_4 = arith.constant 0 : index
    %2 = vector.load %arg3[%c0_2, %c0_3, %c0_4] : memref<16x64x128xbf16, #tpu.memory_space<vmem>>, vector<1x64x128xbf16>
    %3 = vector.shape_cast %2 : vector<1x64x128xbf16> to vector<64x128xbf16>
    %cst = arith.constant dense<0.000000e+00> : vector<10x128xf32>
    %4 = tpu.matmul %1, %3, %cst {dimension_numbers = #tpu.dot_dimension_numbers<[1], [0], [0], [1], [0, 0, 1, 1], [], []>} : vector<10x64xbf16>, vector<64x128xbf16>, vector<10x128xf32> -> vector<10x128xf32>
    %c0_5 = arith.constant 0 : index
    %c1 = arith.constant 1 : index
    %c0_6 = arith.constant 0 : index
    %5 = vector.load %arg2[%c0_5, %c1, %c0_6] : memref<1x30x64xbf16, #tpu.memory_space<vmem>>, vector<1x10x64xbf16>
    %6 = vector.shape_cast %5 : vector<1x10x64xbf16> to vector<10x64xbf16>
    %c1_7 = arith.constant 1 : index
    %c0_8 = arith.constant 0 : index
    %c0_9 = arith.constant 0 : index
    %7 = vector.load %arg3[%c1_7, %c0_8, %c0_9] : memref<16x64x128xbf16, #tpu.memory_space<vmem>>, vector<1x64x128xbf16>
    %8 = vector.shape_cast %7 : vector<1x64x128xbf16> to vector<64x128xbf16>
    %cst_10 = arith.constant dense<0.000000e+00> : vector<10x128xf32>
    %9 = tpu.matmul %6, %8, %cst_10 {dimension_numbers = #tpu.dot_dimension_numbers<[1], [0], [0], [1], [0, 0, 1, 1], [], []>} : vector<10x64xbf16>, vector<64x128xbf16>, vector<10x128xf32> -> vector<10x128xf32>
    %10 = arith.addf %4, %9 : vector<10x128xf32>
    %c0_11 = arith.constant 0 : index
    %c2 = arith.constant 2 : index
    %c0_12 = arith.constant 0 : index
    %11 = vector.load %arg2[%c0_11, %c2, %c0_12] : memref<1x30x64xbf16, #tpu.memory_space<vmem>>, vector<1x10x64xbf16>
    %12 = vector.shape_cast %11 : vector<1x10x64xbf16> to vector<10x64xbf16>
    %c2_13 = arith.constant 2 : index
    %c0_14 = arith.constant 0 : index
    %c0_15 = arith.constant 0 : index
    %13 = vector.load %arg3[%c2_13, %c0_14, %c0_15] : memref<16x64x128xbf16, #tpu.memory_space<vmem>>, vector<1x64x128xbf16>
    %14 = vector.shape_cast %13 : vector<1x64x128xbf16> to vector<64x128xbf16>
    %cst_16 = arith.constant dense<0.000000e+00> : vector<10x128xf32>
    %15 = tpu.matmul %12, %14, %cst_16 {dimension_numbers = #tpu.dot_dimension_numbers<[1], [0], [0], [1], [0, 0, 1, 1], [], []>} : vector<10x64xbf16>, vector<64x128xbf16>, vector<10x128xf32> -> vector<10x128xf32>
    %16 = arith.addf %10, %15 : vector<10x128xf32>
    %c0_17 = arith.constant 0 : index
    %c3 = arith.constant 3 : index
    %c0_18 = arith.constant 0 : index
    %17 = vector.load %arg2[%c0_17, %c3, %c0_18] : memref<1x30x64xbf16, #tpu.memory_space<vmem>>, vector<1x10x64xbf16>
    %18 = vector.shape_cast %17 : vector<1x10x64xbf16> to vector<10x64xbf16>
    %c3_19 = arith.constant 3 : index
    %c0_20 = arith.constant 0 : index
    %c0_21 = arith.constant 0 : index
    %19 = vector.load %arg3[%c3_19, %c0_20, %c0_21] : memref<16x64x128xbf16, #tpu.memory_space<vmem>>, vector<1x64x128xbf16>
    %20 = vector.shape_cast %19 : vector<1x64x128xbf16> to vector<64x128xbf16>
    %cst_22 = arith.constant dense<0.000000e+00> : vector<10x128xf32>
    %21 = tpu.matmul %18, %20, %cst_22 {dimension_numbers = #tpu.dot_dimension_numbers<[1], [0], [0], [1], [0, 0, 1, 1], [], []>} : vector<10x64xbf16>, vector<64x128xbf16>, vector<10x128xf32> -> vector<10x128xf32>
    %22 = arith.addf %16, %21 : vector<10x128xf32>
    %c0_23 = arith.constant 0 : index
    %c5 = arith.constant 5 : index
    %c0_24 = arith.constant 0 : index
    %23 = vector.load %arg2[%c0_23, %c5, %c0_24] : memref<1x30x64xbf16, #tpu.memory_space<vmem>>, vector<1x10x64xbf16>
    %24 = vector.shape_cast %23 : vector<1x10x64xbf16> to vector<10x64xbf16>
    %c4 = arith.constant 4 : index
    %c0_25 = arith.constant 0 : index
    %c0_26 = arith.constant 0 : index
    %25 = vector.load %arg3[%c4, %c0_25, %c0_26] : memref<16x64x128xbf16, #tpu.memory_space<vmem>>, vector<1x64x128xbf16>
    %26 = vector.shape_cast %25 : vector<1x64x128xbf16> to vector<64x128xbf16>
    %cst_27 = arith.constant dense<0.000000e+00> : vector<10x128xf32>
    %27 = tpu.matmul %24, %26, %cst_27 {dimension_numbers = #tpu.dot_dimension_numbers<[1], [0], [0], [1], [0, 0, 1, 1], [], []>} : vector<10x64xbf16>, vector<64x128xbf16>, vector<10x128xf32> -> vector<10x128xf32>
    %28 = arith.addf %22, %27 : vector<10x128xf32>
    %c0_28 = arith.constant 0 : index
    %c6 = arith.constant 6 : index
    %c0_29 = arith.constant 0 : index
    %29 = vector.load %arg2[%c0_28, %c6, %c0_29] : memref<1x30x64xbf16, #tpu.memory_space<vmem>>, vector<1x10x64xbf16>
    %30 = vector.shape_cast %29 : vector<1x10x64xbf16> to vector<10x64xbf16>
    %c5_30 = arith.constant 5 : index
    %c0_31 = arith.constant 0 : index
    %c0_32 = arith.constant 0 : index
    %31 = vector.load %arg3[%c5_30, %c0_31, %c0_32] : memref<16x64x128xbf16, #tpu.memory_space<vmem>>, vector<1x64x128xbf16>
    %32 = vector.shape_cast %31 : vector<1x64x128xbf16> to vector<64x128xbf16>
    %cst_33 = arith.constant dense<0.000000e+00> : vector<10x128xf32>
    %33 = tpu.matmul %30, %32, %cst_33 {dimension_numbers = #tpu.dot_dimension_numbers<[1], [0], [0], [1], [0, 0, 1, 1], [], []>} : vector<10x64xbf16>, vector<64x128xbf16>, vector<10x128xf32> -> vector<10x128xf32>
    %34 = arith.addf %28, %33 : vector<10x128xf32>
    %c0_34 = arith.constant 0 : index
    %c7 = arith.constant 7 : index
    %c0_35 = arith.constant 0 : index
    %35 = vector.load %arg2[%c0_34, %c7, %c0_35] : memref<1x30x64xbf16, #tpu.memory_space<vmem>>, vector<1x10x64xbf16>
    %36 = vector.shape_cast %35 : vector<1x10x64xbf16> to vector<10x64xbf16>
    %c6_36 = arith.constant 6 : index
    %c0_37 = arith.constant 0 : index
    %c0_38 = arith.constant 0 : index
    %37 = vector.load %arg3[%c6_36, %c0_37, %c0_38] : memref<16x64x128xbf16, #tpu.memory_space<vmem>>, vector<1x64x128xbf16>
    %38 = vector.shape_cast %37 : vector<1x64x128xbf16> to vector<64x128xbf16>
    %cst_39 = arith.constant dense<0.000000e+00> : vector<10x128xf32>
    %39 = tpu.matmul %36, %38, %cst_39 {dimension_numbers = #tpu.dot_dimension_numbers<[1], [0], [0], [1], [0, 0, 1, 1], [], []>} : vector<10x64xbf16>, vector<64x128xbf16>, vector<10x128xf32> -> vector<10x128xf32>
    %40 = arith.addf %34, %39 : vector<10x128xf32>
    %c0_40 = arith.constant 0 : index
    %c8 = arith.constant 8 : index
    %c0_41 = arith.constant 0 : index
    %41 = vector.load %arg2[%c0_40, %c8, %c0_41] : memref<1x30x64xbf16, #tpu.memory_space<vmem>>, vector<1x10x64xbf16>
    %42 = vector.shape_cast %41 : vector<1x10x64xbf16> to vector<10x64xbf16>
    %c7_42 = arith.constant 7 : index
    %c0_43 = arith.constant 0 : index
    %c0_44 = arith.constant 0 : index
    %43 = vector.load %arg3[%c7_42, %c0_43, %c0_44] : memref<16x64x128xbf16, #tpu.memory_space<vmem>>, vector<1x64x128xbf16>
    %44 = vector.shape_cast %43 : vector<1x64x128xbf16> to vector<64x128xbf16>
    %cst_45 = arith.constant dense<0.000000e+00> : vector<10x128xf32>
    %45 = tpu.matmul %42, %44, %cst_45 {dimension_numbers = #tpu.dot_dimension_numbers<[1], [0], [0], [1], [0, 0, 1, 1], [], []>} : vector<10x64xbf16>, vector<64x128xbf16>, vector<10x128xf32> -> vector<10x128xf32>
    %46 = arith.addf %40, %45 : vector<10x128xf32>
    %c0_46 = arith.constant 0 : index
    %c10 = arith.constant 10 : index
    %c0_47 = arith.constant 0 : index
    %47 = vector.load %arg2[%c0_46, %c10, %c0_47] : memref<1x30x64xbf16, #tpu.memory_space<vmem>>, vector<1x10x64xbf16>
    %48 = vector.shape_cast %47 : vector<1x10x64xbf16> to vector<10x64xbf16>
    %c8_48 = arith.constant 8 : index
    %c0_49 = arith.constant 0 : index
    %c0_50 = arith.constant 0 : index
    %49 = vector.load %arg3[%c8_48, %c0_49, %c0_50] : memref<16x64x128xbf16, #tpu.memory_space<vmem>>, vector<1x64x128xbf16>
    %50 = vector.shape_cast %49 : vector<1x64x128xbf16> to vector<64x128xbf16>
    %cst_51 = arith.constant dense<0.000000e+00> : vector<10x128xf32>
    %51 = tpu.matmul %48, %50, %cst_51 {dimension_numbers = #tpu.dot_dimension_numbers<[1], [0], [0], [1], [0, 0, 1, 1], [], []>} : vector<10x64xbf16>, vector<64x128xbf16>, vector<10x128xf32> -> vector<10x128xf32>
    %52 = arith.addf %46, %51 : vector<10x128xf32>
    %c0_52 = arith.constant 0 : index
    %c11 = arith.constant 11 : index
    %c0_53 = arith.constant 0 : index
    %53 = vector.load %arg2[%c0_52, %c11, %c0_53] : memref<1x30x64xbf16, #tpu.memory_space<vmem>>, vector<1x10x64xbf16>
    %54 = vector.shape_cast %53 : vector<1x10x64xbf16> to vector<10x64xbf16>
    %c9 = arith.constant 9 : index
    %c0_54 = arith.constant 0 : index
    %c0_55 = arith.constant 0 : index
    %55 = vector.load %arg3[%c9, %c0_54, %c0_55] : memref<16x64x128xbf16, #tpu.memory_space<vmem>>, vector<1x64x128xbf16>
    %56 = vector.shape_cast %55 : vector<1x64x128xbf16> to vector<64x128xbf16>
    %cst_56 = arith.constant dense<0.000000e+00> : vector<10x128xf32>
    %57 = tpu.matmul %54, %56, %cst_56 {dimension_numbers = #tpu.dot_dimension_numbers<[1], [0], [0], [1], [0, 0, 1, 1], [], []>} : vector<10x64xbf16>, vector<64x128xbf16>, vector<10x128xf32> -> vector<10x128xf32>
    %58 = arith.addf %52, %57 : vector<10x128xf32>
    %c0_57 = arith.constant 0 : index
    %c12 = arith.constant 12 : index
    %c0_58 = arith.constant 0 : index
    %59 = vector.load %arg2[%c0_57, %c12, %c0_58] : memref<1x30x64xbf16, #tpu.memory_space<vmem>>, vector<1x10x64xbf16>
    %60 = vector.shape_cast %59 : vector<1x10x64xbf16> to vector<10x64xbf16>
    %c10_59 = arith.constant 10 : index
    %c0_60 = arith.constant 0 : index
    %c0_61 = arith.constant 0 : index
    %61 = vector.load %arg3[%c10_59, %c0_60, %c0_61] : memref<16x64x128xbf16, #tpu.memory_space<vmem>>, vector<1x64x128xbf16>
    %62 = vector.shape_cast %61 : vector<1x64x128xbf16> to vector<64x128xbf16>
    %cst_62 = arith.constant dense<0.000000e+00> : vector<10x128xf32>
    %63 = tpu.matmul %60, %62, %cst_62 {dimension_numbers = #tpu.dot_dimension_numbers<[1], [0], [0], [1], [0, 0, 1, 1], [], []>} : vector<10x64xbf16>, vector<64x128xbf16>, vector<10x128xf32> -> vector<10x128xf32>
    %64 = arith.addf %58, %63 : vector<10x128xf32>
    %c0_63 = arith.constant 0 : index
    %c13 = arith.constant 13 : index
    %c0_64 = arith.constant 0 : index
    %65 = vector.load %arg2[%c0_63, %c13, %c0_64] : memref<1x30x64xbf16, #tpu.memory_space<vmem>>, vector<1x10x64xbf16>
    %66 = vector.shape_cast %65 : vector<1x10x64xbf16> to vector<10x64xbf16>
    %c11_65 = arith.constant 11 : index
    %c0_66 = arith.constant 0 : index
    %c0_67 = arith.constant 0 : index
    %67 = vector.load %arg3[%c11_65, %c0_66, %c0_67] : memref<16x64x128xbf16, #tpu.memory_space<vmem>>, vector<1x64x128xbf16>
    %68 = vector.shape_cast %67 : vector<1x64x128xbf16> to vector<64x128xbf16>
    %cst_68 = arith.constant dense<0.000000e+00> : vector<10x128xf32>
    %69 = tpu.matmul %66, %68, %cst_68 {dimension_numbers = #tpu.dot_dimension_numbers<[1], [0], [0], [1], [0, 0, 1, 1], [], []>} : vector<10x64xbf16>, vector<64x128xbf16>, vector<10x128xf32> -> vector<10x128xf32>
    %70 = arith.addf %64, %69 : vector<10x128xf32>
    %c0_69 = arith.constant 0 : index
    %c15 = arith.constant 15 : index
    %c0_70 = arith.constant 0 : index
    %71 = vector.load %arg2[%c0_69, %c15, %c0_70] : memref<1x30x64xbf16, #tpu.memory_space<vmem>>, vector<1x10x64xbf16>
    %72 = vector.shape_cast %71 : vector<1x10x64xbf16> to vector<10x64xbf16>
    %c12_71 = arith.constant 12 : index
    %c0_72 = arith.constant 0 : index
    %c0_73 = arith.constant 0 : index
    %73 = vector.load %arg3[%c12_71, %c0_72, %c0_73] : memref<16x64x128xbf16, #tpu.memory_space<vmem>>, vector<1x64x128xbf16>
    %74 = vector.shape_cast %73 : vector<1x64x128xbf16> to vector<64x128xbf16>
    %cst_74 = arith.constant dense<0.000000e+00> : vector<10x128xf32>
    %75 = tpu.matmul %72, %74, %cst_74 {dimension_numbers = #tpu.dot_dimension_numbers<[1], [0], [0], [1], [0, 0, 1, 1], [], []>} : vector<10x64xbf16>, vector<64x128xbf16>, vector<10x128xf32> -> vector<10x128xf32>
    %76 = arith.addf %70, %75 : vector<10x128xf32>
    %c0_75 = arith.constant 0 : index
    %c16 = arith.constant 16 : index
    %c0_76 = arith.constant 0 : index
    %77 = vector.load %arg2[%c0_75, %c16, %c0_76] : memref<1x30x64xbf16, #tpu.memory_space<vmem>>, vector<1x10x64xbf16>
    %78 = vector.shape_cast %77 : vector<1x10x64xbf16> to vector<10x64xbf16>
    %c13_77 = arith.constant 13 : index
    %c0_78 = arith.constant 0 : index
    %c0_79 = arith.constant 0 : index
    %79 = vector.load %arg3[%c13_77, %c0_78, %c0_79] : memref<16x64x128xbf16, #tpu.memory_space<vmem>>, vector<1x64x128xbf16>
    %80 = vector.shape_cast %79 : vector<1x64x128xbf16> to vector<64x128xbf16>
    %cst_80 = arith.constant dense<0.000000e+00> : vector<10x128xf32>
    %81 = tpu.matmul %78, %80, %cst_80 {dimension_numbers = #tpu.dot_dimension_numbers<[1], [0], [0], [1], [0, 0, 1, 1], [], []>} : vector<10x64xbf16>, vector<64x128xbf16>, vector<10x128xf32> -> vector<10x128xf32>
    %82 = arith.addf %76, %81 : vector<10x128xf32>
    %c0_81 = arith.constant 0 : index
    %c17 = arith.constant 17 : index
    %c0_82 = arith.constant 0 : index
    %83 = vector.load %arg2[%c0_81, %c17, %c0_82] : memref<1x30x64xbf16, #tpu.memory_space<vmem>>, vector<1x10x64xbf16>
    %84 = vector.shape_cast %83 : vector<1x10x64xbf16> to vector<10x64xbf16>
    %c14 = arith.constant 14 : index
    %c0_83 = arith.constant 0 : index
    %c0_84 = arith.constant 0 : index
    %85 = vector.load %arg3[%c14, %c0_83, %c0_84] : memref<16x64x128xbf16, #tpu.memory_space<vmem>>, vector<1x64x128xbf16>
    %86 = vector.shape_cast %85 : vector<1x64x128xbf16> to vector<64x128xbf16>
    %cst_85 = arith.constant dense<0.000000e+00> : vector<10x128xf32>
    %87 = tpu.matmul %84, %86, %cst_85 {dimension_numbers = #tpu.dot_dimension_numbers<[1], [0], [0], [1], [0, 0, 1, 1], [], []>} : vector<10x64xbf16>, vector<64x128xbf16>, vector<10x128xf32> -> vector<10x128xf32>
    %88 = arith.addf %82, %87 : vector<10x128xf32>
    %c0_86 = arith.constant 0 : index
    %c18 = arith.constant 18 : index
    %c0_87 = arith.constant 0 : index
    %89 = vector.load %arg2[%c0_86, %c18, %c0_87] : memref<1x30x64xbf16, #tpu.memory_space<vmem>>, vector<1x10x64xbf16>
    %90 = vector.shape_cast %89 : vector<1x10x64xbf16> to vector<10x64xbf16>
    %c15_88 = arith.constant 15 : index
    %c0_89 = arith.constant 0 : index
    %c0_90 = arith.constant 0 : index
    %91 = vector.load %arg3[%c15_88, %c0_89, %c0_90] : memref<16x64x128xbf16, #tpu.memory_space<vmem>>, vector<1x64x128xbf16>
    %92 = vector.shape_cast %91 : vector<1x64x128xbf16> to vector<64x128xbf16>
    %cst_91 = arith.constant dense<0.000000e+00> : vector<10x128xf32>
    %93 = tpu.matmul %90, %92, %cst_91 {dimension_numbers = #tpu.dot_dimension_numbers<[1], [0], [0], [1], [0, 0, 1, 1], [], []>} : vector<10x64xbf16>, vector<64x128xbf16>, vector<10x128xf32> -> vector<10x128xf32>
    %94 = arith.addf %88, %93 : vector<10x128xf32>
    %c0_92 = arith.constant 0 : index
    %c0_93 = arith.constant 0 : index
    %95 = vector.load %arg4[%c0_92, %c0_93] : memref<1x128xf32, #tpu.memory_space<vmem>>, vector<1x128xf32>
    %96 = vector.broadcast %95 : vector<1x128xf32> to vector<10x128xf32>
    %97 = arith.addf %94, %96 : vector<10x128xf32>
    %c0_94 = arith.constant 0 : index
    %c0_95 = arith.constant 0 : index
    %c0_96 = arith.constant 0 : index
    %98 = vector.load %arg5[%c0_94, %c0_95, %c0_96] : memref<1x10x128xf32, #tpu.memory_space<vmem>>, vector<1x10x128xf32>
    %99 = vector.shape_cast %98 : vector<1x10x128xf32> to vector<10x128xf32>
    %100 = vector.shape_cast %97 : vector<10x128xf32> to vector<1x10x128xf32>
    tpu.vector_store %arg5[%c0_94, %c0_95, %c0_96], %100 {strides = array<i32>} : memref<1x10x128xf32, #tpu.memory_space<vmem>>, vector<1x10x128xf32>,
    return
  }
  func.func @transform_0(%arg0: i32, %arg1: i32) -> (i32, i32, i32) {
    %c0_i32 = arith.constant 0 : i32
    %c0_i32_0 = arith.constant 0 : i32
    %c0_i32_1 = arith.constant 0 : i32
    return %arg0, %c0_i32, %c0_i32_0 : i32, i32, i32
  }
  func.func @transform_1(%arg0: i32, %arg1: i32) -> (i32, i32, i32) {
    %c0_i32 = arith.constant 0 : i32
    %c0_i32_0 = arith.constant 0 : i32
    %c0_i32_1 = arith.constant 0 : i32
    return %c0_i32, %c0_i32_0, %arg1 : i32, i32, i32
  }
  func.func @transform_2(%arg0: i32, %arg1: i32) -> (i32, i32) {
    %c0_i32 = arith.constant 0 : i32
    %c0_i32_0 = arith.constant 0 : i32
    return %c0_i32, %arg1 : i32, i32
  }
  func.func @transform_3(%arg0: i32, %arg1: i32) -> (i32, i32, i32) {
    %c0_i32 = arith.constant 0 : i32
    %c0_i32_0 = arith.constant 0 : i32
    return %arg0, %c0_i32, %arg1 : i32, i32, i32
  }
}

</mosaic_0001>

<bundles_post_ra>
// kernel: _lambda_.8
= control target key start
LH: loop header
LB: loop body
LE: loop exit
PB: predicated region body
PF: predicated region fallthrough
CT: control target
= control target key end

     0   :  { %s2230_s12 = smov 0   ;;  %s2232_s13 = smov 0   ;;  %s2577_s0 = inlined_call_operand.vmem [shape: bf16[2,306,12], index: 0, kind: input, shape index: {}]   ;;  %s2578_s1 = inlined_call_operand.vmem [shape: bf16[4,12,128], index: 1, kind: input, shape index: {}]   ;;  %s2579_s2 = inlined_call_operand.vmem [shape: f32[1,128], index: 2, kind: input, shape index: {}]   ;;  %s2580_s3 = inlined_call_operand.vmem [shape: bf16[2,272,128], index: 3, kind: output, shape index: {}]  }
   0x1   :  { %s2234_s14 = smov 0  }
   0x2 LB: > { %s25_s15 = sadd.s32 1, %s2204_s13  ;;  %p1785_p0 = scmp.ge.s32.totalorder %s2208_s14, 1  ;;  %s2208_s14 = sphi %s2234_s14, %s13_s14   ;;  %s2204_s13 = sphi %s2232_s13, %s2582_s13   ;;  %s2200_s12 = sphi %s2230_s12, %s2581_s12  }
   0x3   : > { %p27_p1 = scmp.ge.s32.totalorder %s25_s15, 2  ;;  %p168_p2 = scmp.lt.s32.totalorder %s2208_s14, 3 }
   0x5   : > { %s2584_s15 = smov (%p27_p1, %s25_s15), 0  ;;  %p169_p3 = pnand %p1785_p0, %p168_p2 }
   0x6   : > { %p202_p4 = scmp.lt.s32.totalorder (!%p169_p3), %s2200_s12, 1 }
   0x7   : > { %172 = sbr.rel (%p169_p3) target bundleno = 436 (0x1b4), region = 32 }
   0xc   : > { %v1881_v0 = vld [vmem:[%s2578_s1] sm:$0xf]  ;;  %v2029_v1 = vld [vmem:[%s2578_s1] sm:$0x30]  ;;  %vm549_vm0 = vcmask 1045504   ;;  %s2586_s12 = smov (!%p202_p4, %s2200_s12), 1 }
   0xd   : > { %v1882_v2 = vor.u32 %v2029_v1, %v1881_v0  ;;  %v1991_v3 = vld [vmem:[%s2578_s1 + $0x18] sm:$0xf]  ;;  %v2048_v4 = vld [vmem:[%s2578_s1 + $0x18] sm:$0x30]  ;;  %v1968_v6 = vld [vmem:[%s2578_s1 + $0x10] sm:$0xf] }
   0xe   : > { %v1992_v5 = vor.u32 %v2048_v4, %v1991_v3  ;;  %v2047_v7 = vld [vmem:[%s2578_s1 + $0x10] sm:$0x30]  ;;  %v1860_v10 = vld [vmem:[%s2578_s1 + $0x8] sm:$0xf]  ;;  %v2030_v11 = vld [vmem:[%s2578_s1 + $0x8] sm:$0x30] }
   0xf   : > { %v687_v8 = vsel %vm549_vm0, %v1882_v2, 0  ;;  %v1969_v9 = vor.u32 %v2047_v7, %v1968_v6  ;;  %s2158_s5 = smul.u32 156, %s2586_s12  ;;  %v1861_v13 = vor.u32 %v2030_v11, %v1860_v10  ;;  %vm497_vm1 = vcmask 97280  }
  0x10   : > { %696 = vmatpush.bf16.msra.mxu1 %v687_v8  ;;  %v1336_v12 = vsel %vm549_vm0, %v1992_v5, 0  ;;  %vm1243_vm2 = vcmask 1046528   ;;  %vm351_vm3 = vsmask.f32 7424  ;;  %s2159_s11 = smul.u32 136, %s2586_s12 }
  0x11   : > { %1345 = vmatpush.bf16.msra.mxu3 %v1336_v12  ;;  %v1106_v14 = vsel %vm549_vm0, %v1969_v9, 0  ;;  %s2281_s8 = scalar_lea.vmem %s2577_s0, %s2158_s5  ;;  %v551_v15 = vsel %vm549_vm0, %v1861_v13, 0 }
  0x12   : > { %1115 = vmatpush.bf16.msra.mxu2 %v1106_v14  ;;  %v2012_v16 = vld [vmem:[%s2281_s8] sm:$0xff]  ;;  %v2139_v17 = vld [vmem:[%s2281_s8 + $0x8] sm:$0xf0]  ;;  %v2031_v18 = vld [vmem:[%s2281_s8 + $0x10] sm:$0xff]  ;;  %560 = vmatpush.bf16.msra.mxu0 %v551_v15  ;;  %s2399_s12 = scalar_lea.vmem %s2580_s3, %s2159_s11 }
  0x13   : > { %v2140_v19 = vld [vmem:[%s2281_s8 + $0x8] sm:$0xe]  ;;  %v355_v22 = vshll.u32 %v2012_v16, 16  ;;  %1883 = vmatmul.msk.bf16.vlgmr.msra.gmra.mxu1 %vm497_vm1, %v2012_v16  ;;  %v1245_v24 = vrot.slane %v2031_v18, 1  ;;  %v917_v27 = vshll.u32 %v2031_v18, 16  ;;  %v353_v28 = vshrl.u32 %v2012_v16, 16 }
  0x14   : > { %v2138_v20 = vld [vmem:[%s2281_s8 + $0x8] sm:$0xff]   ;;  %v2141_v23 = vor.u32 %v2140_v19, %v2139_v17  ;;  %v2014_v40 = vld [vmem:[%s2281_s8 + $0x10] sm:$0xff]  ;;  %v2032_v41 = vld [vmem:[%s2281_s8 + $0x18] sm:$0xff]  ;;  %v921_v44 = vshrl.u32 %v2031_v18, 16 }
  0x15   : > { %v2013_v21 = vld [vmem:[%s2281_s8 + $0x8] sm:$0xff]  ;;  %v910_v25 = vshrl.u32 %v2138_v20, 16  ;;  %v912_v26 = vshll.u32 %v2138_v20, 16  ;;  %v357_v31 = vrot.slane %v355_v22, 1  ;;  %v919_v33 = vrot.slane %v917_v27, 1  ;;  %v2015_v54 = vld [vmem:[%s2281_s8 + $0x18] sm:$0xff] }
  0x16   : > { %v360_v29 = vshll.u32 %v2013_v21, 16  ;;  %v1244_v30 = vrot.slane %v2141_v23, 1  ;;  %v364_v42 = vshrl.u32 %v2013_v21, 16  ;;  %v368_v43 = vshll.u32 %v2014_v40, 16  ;;  %v2033_v55 = vld [vmem:[%s2281_s8 + $0x20] sm:$0xff]  ;;  %v2034_v5 = vld [vmem:[%s2281_s8 + $0x28] sm:$0xff] }
  0x17   : > { %v914_v32 = vrot.slane %v912_v26, 1  ;;  %v358_v36 = vor.u32 %v357_v31, %v353_v28  ;;  %v925_v45 = vshll.u32 %v2032_v41, 16  ;;  %v1247_v46 = vrot.slane %v2032_v41, 1  ;;  %v2016_v4 = vld [vmem:[%s2281_s8 + $0x20] sm:$0xff]  ;;  %v2017_v18 = vld [vmem:[%s2281_s8 + $0x28] sm:$0xff]  ;;  %v2035_v19 = vld [vmem:[%s2281_s8 + $0x30] sm:$0xff] }
  0x18   : > { %v362_v34 = vrot.slane %v360_v29, 1  ;;  %v1246_v35 = vsel %vm1243_vm2, %v1244_v30, %v1245_v24  ;;  %v370_v48 = vrot.slane %v368_v43, 1  ;;  %v923_v49 = vor.u32 %v921_v44, %v919_v33 }
  0x19   : > { %1993 = vmatmul.msk.bf16.vlgmr.msra.gmra.mxu3 %vm497_vm1, %v1246_v35  ;;  %v915_v37 = vor.u32 %v914_v32, %v910_v25  ;;  %v927_v50 = vrot.slane %v925_v45, 1  ;;  %v1248_v51 = vsel %vm1243_vm2, %v1245_v24, %v1247_v46  ;;  %v372_v56 = vshrl.u32 %v2014_v40, 16  ;;  %v2018_v32 = vld [vmem:[%s2281_s8 + $0x30] sm:$0xff] }
  0x1a   : > { %v363_v38 = vsel %vm351_vm3, %v358_v36, %v362_v34  ;;  %v366_v47 = vor.u32 %v364_v42, %v362_v34  ;;  %v376_v57 = vshll.u32 %v2015_v54, 16  ;;  %v929_v58 = vshrl.u32 %v2032_v41, 16 }
  0x1b   : > { %v920_v39 = vsel %vm351_vm3, %v915_v37, %v919_v33  ;;  %1862 = vmatmul.msk.bf16.vlgmr.msra.gmra.mxu0 %vm497_vm1, %v363_v38  ;;  %v928_v53 = vsel %vm351_vm3, %v923_v49, %v927_v50  ;;  %v933_v59 = vshll.u32 %v2033_v55, 16  ;;  %v1249_v60 = vrot.slane %v2033_v55, 1  ;;  %v2036_v33 = vld [vmem:[%s2281_s8 + $0x38] sm:$0xff] }
  0x1c   : > { %1970 = vmatmul.msk.bf16.vlgmr.msra.gmra.mxu2 %vm497_vm1, %v920_v39  ;;  %v371_v52 = vsel %vm351_vm3, %v366_v47, %v370_v48  ;;  %v374_v61 = vor.u32 %v372_v56, %v370_v48  ;;  %v378_v62 = vrot.slane %v376_v57, 1  ;;  %v931_v63 = vor.u32 %v929_v58, %v927_v50  ;;  %v2037_v47 = vld [vmem:[%s2281_s8 + $0x40] sm:$0xff] }
  0x1d   : > { %v935_v0 = vrot.slane %v933_v59, 1  ;;  %v1250_v1 = vsel %vm1243_vm2, %v1247_v46, %v1249_v60  ;;  %v380_v6 = vshrl.u32 %v2015_v54, 16  ;;  %v384_v7 = vshll.u32 %v2016_v4, 16  ;;  %v2019_v46 = vld [vmem:[%s2281_s8 + $0x38] sm:$0xff] }
  0x1e   : > { %v379_v2 = vsel %vm351_vm3, %v374_v61, %v378_v62  ;;  %v937_v8 = vshrl.u32 %v2033_v55, 16  ;;  %v941_v9 = vshll.u32 %v2034_v5, 16  ;;  %v1251_v10 = vrot.slane %v2034_v5, 1  ;;  %v2038_v61 = vld [vmem:[%s2281_s8 + $0x48] sm:$0xff] }
  0x1f   : > { %v936_v3 = vsel %vm351_vm3, %v931_v63, %v935_v0  ;;  %v382_v11 = vor.u32 %v380_v6, %v378_v62  ;;  %v386_v12 = vrot.slane %v384_v7, 1  ;;  %v388_v20 = vshrl.u32 %v2016_v4, 16 }
  0x20   : > { %v939_v13 = vor.u32 %v937_v8, %v935_v0  ;;  %v943_v14 = vrot.slane %v941_v9, 1  ;;  %v1252_v15 = vsel %vm1243_vm2, %v1249_v60, %v1251_v10  ;;  %v945_v22 = vshrl.u32 %v2034_v5, 16  ;;  %v2020_v60 = vld [vmem:[%s2281_s8 + $0x40] sm:$0xff] }
  0x21   : > { %v387_v16 = vsel %vm351_vm3, %v382_v11, %v386_v12  ;;  %v949_v23 = vshll.u32 %v2035_v19, 16  ;;  %v1253_v24 = vrot.slane %v2035_v19, 1  ;;  %v390_v25 = vor.u32 %v388_v20, %v386_v12  ;;  %v2039_v11 = vld [vmem:[%s2281_s8 + $0x50] sm:$0xff] }
  0x22   : > { %v944_v17 = vsel %vm351_vm3, %v939_v13, %v943_v14  ;;  %v947_v27 = vor.u32 %v945_v22, %v943_v14  ;;  %v396_v34 = vshrl.u32 %v2017_v18, 16  ;;  %v400_v35 = vshll.u32 %v2018_v32, 16 }
  0x23   : > { %1884 = vmatmul.msk.bf16.gmra.mxu1 %vm497_vm1, %v2013_v21  ;;  %v392_v21 = vshll.u32 %v2017_v18, 16  ;;  %v951_v28 = vrot.slane %v949_v23, 1  ;;  %v1254_v29 = vsel %vm1243_vm2, %v1251_v10, %v1253_v24  ;;  %v953_v36 = vshrl.u32 %v2035_v19, 16  ;;  %v2021_v10 = vld [vmem:[%s2281_s8 + $0x48] sm:$0xff] }
  0x24   : > { %v957_v37 = vshll.u32 %v2036_v33, 16  ;;  %v1255_v38 = vrot.slane %v2036_v33, 1  ;;  %v404_v48 = vshrl.u32 %v2018_v32, 16  ;;  %v408_v49 = vshll.u32 %v2019_v46, 16 }
  0x25   : > { %v394_v26 = vrot.slane %v392_v21, 1  ;;  %v952_v31 = vsel %vm351_vm3, %v947_v27, %v951_v28  ;;  %v955_v41 = vor.u32 %v953_v36, %v951_v28  ;;  %v961_v50 = vshrl.u32 %v2036_v33, 16 }
  0x26   : > { %v959_v42 = vrot.slane %v957_v37, 1  ;;  %v1256_v43 = vsel %vm1243_vm2, %v1253_v24, %v1255_v38  ;;  %v412_v62 = vshrl.u32 %v2019_v46, 16  ;;  %v416_v63 = vshll.u32 %v2020_v60, 16 }
  0x27   : > { %v395_v30 = vsel %vm351_vm3, %v390_v25, %v394_v26  ;;  %v398_v39 = vor.u32 %v396_v34, %v394_v26  ;;  %v969_v0 = vshrl.u32 %v2037_v47, 16  ;;  %v420_v12 = vshrl.u32 %v2020_v60, 16 }
  0x28   : > { %v960_v45 = vsel %vm351_vm3, %v955_v41, %v959_v42  ;;  %v963_v55 = vor.u32 %v961_v50, %v959_v42  ;;  %v424_v13 = vshll.u32 %v2021_v10, 16  ;;  %v428_v34 = vshrl.u32 %v2021_v10, 16  ;;  %v2378_v41 = vld [vmem:[%s2579_s2] ss:$0 sm:$0xff] }
  0x29   : > { %1994 = vmatmul.msk.bf16.gmra.mxu3 %vm497_vm1, %v1248_v51  ;;  %v965_v51 = vshll.u32 %v2037_v47, 16  ;;  %v985_v37 = vshrl.u32 %v2039_v11, 16 }
  0x2a   : > { %v426_v19 = vrot.slane %v424_v13, 1 }
  0x2b   : > { %1863 = vmatmul.msk.bf16.gmra.mxu0 %vm497_vm1, %v371_v52  ;;  %v1257_v52 = vrot.slane %v2037_v47, 1  ;;  %v967_v56 = vrot.slane %v965_v51, 1 }
  0x2c   : > { %1971 = vmatmul.msk.bf16.gmra.mxu2 %vm497_vm1, %v928_v53 }
  0x2d   : > { %v1258_v57 = vsel %vm1243_vm2, %v1255_v38, %v1257_v52  ;;  %v968_v59 = vsel %vm351_vm3, %v963_v55, %v967_v56  ;;  %v971_v5 = vor.u32 %v969_v0, %v967_v56 }
  0x33   : > { %1885 = vmatmul.msk.bf16.gmra.mxu1 %vm497_vm1, %v2014_v40  ;;  %v402_v40 = vrot.slane %v400_v35, 1 }
  0x35   : > { %v403_v44 = vsel %vm351_vm3, %v398_v39, %v402_v40  ;;  %v406_v53 = vor.u32 %v404_v48, %v402_v40 }
  0x39   : > { %1995 = vmatmul.msk.bf16.gmra.mxu3 %vm497_vm1, %v1250_v1  ;;  %v973_v1 = vshll.u32 %v2038_v61, 16 }
  0x3b   : > { %1864 = vmatmul.msk.bf16.gmra.mxu0 %vm497_vm1, %v379_v2  ;;  %v1259_v2 = vrot.slane %v2038_v61, 1  ;;  %v975_v6 = vrot.slane %v973_v1, 1 }
  0x3c   : > { %1972 = vmatmul.msk.bf16.gmra.mxu2 %vm497_vm1, %v936_v3 }
  0x3d   : > { %v1260_v7 = vsel %vm1243_vm2, %v1257_v52, %v1259_v2  ;;  %v976_v9 = vsel %vm351_vm3, %v971_v5, %v975_v6 }
  0x43   : > { %1886 = vmatmul.msk.bf16.gmra.mxu1 %vm497_vm1, %v2015_v54  ;;  %v410_v54 = vrot.slane %v408_v49, 1 }
  0x45   : > { %v411_v58 = vsel %vm351_vm3, %v406_v53, %v410_v54  ;;  %v414_v3 = vor.u32 %v412_v62, %v410_v54  ;;  %v2394_v62 = vld [vmem:[%s2281_s8 + $0x60] sm:$0xff] }
  0x49   : > { %1996 = vmatmul.msk.bf16.gmra.mxu3 %vm497_vm1, %v1252_v15  ;;  %v977_v15 = vshrl.u32 %v2038_v61, 16  ;;  %v2391_v61 = vld [vmem:[%s2281_s8 + $0x58] sm:$0xff] }
  0x4b   : > { %1865 = vmatmul.msk.bf16.gmra.mxu0 %vm497_vm1, %v387_v16  ;;  %v981_v16 = vshll.u32 %v2039_v11, 16  ;;  %v979_v20 = vor.u32 %v977_v15, %v975_v6  ;;  %v440_v6 = vshll.u32 %v2391_v61, 16 }
  0x4c   : > { %1973 = vmatmul.msk.bf16.gmra.mxu2 %vm497_vm1, %v944_v17  ;;  %v1261_v17 = vrot.slane %v2039_v11, 1  ;;  %v1265_v11 = vrot.slane %v2394_v62, 1 }
  0x4d   : > { %v983_v21 = vrot.slane %v981_v16, 1  ;;  %v442_v15 = vrot.slane %v440_v6, 1 }
  0x4e   : > { %v1262_v22 = vsel %vm1243_vm2, %v1259_v2, %v1261_v17 }
  0x4f   : > { %v984_v25 = vsel %vm351_vm3, %v979_v20, %v983_v21 }
  0x53   : > { %1887 = vmatmul.msk.bf16.gmra.mxu1 %vm497_vm1, %v2016_v4  ;;  %v418_v4 = vrot.slane %v416_v63, 1 }
  0x55   : > { %v419_v8 = vsel %vm351_vm3, %v414_v3, %v418_v4 }
  0x59   : > { %1997 = vmatmul.msk.bf16.gmra.mxu3 %vm497_vm1, %v1254_v29  ;;  %v2022_v29 = vld [vmem:[%s2281_s8 + $0x50] sm:$0xff] }
  0x5a   : > { %v432_v35 = vshll.u32 %v2022_v29, 16  ;;  %v436_v1 = vshrl.u32 %v2022_v29, 16 }
  0x5b   : > { %1866 = vmatmul.msk.bf16.gmra.mxu0 %vm497_vm1, %v395_v30  ;;  %v2371_v30 = vld [vmem:[%s2281_s8 + $0x58] sm:$0xff] }
  0x5c   : > { %1974 = vmatmul.msk.bf16.gmra.mxu2 %vm497_vm1, %v952_v31  ;;  %v989_v38 = vshll.u32 %v2371_v30, 16  ;;  %v1263_v39 = vrot.slane %v2371_v30, 1 }
  0x5e   : > { %v1264_v48 = vsel %vm1243_vm2, %v1261_v17, %v1263_v39 }
  0x63   : > { %1888 = vmatmul.msk.bf16.gmra.mxu1 %vm497_vm1, %v2017_v18  ;;  %v422_v18 = vor.u32 %v420_v12, %v418_v4 }
  0x65   : > { %v427_v24 = vsel %vm351_vm3, %v422_v18, %v426_v19 }
  0x69   : > { %1998 = vmatmul.msk.bf16.gmra.mxu3 %vm497_vm1, %v1256_v43  ;;  %v430_v43 = vor.u32 %v428_v34, %v426_v19  ;;  %v1266_v19 = vsel %vm1243_vm2, %v1263_v39, %v1265_v11 }
  0x6b   : > { %1867 = vmatmul.msk.bf16.gmra.mxu0 %vm497_vm1, %v403_v44  ;;  %v434_v44 = vrot.slane %v432_v35, 1 }
  0x6c   : > { %1975 = vmatmul.msk.bf16.gmra.mxu2 %vm497_vm1, %v960_v45  ;;  %v987_v45 = vor.u32 %v985_v37, %v983_v21 }
  0x6d   : > { %v435_v53 = vsel %vm351_vm3, %v430_v43, %v434_v44 }
  0x73   : > { %1889 = vmatmul.msk.bf16.gmra.mxu1 %vm497_vm1, %v2018_v32 }
  0x79   : > { %1999 = vmatmul.msk.bf16.gmra.mxu3 %vm497_vm1, %v1258_v57 }
  0x7b   : > { %1868 = vmatmul.msk.bf16.gmra.mxu0 %vm497_vm1, %v411_v58 }
  0x7c   : > { %1976 = vmatmul.msk.bf16.gmra.mxu2 %vm497_vm1, %v968_v59 }
  0x83   : > { %1890 = vmatmul.msk.bf16.gmra.mxu1 %vm497_vm1, %v2019_v46  ;;  %v991_v46 = vrot.slane %v989_v38, 1 }
  0x85   : > { %v992_v54 = vsel %vm351_vm3, %v987_v45, %v991_v46  ;;  %v1001_v45 = vshrl.u32 %v2394_v62, 16 }
  0x89   : > { %2000 = vmatmul.msk.bf16.gmra.mxu3 %vm497_vm1, %v1260_v7 }
  0x8b   : > { %1869 = vmatmul.msk.bf16.gmra.mxu0 %vm497_vm1, %v419_v8 }
  0x8c   : > { %1977 = vmatmul.msk.bf16.gmra.mxu2 %vm497_vm1, %v976_v9  ;;  %v993_v9 = vshrl.u32 %v2371_v30, 16 }
  0x8e   : > { %v995_v16 = vor.u32 %v993_v9, %v991_v46 }
  0x90   : > { %v698_v14 = vpop.f32.mrf.mxu1 }
  0x93   : > { %1891 = vmatmul.msk.bf16.gmra.mxu1 %vm497_vm1, %v2020_v60 }
  0x98   : > { %v562_v23 = vpop.f32.mrf.mxu0  ;;  %v700_v26 = vpop.f32.mrf.mxu1 }
  0x99   : > { %2001 = vmatmul.msk.bf16.gmra.mxu3 %vm497_vm1, %v1262_v22  ;;  %v699_v27 = vadd.f32 %v698_v14, %v562_v23  ;;  %v438_v14 = vor.u32 %v436_v1, %v434_v44 }
  0x9b   : > { %1870 = vmatmul.msk.bf16.gmra.mxu0 %vm497_vm1, %v427_v24  ;;  %v443_v24 = vsel %vm351_vm3, %v438_v14, %v442_v15 }
  0x9c   : > { %1978 = vmatmul.msk.bf16.gmra.mxu2 %vm497_vm1, %v984_v25  ;;  %v1347_v28 = vpop.f32.mrf.mxu3 }
  0x9f   : > { %v1117_v31 = vpop.f32.mrf.mxu2 }
  0xa0   : > { %v1202_v32 = vadd.f32 %v1117_v31, %v699_v27  ;;  %v564_v33 = vpop.f32.mrf.mxu0  ;;  %v703_v36 = vpop.f32.mrf.mxu1 }
  0xa1   : > { %v701_v47 = vadd.f32 %v700_v26, %v564_v33  ;;  %v2419_v33 = vld [vmem:[%s2281_s8 + $0x68] sm:$0xff] }
  0xa2   : > { %v1432_v40 = vadd.f32 %v1347_v28, %v1202_v32  ;;  %v2416_v32 = vld [vmem:[%s2281_s8 + $0x60] sm:$0xff]  ;;  %v1005_v46 = vshll.u32 %v2419_v33, 16 }
  0xa3   : > { %1892 = vmatmul.msk.bf16.gmra.mxu1 %vm497_vm1, %v2021_v10  ;;  %v997_v10 = vshll.u32 %v2394_v62, 16 }
  0xa4   : > { %v1349_v42 = vpop.f32.mrf.mxu3  ;;  %v1470_v50 = vadd.f32 %v2378_v41, %v1432_v40 }
  0xa5   : > { %v999_v17 = vrot.slane %v997_v10, 1 }
  0xa6   : > { %v1538_v57 = vmul.f32 0.2, %v1470_v50  ;;  %vm1504_vm4 = vcmp.ge.f32.partialorder %v1470_v50, 0.0 }
  0xa7   : > { %v1119_v49 = vpop.f32.mrf.mxu2  ;;  %v1000_v25 = vsel %vm351_vm3, %v995_v16, %v999_v17  ;;  %v1009_v16 = vshrl.u32 %v2419_v33, 16 }
  0xa8   : > { %v1203_v51 = vadd.f32 %v1119_v49, %v701_v47  ;;  %v567_v52 = vpop.f32.mrf.mxu0  ;;  %v705_v55 = vpop.f32.mrf.mxu1  ;;  %v1572_v2 = vsel %vm1504_vm4, %v1470_v50, %v1538_v57  ;;  %v1267_v47 = vrot.slane %v2419_v33, 1 }
  0xa9   : > { %2002 = vmatmul.msk.bf16.gmra.mxu3 %vm497_vm1, %v1264_v48  ;;  %v704_v59 = vadd.f32 %v703_v36, %v567_v52  ;;  %v444_v36 = vshrl.u32 %v2391_v61, 16  ;;  %v1003_v52 = vor.u32 %v1001_v45, %v999_v17 }
  0xaa   : > { %v1433_v56 = vadd.f32 %v1349_v42, %v1203_v51  ;;  %v448_v42 = vshll.u32 %v2416_v32, 16 }
  0xab   : > { %1871 = vmatmul.msk.bf16.gmra.mxu0 %vm497_vm1, %v435_v53  ;;  %v446_v50 = vor.u32 %v444_v36, %v442_v15  ;;  %v1007_v53 = vrot.slane %v1005_v46, 1 }
  0xac   : > { %v1471_v58 = vadd.f32 %v2378_v41, %v1433_v56  ;;  %1979 = vmatmul.msk.bf16.gmra.mxu2 %vm497_vm1, %v992_v54  ;;  %v1352_v60 = vpop.f32.mrf.mxu3  ;;  %v450_v51 = vrot.slane %v448_v42, 1 }
  0xae   : > { %vm1505_vm5 = vcmp.ge.f32.partialorder %v1471_v58, 0.0  ;;  %v1539_v63 = vmul.f32 0.2, %v1471_v58 }
  0xaf   : > { %v1122_v0 = vpop.f32.mrf.mxu2 }
  0xb0   : > { %v1573_v3 = vsel %vm1505_vm5, %v1471_v58, %v1539_v63  ;;  %v1204_v4 = vadd.f32 %v1122_v0, %v704_v59  ;;  %v569_v5 = vpop.f32.mrf.mxu0  ;;  %v708_v8 = vpop.f32.mrf.mxu1 }
  0xb1   : > { %v2056_v7 = vpack.c.bf16 %v1573_v3, %v1572_v2  ;;  %v706_v18 = vadd.f32 %v705_v55, %v569_v5  ;;  %v1268_v55 = vsel %vm1243_vm2, %v1265_v11, %v1267_v47  ;;  %v2441_v5 = vld [vmem:[%s2281_s8 + $0x70] sm:$0xff] }
  0xb2   : > { %v1434_v12 = vadd.f32 %v1352_v60, %v1204_v4  ;;  %v451_v60 = vsel %vm351_vm3, %v446_v50, %v450_v51  ;;  %v2438_v4 = vld [vmem:[%s2281_s8 + $0x68] sm:$0xff]  ;;  %v1013_v17 = vshll.u32 %v2441_v5, 16 }
  0xb3   : > { %2057 = vst [vmem:[%s2399_s12] sm:$0xff] %v2056_v7   ;;  %1893 = vmatmul.msk.bf16.gmra.mxu1 %vm497_vm1, %v2022_v29 }
  0xb4   : > { %v1354_v13 = vpop.f32.mrf.mxu3  ;;  %v1472_v21 = vadd.f32 %v2378_v41, %v1434_v12 }
  0xb6   : > { %v1540_v28 = vmul.f32 0.2, %v1472_v21  ;;  %vm1506_vm6 = vcmp.ge.f32.partialorder %v1472_v21, 0.0 }
  0xb7   : > { %v1124_v20 = vpop.f32.mrf.mxu2 }
  0xb8   : > { %v1205_v22 = vadd.f32 %v1124_v20, %v706_v18  ;;  %v572_v23 = vpop.f32.mrf.mxu0  ;;  %v710_v26 = vpop.f32.mrf.mxu1  ;;  %v1574_v37 = vsel %vm1506_vm6, %v1472_v21, %v1540_v28  ;;  %v1269_v18 = vrot.slane %v2441_v5, 1 }
  0xb9   : > { %2003 = vmatmul.msk.bf16.gmra.mxu3 %vm497_vm1, %v1266_v19  ;;  %v709_v30 = vadd.f32 %v708_v8, %v572_v23  ;;  %v452_v8 = vshrl.u32 %v2416_v32, 16  ;;  %v1011_v23 = vor.u32 %v1009_v16, %v1007_v53 }
  0xba   : > { %v1435_v27 = vadd.f32 %v1354_v13, %v1205_v22  ;;  %v456_v13 = vshll.u32 %v2438_v4, 16 }
  0xbb   : > { %1872 = vmatmul.msk.bf16.gmra.mxu0 %vm497_vm1, %v443_v24  ;;  %v454_v21 = vor.u32 %v452_v8, %v450_v51  ;;  %v1015_v24 = vrot.slane %v1013_v17, 1 }
  0xbc   : > { %v1473_v29 = vadd.f32 %v2378_v41, %v1435_v27  ;;  %1980 = vmatmul.msk.bf16.gmra.mxu2 %vm497_vm1, %v1000_v25  ;;  %v1357_v31 = vpop.f32.mrf.mxu3  ;;  %v458_v22 = vrot.slane %v456_v13, 1 }
  0xbe   : > { %vm1507_vm7 = vcmp.ge.f32.partialorder %v1473_v29, 0.0  ;;  %v1541_v34 = vmul.f32 0.2, %v1473_v29 }
  0xbf   : > { %v1127_v35 = vpop.f32.mrf.mxu2 }
  0xc0   : > { %v1575_v38 = vsel %vm1507_vm7, %v1473_v29, %v1541_v34  ;;  %v1206_v39 = vadd.f32 %v1127_v35, %v709_v30  ;;  %v574_v40 = vpop.f32.mrf.mxu0  ;;  %v713_v44 = vpop.f32.mrf.mxu1 }
  0xc1   : > { %v2061_v43 = vpack.c.bf16 %v1575_v38, %v1574_v37  ;;  %v711_v54 = vadd.f32 %v710_v26, %v574_v40  ;;  %v1270_v26 = vsel %vm1243_vm2, %v1267_v47, %v1269_v18  ;;  %v2463_v40 = vld [vmem:[%s2281_s8 + $0x78] sm:$0xff] }
  0xc2   : > { %v1436_v48 = vadd.f32 %v1357_v31, %v1206_v39  ;;  %v459_v31 = vsel %vm351_vm3, %v454_v21, %v458_v22  ;;  %v2460_v39 = vld [vmem:[%s2281_s8 + $0x70] sm:$0xff] }
  0xc3   : > { %2142 = vst [vmem:[%s2399_s12 + $0x8] sm:$0xff] %v2061_v43   ;;  %1894 = vmatmul.msk.bf16.gmra.mxu1 %vm497_vm1, %v2391_v61  ;;  %v1008_v61 = vsel %vm351_vm3, %v1003_v52, %v1007_v53  ;;  %v1017_v52 = vshrl.u32 %v2441_v5, 16  ;;  %v1021_v53 = vshll.u32 %v2463_v40, 16 }
  0xc4   : > { %v1359_v49 = vpop.f32.mrf.mxu3  ;;  %v1474_v57 = vadd.f32 %v2378_v41, %v1436_v48 }
  0xc6   : > { %v1542_v0 = vmul.f32 0.2, %v1474_v57  ;;  %vm1508_vm8 = vcmp.ge.f32.partialorder %v1474_v57, 0.0 }
  0xc7   : > { %v1129_v56 = vpop.f32.mrf.mxu2 }
  0xc8   : > { %v1207_v58 = vadd.f32 %v1129_v56, %v711_v54  ;;  %v577_v59 = vpop.f32.mrf.mxu0  ;;  %v715_v62 = vpop.f32.mrf.mxu1  ;;  %v1576_v9 = vsel %vm1508_vm8, %v1474_v57, %v1542_v0  ;;  %v1271_v54 = vrot.slane %v2463_v40, 1 }
  0xc9   : > { %2004 = vmatmul.msk.bf16.gmra.mxu3 %vm497_vm1, %v1268_v55  ;;  %v714_v2 = vadd.f32 %v713_v44, %v577_v59  ;;  %v460_v44 = vshrl.u32 %v2438_v4, 16  ;;  %v1019_v59 = vor.u32 %v1017_v52, %v1015_v24 }
  0xca   : > { %v1437_v63 = vadd.f32 %v1359_v49, %v1207_v58  ;;  %v464_v49 = vshll.u32 %v2460_v39, 16 }
  0xcb   : > { %1873 = vmatmul.msk.bf16.gmra.mxu0 %vm497_vm1, %v451_v60  ;;  %v462_v57 = vor.u32 %v460_v44, %v458_v22  ;;  %v1023_v60 = vrot.slane %v1021_v53, 1 }
  0xcc   : > { %v1475_v1 = vadd.f32 %v2378_v41, %v1437_v63  ;;  %1981 = vmatmul.msk.bf16.gmra.mxu2 %vm497_vm1, %v1008_v61  ;;  %v1362_v3 = vpop.f32.mrf.mxu3  ;;  %v466_v58 = vrot.slane %v464_v49, 1 }
  0xce   : > { %vm1509_vm9 = vcmp.ge.f32.partialorder %v1475_v1, 0.0  ;;  %v1543_v6 = vmul.f32 0.2, %v1475_v1 }
  0xcf   : > { %v1132_v7 = vpop.f32.mrf.mxu2 }
  0xd0   : > { %v1577_v10 = vsel %vm1509_vm9, %v1475_v1, %v1543_v6  ;;  %v1208_v11 = vadd.f32 %v1132_v7, %v714_v2  ;;  %v579_v12 = vpop.f32.mrf.mxu0  ;;  %v718_v15 = vpop.f32.mrf.mxu1 }
  0xd1   : > { %v2066_v14 = vpack.c.bf16 %v1577_v10, %v1576_v9  ;;  %v716_v25 = vadd.f32 %v715_v62, %v579_v12  ;;  %v1272_v62 = vsel %vm1243_vm2, %v1269_v18, %v1271_v54  ;;  %v2485_v12 = vld [vmem:[%s2281_s8 + $0x80] sm:$0xff] }
  0xd2   : > { %v1438_v19 = vadd.f32 %v1362_v3, %v1208_v11  ;;  %v467_v3 = vsel %vm351_vm3, %v462_v57, %v466_v58  ;;  %v2482_v11 = vld [vmem:[%s2281_s8 + $0x78] sm:$0xff] }
  0xd3   : > { %2143 = vst [vmem:[%s2399_s12 + $0x10] sm:$0xff] %v2066_v14   ;;  %1895 = vmatmul.msk.bf16.gmra.mxu1 %vm497_vm1, %v2416_v32  ;;  %v1016_v32 = vsel %vm351_vm3, %v1011_v23, %v1015_v24  ;;  %v1025_v23 = vshrl.u32 %v2463_v40, 16  ;;  %v1029_v24 = vshll.u32 %v2485_v12, 16 }
  0xd4   : > { %v1364_v20 = vpop.f32.mrf.mxu3  ;;  %v1476_v28 = vadd.f32 %v2378_v41, %v1438_v19 }
  0xd6   : > { %v1544_v35 = vmul.f32 0.2, %v1476_v28  ;;  %vm1510_vm10 = vcmp.ge.f32.partialorder %v1476_v28, 0.0 }
  0xd7   : > { %v1134_v27 = vpop.f32.mrf.mxu2 }
  0xd8   : > { %v1209_v29 = vadd.f32 %v1134_v27, %v716_v25  ;;  %v582_v30 = vpop.f32.mrf.mxu0  ;;  %v720_v33 = vpop.f32.mrf.mxu1  ;;  %v1578_v45 = vsel %vm1510_vm10, %v1476_v28, %v1544_v35  ;;  %v1273_v25 = vrot.slane %v2485_v12, 1 }
  0xd9   : > { %2005 = vmatmul.msk.bf16.gmra.mxu3 %vm497_vm1, %v1270_v26  ;;  %v719_v37 = vadd.f32 %v718_v15, %v582_v30  ;;  %v468_v15 = vshrl.u32 %v2460_v39, 16  ;;  %v1027_v30 = vor.u32 %v1025_v23, %v1023_v60 }
  0xda   : > { %v1439_v34 = vadd.f32 %v1364_v20, %v1209_v29  ;;  %v472_v20 = vshll.u32 %v2482_v11, 16 }
  0xdb   : > { %1874 = vmatmul.msk.bf16.gmra.mxu0 %vm497_vm1, %v459_v31  ;;  %v470_v28 = vor.u32 %v468_v15, %v466_v58  ;;  %v1031_v31 = vrot.slane %v1029_v24, 1 }
  0xdc   : > { %v1477_v36 = vadd.f32 %v2378_v41, %v1439_v34  ;;  %1982 = vmatmul.msk.bf16.gmra.mxu2 %vm497_vm1, %v1016_v32  ;;  %v1367_v38 = vpop.f32.mrf.mxu3  ;;  %v474_v29 = vrot.slane %v472_v20, 1 }
  0xde   : > { %vm1511_vm11 = vcmp.ge.f32.partialorder %v1477_v36, 0.0  ;;  %v1545_v42 = vmul.f32 0.2, %v1477_v36 }
  0xdf   : > { %v1137_v43 = vpop.f32.mrf.mxu2 }
  0xe0   : > { %v1579_v46 = vsel %vm1511_vm11, %v1477_v36, %v1545_v42  ;;  %v1210_v47 = vadd.f32 %v1137_v43, %v719_v37  ;;  %v584_v48 = vpop.f32.mrf.mxu0  ;;  %v723_v51 = vpop.f32.mrf.mxu1 }
  0xe1   : > { %v2071_v50 = vpack.c.bf16 %v1579_v46, %v1578_v45  ;;  %v721_v61 = vadd.f32 %v720_v33, %v584_v48  ;;  %v1274_v33 = vsel %vm1243_vm2, %v1271_v54, %v1273_v25  ;;  %v2507_v48 = vld [vmem:[%s2281_s8 + $0x88] sm:$0xff] }
  0xe2   : > { %v1440_v55 = vadd.f32 %v1367_v38, %v1210_v47  ;;  %v475_v38 = vsel %vm351_vm3, %v470_v28, %v474_v29  ;;  %v2504_v47 = vld [vmem:[%s2281_s8 + $0x80] sm:$0xff] }
  0xe3   : > { %2144 = vst [vmem:[%s2399_s12 + $0x18] sm:$0xff] %v2071_v50   ;;  %1896 = vmatmul.msk.bf16.gmra.mxu1 %vm497_vm1, %v2438_v4  ;;  %v1024_v4 = vsel %vm351_vm3, %v1019_v59, %v1023_v60  ;;  %v1033_v59 = vshrl.u32 %v2485_v12, 16  ;;  %v1037_v60 = vshll.u32 %v2507_v48, 16 }
  0xe4   : > { %v1369_v56 = vpop.f32.mrf.mxu3  ;;  %v1478_v0 = vadd.f32 %v2378_v41, %v1440_v55 }
  0xe6   : > { %v1546_v7 = vmul.f32 0.2, %v1478_v0  ;;  %vm1512_vm12 = vcmp.ge.f32.partialorder %v1478_v0, 0.0 }
  0xe7   : > { %v1139_v63 = vpop.f32.mrf.mxu2 }
  0xe8   : > { %v1211_v1 = vadd.f32 %v1139_v63, %v721_v61  ;;  %v587_v2 = vpop.f32.mrf.mxu0  ;;  %v725_v5 = vpop.f32.mrf.mxu1  ;;  %v1580_v16 = vsel %vm1512_vm12, %v1478_v0, %v1546_v7  ;;  %v1275_v61 = vrot.slane %v2507_v48, 1  ;;  %v817_v7 = vld [vmem:[%s2281_s8 + $0x90] sm:$0x1] }
  0xe9   : > { %2006 = vmatmul.msk.bf16.gmra.mxu3 %vm497_vm1, %v1272_v62  ;;  %v724_v9 = vadd.f32 %v723_v51, %v587_v2  ;;  %v476_v51 = vshrl.u32 %v2482_v11, 16  ;;  %v1035_v2 = vor.u32 %v1033_v59, %v1031_v31 }
  0xea   : > { %v1441_v6 = vadd.f32 %v1369_v56, %v1211_v1  ;;  %v480_v56 = vshll.u32 %v2504_v47, 16 }
  0xeb   : > { %1875 = vmatmul.msk.bf16.gmra.mxu0 %vm497_vm1, %v467_v3  ;;  %v478_v0 = vor.u32 %v476_v51, %v474_v29  ;;  %v1039_v3 = vrot.slane %v1037_v60, 1 }
  0xec   : > { %v1479_v8 = vadd.f32 %v2378_v41, %v1441_v6  ;;  %1983 = vmatmul.msk.bf16.gmra.mxu2 %vm497_vm1, %v1024_v4  ;;  %v1372_v10 = vpop.f32.mrf.mxu3  ;;  %v482_v1 = vrot.slane %v480_v56, 1  ;;  %v259_v4 = vld [vmem:[%s2281_s8 + $0x88] sm:$0x1]  ;;  %v1276_v6 = vsel %vm1243_vm2, %v1273_v25, %v1275_v61 }
  0xee   : > { %vm1513_vm13 = vcmp.ge.f32.partialorder %v1479_v8, 0.0  ;;  %v1547_v13 = vmul.f32 0.2, %v1479_v8 }
  0xef   : > { %v1142_v14 = vpop.f32.mrf.mxu2 }
  0xf0   : > { %v1581_v17 = vsel %vm1513_vm13, %v1479_v8, %v1547_v13  ;;  %v1212_v18 = vadd.f32 %v1142_v14, %v724_v9  ;;  %v589_v19 = vpop.f32.mrf.mxu0  ;;  %v728_v22 = vpop.f32.mrf.mxu1  ;;  %v483_v13 = vsel %vm351_vm3, %v478_v0, %v482_v1  ;;  %v332_v14 = vunpack.c.l.b16 %v259_v4 }
  0xf1   : > { %v2076_v21 = vpack.c.bf16 %v1581_v17, %v1580_v16  ;;  %v726_v32 = vadd.f32 %v725_v5, %v589_v19  ;;  %v890_v16 = vunpack.c.l.b16 %v817_v7 }
  0xf2   : > { %v1442_v26 = vadd.f32 %v1372_v10, %v1212_v18 }
  0xf3   : > { %2145 = vst [vmem:[%s2399_s12 + $0x20] sm:$0xff] %v2076_v21   ;;  %1897 = vmatmul.msk.bf16.gmra.mxu1 %vm497_vm1, %v2460_v39  ;;  %v1032_v39 = vsel %vm351_vm3, %v1027_v30, %v1031_v31  ;;  %v908_v23 = vpack.c.b16 %v890_v16, %v890_v16 }
  0xf4   : > { %v1374_v27 = vpop.f32.mrf.mxu3  ;;  %v1480_v35 = vadd.f32 %v2378_v41, %v1442_v26  ;;  %v484_v26 = vshrl.u32 %v2504_v47, 16 }
  0xf6   : > { %v1548_v43 = vmul.f32 0.2, %v1480_v35  ;;  %vm1514_vm14 = vcmp.ge.f32.partialorder %v1480_v35, 0.0 }
  0xf7   : > { %v1144_v34 = vpop.f32.mrf.mxu2 }
  0xf8   : > { %v1213_v36 = vadd.f32 %v1144_v34, %v726_v32  ;;  %v592_v37 = vpop.f32.mrf.mxu0  ;;  %v730_v40 = vpop.f32.mrf.mxu1  ;;  %v1582_v52 = vsel %vm1514_vm14, %v1480_v35, %v1548_v43  ;;  %v1041_v34 = vshrl.u32 %v2507_v48, 16  ;;  %v1045_v35 = vshll.u32 %v908_v23, 16 }
  0xf9   : > { %2007 = vmatmul.msk.bf16.gmra.mxu3 %vm497_vm1, %v1274_v33  ;;  %v729_v45 = vadd.f32 %v728_v22, %v592_v37  ;;  %v350_v22 = vpack.c.b16 %v332_v14, %v332_v14 }
  0xfa   : > { %v1443_v42 = vadd.f32 %v1374_v27, %v1213_v36  ;;  %v1277_v36 = vrot.slane %v908_v23, 1  ;;  %v1047_v43 = vrot.slane %v1045_v35, 1 }
  0xfb   : > { %1876 = vmatmul.msk.bf16.gmra.mxu0 %vm497_vm1, %v475_v38  ;;  %v488_v31 = vshll.u32 %v350_v22, 16 }
  0xfc   : > { %v1481_v44 = vadd.f32 %v2378_v41, %v1443_v42  ;;  %1984 = vmatmul.msk.bf16.gmra.mxu2 %vm497_vm1, %v1032_v39  ;;  %v1377_v46 = vpop.f32.mrf.mxu3  ;;  %v486_v39 = vor.u32 %v484_v26, %v482_v1  ;;  %v1043_v42 = vor.u32 %v1041_v34, %v1039_v3 }
  0xfe   : > { %vm1515_vm15 = vcmp.ge.f32.partialorder %v1481_v44, 0.0  ;;  %v1549_v49 = vmul.f32 0.2, %v1481_v44 }
  0xff   : > { %v1147_v50 = vpop.f32.mrf.mxu2 }
 0x100   : > { %v1583_v53 = vsel %vm1515_vm15, %v1481_v44, %v1549_v49  ;;  %v1214_v54 = vadd.f32 %v1147_v50, %v729_v45  ;;  %v594_v55 = vpop.f32.mrf.mxu0  ;;  %v733_v58 = vpop.f32.mrf.mxu1  ;;  %v1278_v45 = vsel %vm1243_vm2, %v1275_v61, %v1277_v36 }
 0x101   : > { %v2081_v57 = vpack.c.bf16 %v1583_v53, %v1582_v52  ;;  %v731_v5 = vadd.f32 %v730_v40, %v594_v55  ;;  %v490_v40 = vrot.slane %v488_v31, 1  ;;  %v1048_v52 = vsel %vm351_vm3, %v1043_v42, %v1047_v43 }
 0x102   : > { %v1444_v62 = vadd.f32 %v1377_v46, %v1214_v54 }
 0x103   : > { %2146 = vst [vmem:[%s2399_s12 + $0x28] sm:$0xff] %v2081_v57   ;;  %1898 = vmatmul.msk.bf16.gmra.mxu1 %vm497_vm1, %v2482_v11  ;;  %v1040_v11 = vsel %vm351_vm3, %v1035_v2, %v1039_v3  ;;  %v491_v51 = vsel %vm351_vm3, %v486_v39, %v490_v40 }
 0x104   : > { %v1379_v63 = vpop.f32.mrf.mxu3  ;;  %v1482_v9 = vadd.f32 %v2378_v41, %v1444_v62 }
 0x106   : > { %v1550_v18 = vmul.f32 0.2, %v1482_v9  ;;  %vm1516_vm0 = vcmp.ge.f32.partialorder %v1482_v9, 0.0 }
 0x107   : > { %v1149_v8 = vpop.f32.mrf.mxu2 }
 0x108   : > { %v1215_v10 = vadd.f32 %v1149_v8, %v731_v5  ;;  %v597_v12 = vpop.f32.mrf.mxu0  ;;  %v735_v15 = vpop.f32.mrf.mxu1  ;;  %v1584_v27 = vsel %vm1516_vm0, %v1482_v9, %v1550_v18 }
 0x109   : > { %2008 = vmatmul.msk.bf16.gmra.mxu3 %vm497_vm1, %v1276_v6  ;;  %v734_v20 = vadd.f32 %v733_v58, %v597_v12 }
 0x10a   : > { %v1445_v17 = vadd.f32 %v1379_v63, %v1215_v10 }
 0x10b   : > { %1877 = vmatmul.msk.bf16.gmra.mxu0 %vm497_vm1, %v483_v13 }
 0x10c   : > { %v1483_v19 = vadd.f32 %v2378_v41, %v1445_v17  ;;  %1985 = vmatmul.msk.bf16.gmra.mxu2 %vm497_vm1, %v1040_v11  ;;  %v1382_v21 = vpop.f32.mrf.mxu3 }
 0x10e   : > { %vm1517_vm4 = vcmp.ge.f32.partialorder %v1483_v19, 0.0  ;;  %v1551_v24 = vmul.f32 0.2, %v1483_v19 }
 0x10f   : > { %v1152_v25 = vpop.f32.mrf.mxu2 }
 0x110   : > { %v1585_v28 = vsel %vm1517_vm4, %v1483_v19, %v1551_v24  ;;  %v1216_v29 = vadd.f32 %v1152_v25, %v734_v20  ;;  %v599_v30 = vpop.f32.mrf.mxu0  ;;  %v738_v33 = vpop.f32.mrf.mxu1 }
 0x111   : > { %v2086_v32 = vpack.c.bf16 %v1585_v28, %v1584_v27  ;;  %v736_v44 = vadd.f32 %v735_v15, %v599_v30 }
 0x112   : > { %v1446_v37 = vadd.f32 %v1382_v21, %v1216_v29 }
 0x113   : > { %2147 = vst [vmem:[%s2399_s12 + $0x30] sm:$0xff] %v2086_v32   ;;  %1899 = vmatmul.msk.bf16.gmra.mxu1 %vm497_vm1, %v2504_v47 }
 0x114   : > { %v1384_v38 = vpop.f32.mrf.mxu3  ;;  %v1484_v49 = vadd.f32 %v2378_v41, %v1446_v37 }
 0x116   : > { %v1552_v54 = vmul.f32 0.2, %v1484_v49  ;;  %vm1518_vm2 = vcmp.ge.f32.partialorder %v1484_v49, 0.0 }
 0x117   : > { %v1154_v46 = vpop.f32.mrf.mxu2 }
 0x118   : > { %v1217_v50 = vadd.f32 %v1154_v46, %v736_v44  ;;  %v602_v48 = vpop.f32.mrf.mxu0  ;;  %v740_v53 = vpop.f32.mrf.mxu1  ;;  %v1586_v60 = vsel %vm1518_vm2, %v1484_v49, %v1552_v54 }
 0x119   : > { %2009 = vmatmul.msk.bf16.gmra.mxu3 %vm497_vm1, %v1278_v45  ;;  %v739_v56 = vadd.f32 %v738_v33, %v602_v48 }
 0x11a   : > { %v1447_v47 = vadd.f32 %v1384_v38, %v1217_v50 }
 0x11b   : > { %1878 = vmatmul.msk.bf16.gmra.mxu0 %vm497_vm1, %v491_v51 }
 0x11c   : > { %v1485_v55 = vadd.f32 %v2378_v41, %v1447_v47  ;;  %1986 = vmatmul.msk.bf16.gmra.mxu2 %vm497_vm1, %v1048_v52  ;;  %v1387_v57 = vpop.f32.mrf.mxu3 }
 0x11e   : > { %vm1519_vm5 = vcmp.ge.f32.partialorder %v1485_v55, 0.0  ;;  %v1553_v58 = vmul.f32 0.2, %v1485_v55 }
 0x11f   : > { %v1157_v59 = vpop.f32.mrf.mxu2 }
 0x120   : > { %v1587_v61 = vsel %vm1519_vm5, %v1485_v55, %v1553_v58  ;;  %v1218_v62 = vadd.f32 %v1157_v59, %v739_v56  ;;  %v604_v63 = vpop.f32.mrf.mxu0  ;;  %v743_v1 = vpop.f32.mrf.mxu1 }
 0x121   : > { %v2091_v0 = vpack.c.bf16 %v1587_v61, %v1586_v60  ;;  %v741_v4 = vadd.f32 %v740_v53, %v604_v63 }
 0x122   : > { %v1448_v2 = vadd.f32 %v1387_v57, %v1218_v62 }
 0x123   : > { %2148 = vst [vmem:[%s2399_s12 + $0x38] sm:$0xff] %v2091_v0  }
 0x124   : > { %v1389_v3 = vpop.f32.mrf.mxu3  ;;  %v1486_v6 = vadd.f32 %v2378_v41, %v1448_v2 }
 0x126   : > { %v1554_v12 = vmul.f32 0.2, %v1486_v6  ;;  %vm1520_vm1 = vcmp.ge.f32.partialorder %v1486_v6, 0.0 }
 0x127   : > { %v1159_v5 = vpop.f32.mrf.mxu2 }
 0x128   : > { %v1219_v7 = vadd.f32 %v1159_v5, %v741_v4  ;;  %v607_v8 = vpop.f32.mrf.mxu0  ;;  %v745_v9 = vpop.f32.mrf.mxu1  ;;  %v1588_v17 = vsel %vm1520_vm1, %v1486_v6, %v1554_v12 }
 0x129   : > { %v744_v14 = vadd.f32 %v743_v1, %v607_v8 }
 0x12a   : > { %v1449_v10 = vadd.f32 %v1389_v3, %v1219_v7 }
 0x12c   : > { %v1487_v13 = vadd.f32 %v2378_v41, %v1449_v10  ;;  %v1392_v11 = vpop.f32.mrf.mxu3 }
 0x12e   : > { %vm1521_vm3 = vcmp.ge.f32.partialorder %v1487_v13, 0.0  ;;  %v1555_v15 = vmul.f32 0.2, %v1487_v13 }
 0x12f   : > { %v1162_v16 = vpop.f32.mrf.mxu2 }
 0x130   : > { %v1589_v18 = vsel %vm1521_vm3, %v1487_v13, %v1555_v15  ;;  %v1220_v19 = vadd.f32 %v1162_v16, %v744_v14  ;;  %v609_v20 = vpop.f32.mrf.mxu0  ;;  %v748_v22 = vpop.f32.mrf.mxu1 }
 0x131   : > { %v2096_v21 = vpack.c.bf16 %v1589_v18, %v1588_v17  ;;  %v746_v25 = vadd.f32 %v745_v9, %v609_v20 }
 0x132   : > { %v1450_v23 = vadd.f32 %v1392_v11, %v1220_v19 }
 0x133   : > { %2149 = vst [vmem:[%s2399_s12 + $0x40] sm:$0xff] %v2096_v21  }
 0x134   : > { %v1394_v24 = vpop.f32.mrf.mxu3  ;;  %v1488_v27 = vadd.f32 %v2378_v41, %v1450_v23 }
 0x136   : > { %v1556_v32 = vmul.f32 0.2, %v1488_v27  ;;  %vm1522_vm6 = vcmp.ge.f32.partialorder %v1488_v27, 0.0 }
 0x137   : > { %v1164_v26 = vpop.f32.mrf.mxu2 }
 0x138   : > { %v1221_v28 = vadd.f32 %v1164_v26, %v746_v25  ;;  %v612_v29 = vpop.f32.mrf.mxu0  ;;  %v750_v30 = vpop.f32.mrf.mxu1  ;;  %v1590_v38 = vsel %vm1522_vm6, %v1488_v27, %v1556_v32 }
 0x139   : > { %v749_v34 = vadd.f32 %v748_v22, %v612_v29 }
 0x13a   : > { %v1451_v31 = vadd.f32 %v1394_v24, %v1221_v28 }
 0x13c   : > { %v1489_v33 = vadd.f32 %v2378_v41, %v1451_v31  ;;  %v1397_v35 = vpop.f32.mrf.mxu3 }
 0x13e   : > { %vm1523_vm7 = vcmp.ge.f32.partialorder %v1489_v33, 0.0  ;;  %v1557_v36 = vmul.f32 0.2, %v1489_v33 }
 0x13f   : > { %v1167_v37 = vpop.f32.mrf.mxu2 }
 0x140   : > { %v1591_v39 = vsel %vm1523_vm7, %v1489_v33, %v1557_v36  ;;  %v1222_v40 = vadd.f32 %v1167_v37, %v749_v34  ;;  %v614_v42 = vpop.f32.mrf.mxu0  ;;  %v753_v44 = vpop.f32.mrf.mxu1 }
 0x141   : > { %v2101_v43 = vpack.c.bf16 %v1591_v39, %v1590_v38  ;;  %v751_v49 = vadd.f32 %v750_v30, %v614_v42 }
 0x142   : > { %v1452_v45 = vadd.f32 %v1397_v35, %v1222_v40 }
 0x143   : > { %2150 = vst [vmem:[%s2399_s12 + $0x48] sm:$0xff] %v2101_v43  }
 0x144   : > { %v1399_v46 = vpop.f32.mrf.mxu3  ;;  %v1490_v48 = vadd.f32 %v2378_v41, %v1452_v45 }
 0x146   : > { %v1558_v54 = vmul.f32 0.2, %v1490_v48  ;;  %vm1524_vm8 = vcmp.ge.f32.partialorder %v1490_v48, 0.0 }
 0x147   : > { %v1169_v50 = vpop.f32.mrf.mxu2 }
 0x148   : > { %v1223_v51 = vadd.f32 %v1169_v50, %v751_v49  ;;  %v617_v52 = vpop.f32.mrf.mxu0  ;;  %v755_v53 = vpop.f32.mrf.mxu1  ;;  %v1592_v60 = vsel %vm1524_vm8, %v1490_v48, %v1558_v54 }
 0x149   : > { %v754_v56 = vadd.f32 %v753_v44, %v617_v52 }
 0x14a   : > { %v1453_v47 = vadd.f32 %v1399_v46, %v1223_v51 }
 0x14c   : > { %v1491_v55 = vadd.f32 %v2378_v41, %v1453_v47  ;;  %v1402_v57 = vpop.f32.mrf.mxu3 }
 0x14e   : > { %vm1525_vm9 = vcmp.ge.f32.partialorder %v1491_v55, 0.0  ;;  %v1559_v58 = vmul.f32 0.2, %v1491_v55 }
 0x14f   : > { %v1172_v59 = vpop.f32.mrf.mxu2 }
 0x150   : > { %v1593_v61 = vsel %vm1525_vm9, %v1491_v55, %v1559_v58  ;;  %v1224_v62 = vadd.f32 %v1172_v59, %v754_v56  ;;  %v619_v63 = vpop.f32.mrf.mxu0  ;;  %v758_v1 = vpop.f32.mrf.mxu1 }
 0x151   : > { %v2106_v0 = vpack.c.bf16 %v1593_v61, %v1592_v60  ;;  %v756_v4 = vadd.f32 %v755_v53, %v619_v63 }
 0x152   : > { %v1454_v2 = vadd.f32 %v1402_v57, %v1224_v62 }
 0x153   : > { %2151 = vst [vmem:[%s2399_s12 + $0x50] sm:$0xff] %v2106_v0  }
 0x154   : > { %v1404_v3 = vpop.f32.mrf.mxu3  ;;  %v1492_v6 = vadd.f32 %v2378_v41, %v1454_v2 }
 0x156   : > { %v1560_v12 = vmul.f32 0.2, %v1492_v6  ;;  %vm1526_vm10 = vcmp.ge.f32.partialorder %v1492_v6, 0.0 }
 0x157   : > { %v1174_v5 = vpop.f32.mrf.mxu2 }
 0x158   : > { %v1225_v7 = vadd.f32 %v1174_v5, %v756_v4  ;;  %v622_v8 = vpop.f32.mrf.mxu0  ;;  %v760_v9 = vpop.f32.mrf.mxu1  ;;  %v1594_v17 = vsel %vm1526_vm10, %v1492_v6, %v1560_v12 }
 0x159   : > { %v759_v14 = vadd.f32 %v758_v1, %v622_v8 }
 0x15a   : > { %v1455_v10 = vadd.f32 %v1404_v3, %v1225_v7 }
 0x15c   : > { %v1493_v13 = vadd.f32 %v2378_v41, %v1455_v10  ;;  %v1407_v11 = vpop.f32.mrf.mxu3 }
 0x15e   : > { %vm1527_vm11 = vcmp.ge.f32.partialorder %v1493_v13, 0.0  ;;  %v1561_v15 = vmul.f32 0.2, %v1493_v13 }
 0x15f   : > { %v1177_v16 = vpop.f32.mrf.mxu2 }
 0x160   : > { %v1595_v18 = vsel %vm1527_vm11, %v1493_v13, %v1561_v15  ;;  %v1226_v19 = vadd.f32 %v1177_v16, %v759_v14  ;;  %v624_v20 = vpop.f32.mrf.mxu0  ;;  %v763_v22 = vpop.f32.mrf.mxu1 }
 0x161   : > { %v2111_v21 = vpack.c.bf16 %v1595_v18, %v1594_v17  ;;  %v761_v25 = vadd.f32 %v760_v9, %v624_v20 }
 0x162   : > { %v1456_v23 = vadd.f32 %v1407_v11, %v1226_v19 }
 0x163   : > { %2152 = vst [vmem:[%s2399_s12 + $0x58] sm:$0xff] %v2111_v21  }
 0x164   : > { %v1409_v24 = vpop.f32.mrf.mxu3  ;;  %v1494_v27 = vadd.f32 %v2378_v41, %v1456_v23 }
 0x166   : > { %v1562_v32 = vmul.f32 0.2, %v1494_v27  ;;  %vm1528_vm12 = vcmp.ge.f32.partialorder %v1494_v27, 0.0 }
 0x167   : > { %v1179_v26 = vpop.f32.mrf.mxu2 }
 0x168   : > { %v1227_v28 = vadd.f32 %v1179_v26, %v761_v25  ;;  %v627_v29 = vpop.f32.mrf.mxu0  ;;  %v765_v30 = vpop.f32.mrf.mxu1  ;;  %v1596_v38 = vsel %vm1528_vm12, %v1494_v27, %v1562_v32  ;;  %v2185_v32 = vld [vmem:[%s2579_s2] ss:$0 sm:$0xff] }
 0x169   : > { %v764_v34 = vadd.f32 %v763_v22, %v627_v29 }
 0x16a   : > { %v1457_v31 = vadd.f32 %v1409_v24, %v1227_v28 }
 0x16c   : > { %v1495_v33 = vadd.f32 %v2378_v41, %v1457_v31  ;;  %v1412_v35 = vpop.f32.mrf.mxu3 }
 0x16e   : > { %vm1529_vm13 = vcmp.ge.f32.partialorder %v1495_v33, 0.0  ;;  %v1563_v36 = vmul.f32 0.2, %v1495_v33 }
 0x16f   : > { %v1182_v37 = vpop.f32.mrf.mxu2 }
 0x170   : > { %v1597_v39 = vsel %vm1529_vm13, %v1495_v33, %v1563_v36  ;;  %v1228_v40 = vadd.f32 %v1182_v37, %v764_v34  ;;  %v629_v42 = vpop.f32.mrf.mxu0  ;;  %v768_v44 = vpop.f32.mrf.mxu1 }
 0x171   : > { %v2116_v43 = vpack.c.bf16 %v1597_v39, %v1596_v38  ;;  %v766_v49 = vadd.f32 %v765_v30, %v629_v42 }
 0x172   : > { %v1458_v45 = vadd.f32 %v1412_v35, %v1228_v40 }
 0x173   : > { %2153 = vst [vmem:[%s2399_s12 + $0x60] sm:$0xff] %v2116_v43  }
 0x174   : > { %v1414_v46 = vpop.f32.mrf.mxu3  ;;  %v1496_v48 = vadd.f32 %v2378_v41, %v1458_v45 }
 0x176   : > { %v1564_v47 = vmul.f32 0.2, %v1496_v48  ;;  %vm1530_vm14 = vcmp.ge.f32.partialorder %v1496_v48, 0.0 }
 0x177   : > { %v1184_v50 = vpop.f32.mrf.mxu2 }
 0x178   : > { %v1229_v51 = vadd.f32 %v1184_v50, %v766_v49  ;;  %v632_v52 = vpop.f32.mrf.mxu0  ;;  %v770_v57 = vpop.f32.mrf.mxu1  ;;  %v1598_v60 = vsel %vm1530_vm14, %v1496_v48, %v1564_v47 }
 0x179   : > { %v769_v55 = vadd.f32 %v768_v44, %v632_v52 }
 0x17a   : > { %v1459_v53 = vadd.f32 %v1414_v46, %v1229_v51 }
 0x17c   : > { %v1497_v54 = vadd.f32 %v2378_v41, %v1459_v53  ;;  %v1417_v56 = vpop.f32.mrf.mxu3 }
 0x17e   : > { %vm1531_vm15 = vcmp.ge.f32.partialorder %v1497_v54, 0.0  ;;  %v1565_v58 = vmul.f32 0.2, %v1497_v54 }
 0x17f   : > { %v1187_v59 = vpop.f32.mrf.mxu2 }
 0x180   : > { %v1599_v61 = vsel %vm1531_vm15, %v1497_v54, %v1565_v58  ;;  %v1230_v62 = vadd.f32 %v1187_v59, %v769_v55  ;;  %v634_v63 = vpop.f32.mrf.mxu0  ;;  %v773_v4 = vpop.f32.mrf.mxu1 }
 0x181   : > { %v2121_v0 = vpack.c.bf16 %v1599_v61, %v1598_v60  ;;  %v771_v3 = vadd.f32 %v770_v57, %v634_v63 }
 0x182   : > { %v1460_v1 = vadd.f32 %v1417_v56, %v1230_v62 }
 0x183   : > { %2154 = vst [vmem:[%s2399_s12 + $0x68] sm:$0xff] %v2121_v0  }
 0x184   : > { %v1419_v2 = vpop.f32.mrf.mxu3  ;;  %v1498_v6 = vadd.f32 %v2378_v41, %v1460_v1 }
 0x186   : > { %v1566_v10 = vmul.f32 0.2, %v1498_v6  ;;  %vm1532_vm0 = vcmp.ge.f32.partialorder %v1498_v6, 0.0 }
 0x187   : > { %v1189_v5 = vpop.f32.mrf.mxu2 }
 0x188   : > { %v1231_v7 = vadd.f32 %v1189_v5, %v771_v3  ;;  %v637_v8 = vpop.f32.mrf.mxu0  ;;  %v1600_v16 = vsel %vm1532_vm0, %v1498_v6, %v1566_v10  ;;  %v775_v21 = vpop.f32.mrf.mxu1 }
 0x189   : > { %v774_v13 = vadd.f32 %v773_v4, %v637_v8 }
 0x18a   : > { %v1461_v9 = vadd.f32 %v1419_v2, %v1231_v7 }
 0x18c   : > { %v1499_v12 = vadd.f32 %v2378_v41, %v1461_v9  ;;  %v1422_v14 = vpop.f32.mrf.mxu3 }
 0x18e   : > { %vm1533_vm4 = vcmp.ge.f32.partialorder %v1499_v12, 0.0  ;;  %v1567_v11 = vmul.f32 0.2, %v1499_v12 }
 0x18f   : > { %v1192_v15 = vpop.f32.mrf.mxu2 }
 0x190   : > { %v1601_v17 = vsel %vm1533_vm4, %v1499_v12, %v1567_v11  ;;  %v1232_v18 = vadd.f32 %v1192_v15, %v774_v13  ;;  %v639_v19 = vpop.f32.mrf.mxu0  ;;  %v778_v30 = vpop.f32.mrf.mxu1 }
 0x191   : > { %v2126_v20 = vpack.c.bf16 %v1601_v17, %v1600_v16  ;;  %v776_v24 = vadd.f32 %v775_v21, %v639_v19 }
 0x192   : > { %v1462_v22 = vadd.f32 %v1422_v14, %v1232_v18 }
 0x193   : > { %2155 = vst [vmem:[%s2399_s12 + $0x70] sm:$0xff] %v2126_v20  }
 0x194   : > { %v1424_v23 = vpop.f32.mrf.mxu3  ;;  %v1500_v26 = vadd.f32 %v2378_v41, %v1462_v22 }
 0x196   : > { %v1568_v31 = vmul.f32 0.2, %v1500_v26  ;;  %vm1534_vm2 = vcmp.ge.f32.partialorder %v1500_v26, 0.0 }
 0x197   : > { %v1194_v25 = vpop.f32.mrf.mxu2 }
 0x198   : > { %v1233_v27 = vadd.f32 %v1194_v25, %v776_v24  ;;  %v642_v28 = vpop.f32.mrf.mxu0  ;;  %v1602_v38 = vsel %vm1534_vm2, %v1500_v26, %v1568_v31  ;;  %v780_v44 = vpop.f32.mrf.mxu1 }
 0x199   : > { %v779_v34 = vadd.f32 %v778_v30, %v642_v28 }
 0x19a   : > { %v1463_v29 = vadd.f32 %v1424_v23, %v1233_v27 }
 0x19c   : > { %v1501_v33 = vadd.f32 %v2185_v32, %v1463_v29  ;;  %v1427_v36 = vpop.f32.mrf.mxu3 }
 0x19e   : > { %vm1535_vm5 = vcmp.ge.f32.partialorder %v1501_v33, 0.0  ;;  %v1569_v35 = vmul.f32 0.2, %v1501_v33 }
 0x19f   : > { %v1197_v37 = vpop.f32.mrf.mxu2 }
 0x1a0   : > { %v1603_v39 = vsel %vm1535_vm5, %v1501_v33, %v1569_v35  ;;  %v1234_v41 = vadd.f32 %v1197_v37, %v779_v34  ;;  %v644_v42 = vpop.f32.mrf.mxu0 }
 0x1a1   : > { %v2131_v40 = vpack.c.bf16 %v1603_v39, %v1602_v38  ;;  %v781_v45 = vadd.f32 %v780_v44, %v644_v42 }
 0x1a2   : > { %v1464_v43 = vadd.f32 %v1427_v36, %v1234_v41 }
 0x1a3   : > { %2156 = vst [vmem:[%s2399_s12 + $0x78] sm:$0xff] %v2131_v40  }
 0x1a4   : > { %v1502_v49 = vadd.f32 %v2185_v32, %v1464_v43  ;;  %v1429_v48 = vpop.f32.mrf.mxu3 }
 0x1a6   : > { %v1570_v52 = vmul.f32 0.2, %v1502_v49  ;;  %vm1536_vm1 = vcmp.ge.f32.partialorder %v1502_v49, 0.0 }
 0x1a7   : > { %v1199_v46 = vpop.f32.mrf.mxu2 }
 0x1a8   : > { %v1235_v50 = vadd.f32 %v1199_v46, %v781_v45  ;;  %v1604_v54 = vsel %vm1536_vm1, %v1502_v49, %v1570_v52 }
 0x1aa   : > { %v1465_v51 = vadd.f32 %v1429_v48, %v1235_v50 }
 0x1ac   : > { %v1503_v53 = vadd.f32 %v2185_v32, %v1465_v51 }
 0x1ae   : > { %vm1537_vm3 = vcmp.ge.f32.partialorder %v1503_v53, 0.0  ;;  %v1571_v47 = vmul.f32 0.2, %v1503_v53 }
 0x1b0   : > { %v1605_v55 = vsel %vm1537_vm3, %v1503_v53, %v1571_v47 }
 0x1b1   : > { %v2136_v56 = vpack.c.bf16 %v1605_v55, %v1604_v54 }
 0x1b3   : > { %2157 = vst [vmem:[%s2399_s12 + $0x80] sm:$0xff] %v2136_v56  }
 0x1b4 PF: > { %s13_s14 = sadd.s32 1, %s2208_s14   ;;  %s2581_s12 = smov %s2204_s13 }
 0x1b5   : > { %p10_p5 = scmp.ge.s32.totalorder %s13_s14, 4   ;;  %s2582_s13 = smov %s2584_s15 }
 0x1b7   :  { %12 = sbr.rel (!%p10_p5) target bundleno = 2 (0x2), region = 71 }

// kernel: _lambda_.9
= control target key start
LH: loop header
LB: loop body
LE: loop exit
PB: predicated region body
PF: predicated region fallthrough
CT: control target
= control target key end

     0   :  { %s1430_s12 = smov 0   ;;  %s1432_s13 = smov 0   ;;  %s1844_s0 = inlined_call_operand.vmem [shape: bf16[2,90,32], index: 0, kind: input, shape index: {}]   ;;  %s1845_s1 = inlined_call_operand.vmem [shape: bf16[4,32,128], index: 1, kind: input, shape index: {}]   ;;  %s1846_s2 = inlined_call_operand.vmem [shape: bf16[2,72,128], index: 2, kind: output, shape index: {0}]   ;;  %s1847_s3 = inlined_call_operand.vmem [shape: f32[2,2,128], index: 3, kind: output, shape index: {1}]  }
   0x1   :  { %s1434_s14 = smov 0  }
   0x2 LB: > { %s26_s15 = sadd.s32 1, %s1403_s13  ;;  %p1214_p0 = scmp.ge.s32.totalorder %s1407_s14, 1  ;;  %s1407_s14 = sphi %s1434_s14, %s14_s14   ;;  %s1403_s13 = sphi %s1432_s13, %s1877_s13   ;;  %s1399_s12 = sphi %s1430_s12, %s1876_s12  }
   0x3   : > { %p28_p1 = scmp.ge.s32.totalorder %s26_s15, 2  ;;  %p165_p2 = scmp.lt.s32.totalorder %s1407_s14, 3 }
   0x5   : > { %s1879_s15 = smov (%p28_p1, %s26_s15), 0  ;;  %p166_p3 = pnand %p1214_p0, %p165_p2 }
   0x6   : > { %p203_p4 = scmp.lt.s32.totalorder (!%p166_p3), %s1399_s12, 1 }
   0x7   : > { %169 = sbr.rel (%p166_p3) target bundleno = 243 (0xf3), region = 28 }
   0xc   : > { %v1321_v0 = vld [vmem:[%s1845_s1 + $0x8] sm:$0xff]  ;;  %v1331_v1 = vld [vmem:[%s1845_s1 + $0x38] sm:$0xff]  ;;  %v1320_v4 = vld [vmem:[%s1845_s1] sm:$0xff]  ;;  %s1881_s12 = smov (!%p203_p4, %s1399_s12), 1  ;;  %vm324_vm0 = vcmask 261120   ;;  %vm587_vm1 = vcmask 1046528  }
   0xd   : > { %v1323_v2 = vld [vmem:[%s1845_s1 + $0x18] sm:$0xff]  ;;  %v1329_v3 = vld [vmem:[%s1845_s1 + $0x28] sm:$0xff]  ;;  %403 = vmatpush.bf16.msra.mxu1 %v1321_v0  ;;  %630 = vmatpush.bf16.msra.mxu3 %v1331_v1  ;;  %v1330_v5 = vld [vmem:[%s1845_s1 + $0x30] sm:$0xff]  ;;  %s1355_s5 = smul.u32 48, %s1881_s12  ;;  %vm272_vm2 = vsmask.f32 7424 }
   0xe   : > { %346 = vmatpush.bf16.msra.mxu0 %v1323_v2  ;;  %542 = vmatpush.bf16.msra.mxu2 %v1329_v3  ;;  %v1322_v6 = vld [vmem:[%s1845_s1 + $0x10] sm:$0xff]  ;;  %v1328_v7 = vld [vmem:[%s1845_s1 + $0x20] sm:$0xff]  ;;  %s1356_s9 = smul.u32 36, %s1881_s12  ;;  %s1217_s17 = sshll.u32 %s1881_s12, 1 }
   0xf   : > { %s1478_s8 = scalar_lea.vmem %s1844_s0, %s1355_s5  ;;  %s226_s20 = scalar_lea.vmem %s1847_s3, %s1217_s17 }
  0x10   : > { %v1316_v8 = vld [vmem:[%s1478_s8] sm:$0xff]  ;;  %v1382_v10 = vld [vmem:[%s1478_s8 + $0x4] sm:$0xf0]  ;;  %v1324_v11 = vld [vmem:[%s1478_s8 + $0xc] sm:$0xff]  ;;  %s1656_s16 = scalar_lea.vmem %s1846_s2, %s1356_s9 }
  0x11   : > { %404 = vmatpush.bf16.msra.mxu1 %v1320_v4  ;;  %631 = vmatpush.bf16.msra.mxu3 %v1330_v5  ;;  %v431_v9 = vld [vmem:[%s1478_s8 + $0x4] sm:$0xff]   ;;  %v276_v14 = vshll.u32 %v1316_v8, 16  ;;  %v274_v15 = vshrl.u32 %v1316_v8, 16  ;;  %v478_v17 = vshll.u32 %v1324_v11, 16  ;;  %v589_v19 = vrot.slane %v1324_v11, 1  ;;  %v1318_v31 = vld [vmem:[%s1478_s8 + $0x10] sm:$0xff] }
  0x12   : > { %347 = vmatpush.bf16.msra.mxu0 %v1322_v6  ;;  %543 = vmatpush.bf16.msra.mxu2 %v1328_v7  ;;  %v1383_v12 = vld [vmem:[%s1478_s8 + $0x4] sm:$0xe]  ;;  %v1317_v13 = vld [vmem:[%s1478_s8 + $0x8] sm:$0xff]  ;;  %v471_v22 = vshrl.u32 %v431_v9, 16  ;;  %v473_v23 = vshll.u32 %v431_v9, 16  ;;  %v1325_v33 = vld [vmem:[%s1478_s8 + $0x14] sm:$0xff] }
  0x13   : > { %v281_v16 = vshll.u32 %v1317_v13, 16  ;;  %v1384_v18 = vor.u32 %v1383_v12, %v1382_v10  ;;  %v278_v20 = vrot.slane %v276_v14, 1  ;;  %v480_v27 = vrot.slane %v478_v17, 1  ;;  %v1319_v46 = vld [vmem:[%s1478_s8 + $0x18] sm:$0xff]  ;;  %v236_v55 = vld [vmem:[%s1478_s8 + $0x20] sm:$0xf] }
  0x14   : > { %1259 = vmatmul.msk.bf16.vlgmr.msra.gmra.mxu1 %vm324_vm0, %v1316_v8  ;;  %v475_v26 = vrot.slane %v473_v23, 1  ;;  %v285_v34 = vshrl.u32 %v1317_v13, 16  ;;  %v289_v35 = vshll.u32 %v1318_v31, 16  ;;  %v482_v36 = vshrl.u32 %v1324_v11, 16  ;;  %v1326_v47 = vld [vmem:[%s1478_s8 + $0x1c] sm:$0xff] }
  0x15   : > { %v283_v21 = vrot.slane %v281_v16, 1  ;;  %v588_v24 = vrot.slane %v1384_v18, 1  ;;  %v279_v25 = vor.u32 %v278_v20, %v274_v15  ;;  %v486_v37 = vshll.u32 %v1325_v33, 16  ;;  %v241_v56 = vld [vmem:[%s1478_s8 + $0x24] sm:$0x1] }
  0x16   : > { %v476_v30 = vor.u32 %v475_v26, %v471_v22  ;;  %v591_v38 = vrot.slane %v1325_v33, 1  ;;  %v291_v40 = vrot.slane %v289_v35, 1  ;;  %v484_v41 = vor.u32 %v482_v36, %v480_v27  ;;  %v1282_v1 = vld [vmem:[%s1478_s8 + $0x24] sm:$0xf]  ;;  %v1327_v2 = vld [vmem:[%s1478_s8 + $0x24] sm:$0x10] }
  0x17   : > { %v590_v28 = vsel %vm587_vm1, %v588_v24, %v589_v19  ;;  %v284_v29 = vsel %vm272_vm2, %v279_v25, %v283_v21  ;;  %v287_v39 = vor.u32 %v285_v34, %v283_v21  ;;  %v488_v42 = vrot.slane %v486_v37, 1 }
  0x18   : > { %1309 = vmatmul.msk.bf16.vlgmr.msra.gmra.mxu3 %vm324_vm0, %v590_v28  ;;  %1246 = vmatmul.msk.bf16.vlgmr.msra.gmra.mxu0 %vm324_vm0, %v284_v29  ;;  %v481_v32 = vsel %vm272_vm2, %v476_v30, %v480_v27  ;;  %v592_v43 = vsel %vm587_vm1, %v589_v19, %v591_v38  ;;  %v293_v48 = vshrl.u32 %v1318_v31, 16  ;;  %v297_v49 = vshll.u32 %v1319_v46, 16 }
  0x19   : > { %1292 = vmatmul.msk.bf16.vlgmr.msra.gmra.mxu2 %vm324_vm0, %v481_v32  ;;  %v292_v44 = vsel %vm272_vm2, %v287_v39, %v291_v40  ;;  %v489_v45 = vsel %vm272_vm2, %v484_v41, %v488_v42  ;;  %v490_v50 = vshrl.u32 %v1325_v33, 16  ;;  %v494_v51 = vshll.u32 %v1326_v47, 16 }
  0x1a   : > { %v593_v52 = vrot.slane %v1326_v47, 1  ;;  %v295_v53 = vor.u32 %v293_v48, %v291_v40  ;;  %v299_v54 = vrot.slane %v297_v49, 1  ;;  %v265_v61 = vunpack.c.l.b16 %v236_v55 }
  0x1b   : > { %v492_v57 = vor.u32 %v490_v50, %v488_v42  ;;  %v496_v58 = vrot.slane %v494_v51, 1  ;;  %v266_v62 = vunpack.c.l.b16 %v241_v56  ;;  %v1283_v3 = vor.u32 %v1327_v2, %v1282_v1 }
  0x1c   : > { %v594_v59 = vsel %vm587_vm1, %v591_v38, %v593_v52  ;;  %v300_v60 = vsel %vm272_vm2, %v295_v53, %v299_v54  ;;  %v301_v4 = vshrl.u32 %v1319_v46, 16  ;;  %v498_v6 = vshrl.u32 %v1326_v47, 16 }
  0x1d   : > { %v497_v63 = vsel %vm272_vm2, %v492_v57, %v496_v58  ;;  %v271_v0 = vpack.c.b16 %v266_v62, %v265_v61  ;;  %v502_v7 = vshll.u32 %v1283_v3, 16  ;;  %v595_v8 = vrot.slane %v1283_v3, 1 }
  0x1e   : > { %v303_v9 = vor.u32 %v301_v4, %v299_v54  ;;  %v500_v11 = vor.u32 %v498_v6, %v496_v58  ;;  %v373_v16 = vpack.c.b16 %v265_v61, %v265_v61  ;;  %v506_v18 = vshrl.u32 %v1283_v3, 16 }
  0x1f   : > { %v305_v5 = vshll.u32 %v271_v0, 16  ;;  %v504_v12 = vrot.slane %v502_v7, 1  ;;  %v309_v17 = vshrl.u32 %v271_v0, 16  ;;  %v666_v21 = vlaneseq }
  0x21   : > { %v307_v10 = vrot.slane %v305_v5, 1  ;;  %v505_v15 = vsel %vm272_vm2, %v500_v11, %v504_v12  ;;  %v508_v20 = vor.u32 %v506_v18, %v504_v12  ;;  %v1526_v22 = vshrl.u32 %v666_v21, 7 }
  0x23   : > { %v308_v14 = vsel %vm272_vm2, %v303_v9, %v307_v10  ;;  %v311_v19 = vor.u32 %v309_v17, %v307_v10  ;;  %v679_v23 = vand.u32 65535, %v1526_v22  ;;  %v1530_v24 = vadd.s32 8, %v1526_v22 }
  0x24   : > { %1260 = vmatmul.msk.bf16.gmra.mxu1 %vm324_vm0, %v1317_v13  ;;  %v596_v13 = vsel %vm587_vm1, %v593_v52, %v595_v8  ;;  %v680_v25 = vshrl.u32 %v1526_v22, 16  ;;  %v1540_v33 = vadd.s32 16, %v1526_v22  ;;  %v1548_v40 = vadd.s32 24, %v1526_v22 }
  0x25   : > { %v683_v26 = vmul.u32 58254, %v679_v23  ;;  %v708_v27 = vand.u32 65535, %v1530_v24  ;;  %v682_v28 = vmul.u32 14564, %v679_v23  ;;  %v1551_v41 = vadd.s32 32, %v1526_v22 }
  0x26   : > { %v1534_v29 = vmul.u32 14564, %v680_v25  ;;  %v737_v39 = vand.u32 65535, %v1540_v33  ;;  %v738_v48 = vshrl.u32 %v1540_v33, 16  ;;  %v766_v50 = vand.u32 65535, %v1548_v40 }
  0x27   : > { %v686_v30 = vshll.u32 %v683_v26, 16  ;;  %v1537_v32 = vmul.u32 58254, %v708_v27  ;;  %v711_v36 = vmul.u32 14564, %v708_v27  ;;  %v795_v51 = vand.u32 65535, %v1551_v41 }
  0x28   : > { %1310 = vmatmul.msk.bf16.gmra.mxu3 %vm324_vm0, %v592_v43  ;;  %1247 = vmatmul.msk.bf16.gmra.mxu0 %vm324_vm0, %v292_v44  ;;  %v688_v34 = vshll.u32 %v1534_v29, 16  ;;  %v685_v43 = vmul.u32 58254, %v680_v25  ;;  %v1409_v44 = vmov 0   ;;  %v1558_v49 = vmul.u32 58254, %v737_v39 }
  0x29   : > { %1293 = vmatmul.msk.bf16.gmra.mxu2 %vm324_vm0, %v489_v45  ;;  %vm690_vm3 = vc.u32 %v682_v28, %v686_v30  ;;  %v692_v35 = vadd.s32 %v686_v30, %v682_v28  ;;  %v715_v38 = vshll.u32 %v1537_v32, 16  ;;  %v1564_v56 = vmul.u32 14564, %v738_v48 }
  0x2a   : > { %v691_v45 = vsel %vm690_vm3, 1, %v1409_v44  ;;  %v740_v57 = vmul.u32 14564, %v737_v39  ;;  %v744_v58 = vshll.u32 %v1558_v49, 16  ;;  %v796_v62 = vshrl.u32 %v1551_v41, 16 }
  0x2b   : > { %vm694_vm4 = vc.u32 %v692_v35, %v688_v34  ;;  %v721_v47 = vadd.s32 %v715_v38, %v711_v36  ;;  %vm719_vm5 = vc.u32 %v711_v36, %v715_v38  ;;  %v693_v52 = vadd.s32 %v691_v45, %v685_v43 }
  0x2c   : > { %v695_v53 = vsel %vm694_vm4, 1, %v1409_v44  ;;  %v720_v55 = vsel %vm719_vm5, 1, %v1409_v44  ;;  %v687_v1 = vshrl.u32 %v683_v26, 16  ;;  %v746_v5 = vshll.u32 %v1564_v56, 16 }
  0x2d   : > { %v697_v2 = vadd.s32 %v695_v53, %v693_v52  ;;  %v750_v6 = vadd.s32 %v744_v58, %v740_v57  ;;  %v769_v7 = vmul.u32 14564, %v766_v50  ;;  %vm748_vm7 = vc.u32 %v740_v57, %v744_v58 }
  0x2e   : > { %v798_v10 = vmul.u32 14564, %v795_v51  ;;  %v1578_v11 = vmul.u32 14564, %v796_v62  ;;  %v716_v17 = vshrl.u32 %v1537_v32, 16  ;;  %v745_v58 = vshrl.u32 %v1558_v49, 16 }
  0x2f   : > { %vm1589_vm8 = vc.u32 %v750_v6, %v746_v5 }
  0x30   : > { %v804_v27 = vshll.u32 %v1578_v11, 16  ;;  %v753_v39 = vsel %vm1589_vm8, 1, %v1409_v44 }
  0x34   : > { %1261 = vmatmul.msk.bf16.gmra.mxu1 %vm324_vm0, %v1318_v31  ;;  %v709_v31 = vshrl.u32 %v1530_v24, 16 }
  0x36   : > { %v1543_v37 = vmul.u32 14564, %v709_v31  ;;  %v714_v54 = vmul.u32 58254, %v709_v31 }
  0x38   : > { %1311 = vmatmul.msk.bf16.gmra.mxu3 %vm324_vm0, %v594_v59  ;;  %1248 = vmatmul.msk.bf16.gmra.mxu0 %vm324_vm0, %v300_v60  ;;  %v767_v59 = vshrl.u32 %v1548_v40, 16  ;;  %v1568_v60 = vmul.u32 58254, %v766_v50  ;;  %v722_v3 = vadd.s32 %v720_v55, %v714_v54  ;;  %v718_v34 = vshrl.u32 %v1543_v37, 16 }
  0x39   : > { %1294 = vmatmul.msk.bf16.gmra.mxu2 %vm324_vm0, %v497_v63  ;;  %v1571_v63 = vmul.u32 58254, %v795_v51 }
  0x3a   : > { %v773_v9 = vshll.u32 %v1568_v60, 16  ;;  %v772_v43 = vmul.u32 58254, %v767_v59 }
  0x3b   : > { %v802_v12 = vshll.u32 %v1571_v63, 16  ;;  %v803_v21 = vshrl.u32 %v1571_v63, 16 }
  0x3c   : > { %v779_v25 = vadd.s32 %v773_v9, %v769_v7  ;;  %vm777_vm9 = vc.u32 %v769_v7, %v773_v9 }
  0x3d   : > { %v808_v28 = vadd.s32 %v802_v12, %v798_v10  ;;  %vm806_vm10 = vc.u32 %v798_v10, %v802_v12  ;;  %v778_v45 = vsel %vm777_vm9, 1, %v1409_v44 }
  0x3e   : > { %v807_v50 = vsel %vm806_vm10, 1, %v1409_v44 }
  0x3f   : > { %vm810_vm12 = vc.u32 %v808_v28, %v804_v27 }
  0x44   : > { %1262 = vmatmul.msk.bf16.gmra.mxu1 %vm324_vm0, %v1319_v46  ;;  %v717_v46 = vshll.u32 %v1543_v37, 16 }
  0x46   : > { %vm723_vm6 = vc.u32 %v721_v47, %v717_v46  ;;  %v801_v47 = vmul.u32 58254, %v796_v62 }
  0x47   : > { %v724_v4 = vsel %vm723_vm6, 1, %v1409_v44 }
  0x48   : > { %1312 = vmatmul.msk.bf16.gmra.mxu3 %vm324_vm0, %v596_v13  ;;  %1249 = vmatmul.msk.bf16.gmra.mxu0 %vm324_vm0, %v308_v14  ;;  %v689_v13 = vshrl.u32 %v1534_v29, 16  ;;  %v698_v14 = vadd.s32 %v697_v2, %v687_v1  ;;  %v726_v18 = vadd.s32 %v724_v4, %v722_v3  ;;  %v1596_v29 = vadd.s32 48, %v1526_v22 }
  0x49   : > { %1295 = vmatmul.msk.bf16.gmra.mxu2 %vm324_vm0, %v505_v15  ;;  %v1583_v15 = vadd.s32 40, %v1526_v22  ;;  %v809_v1 = vadd.s32 %v807_v50, %v801_v47  ;;  %v811_v2 = vsel %vm810_vm12, 1, %v1409_v44 }
  0x4a   : > { %v1598_v31 = vadd.s32 %v698_v14, %v689_v13  ;;  %v727_v36 = vadd.s32 %v726_v18, %v716_v17  ;;  %v853_v51 = vand.u32 65535, %v1596_v29  ;;  %v854_v6 = vshrl.u32 %v1596_v29, 16 }
  0x4b   : > { %v824_v35 = vand.u32 65535, %v1583_v15  ;;  %v774_v18 = vshrl.u32 %v1568_v60, 16 }
  0x4c   : > { %v700_v52 = vshrl.u32 %v1598_v31, 3  ;;  %v1622_v57 = vadd.s32 %v727_v36, %v718_v34  ;;  %v1631_v7 = vmul.u32 58254, %v853_v51  ;;  %v1650_v28 = vmul.u32 14564, %v854_v6 }
  0x4d   : > { %v1619_v53 = vmul.u32 58254, %v824_v35  ;;  %v827_v10 = vmul.u32 14564, %v824_v35 }
  0x4e   : > { %v862_v50 = vshll.u32 %v1650_v28, 16 }
  0x4f   : > { %v831_v12 = vshll.u32 %v1619_v53, 16 }
  0x51   : > { %vm835_vm13 = vc.u32 %v827_v10, %v831_v12  ;;  %v837_v36 = vadd.s32 %v831_v12, %v827_v10 }
  0x54   : > { %1263 = vmatmul.msk.bf16.gmra.mxu1 %vm324_vm0, %v373_v16 }
  0x58   : > { %1313 = vmatmul.msk.bf16.gmra.mxu3 %vm324_vm0, %v595_v8  ;;  %1250 = vmatmul.msk.bf16.gmra.mxu0 %vm324_vm0, %v311_v19  ;;  %v1575_v8 = vmul.u32 14564, %v767_v59  ;;  %v743_v19 = vmul.u32 58254, %v738_v48  ;;  %v1613_v48 = vadd.s32 56, %v1526_v22 }
  0x59   : > { %1296 = vmatmul.msk.bf16.gmra.mxu2 %vm324_vm0, %v508_v20  ;;  %v749_v20 = vsel %vm748_vm7, 1, %v1409_v44 }
  0x5a   : > { %v775_v23 = vshll.u32 %v1575_v8, 16  ;;  %v751_v38 = vadd.s32 %v749_v20, %v743_v19  ;;  %v882_v54 = vand.u32 65535, %v1613_v48  ;;  %v883_v13 = vshrl.u32 %v1613_v48, 16 }
  0x5c   : > { %vm1608_vm11 = vc.u32 %v779_v25, %v775_v23  ;;  %v755_v59 = vadd.s32 %v753_v39, %v751_v38  ;;  %v1638_v14 = vmul.u32 58254, %v882_v54  ;;  %v813_v23 = vadd.s32 %v811_v2, %v809_v1 }
  0x5d   : > { %v782_v62 = vsel %vm1608_vm11, 1, %v1409_v44  ;;  %v856_v25 = vmul.u32 14564, %v853_v51  ;;  %v1658_v60 = vmul.u32 14564, %v883_v13  ;;  %v1667_v38 = vadd.s32 64, %v1526_v22 }
  0x5e   : > { %v889_v63 = vshll.u32 %v1638_v14, 16  ;;  %v756_v39 = vadd.s32 %v755_v59, %v745_v58  ;;  %v859_v59 = vmul.u32 58254, %v854_v6 }
  0x91   : > { %v1553_v42 = vpop.f32.mrf.mxu1 }
  0x95   : > { %v349_v61 = vpop.f32.mrf.mxu0 }
  0x96   : > { %v407_v37 = vadd.f32 %v1553_v42, %v349_v61  ;;  %v825_v42 = vshrl.u32 %v1583_v15, 16  ;;  %v780_v61 = vadd.s32 %v778_v45, %v772_v43  ;;  %v776_v43 = vshrl.u32 %v1575_v8, 16 }
  0x97   : > { %v814_v8 = vadd.s32 %v813_v23, %v803_v21 }
  0x98   : > { %v1642_v19 = vmul.u32 14564, %v825_v42  ;;  %v784_v20 = vadd.s32 %v782_v62, %v780_v61  ;;  %v830_v46 = vmul.u32 58254, %v825_v42  ;;  %v805_v61 = vshrl.u32 %v1578_v11, 16 }
  0x99   : > { %v408_v0 = vpop.f32.mrf.mxu1  ;;  %v891_v62 = vshll.u32 %v1658_v60, 16  ;;  %v911_v42 = vand.u32 65535, %v1667_v38 }
  0x9a   : > { %v833_v35 = vshll.u32 %v1642_v19, 16  ;;  %v785_v45 = vadd.s32 %v784_v20, %v774_v18  ;;  %v729_v20 = vshrl.u32 %v1622_v57, 3 }
  0x9b   : > { %v1585_v16 = vpop.f32.mrf.mxu3  ;;  %v1682_v10 = vmul.u32 58254, %v911_v42  ;;  %v914_v6 = vmul.u32 14564, %v911_v42 }
  0x9c   : > { %v545_v30 = vpop.f32.mrf.mxu2  ;;  %vm839_vm0 = vc.u32 %v837_v36, %v833_v35  ;;  %v786_v57 = vadd.s32 %v785_v45, %v776_v43  ;;  %v834_v45 = vshrl.u32 %v1642_v19, 16 }
  0x9d   : > { %v351_v26 = vpop.f32.mrf.mxu0  ;;  %v569_v4 = vadd.f32 %v545_v30, %v407_v37  ;;  %v860_v30 = vshll.u32 %v1631_v7, 16  ;;  %v836_v37 = vsel %vm835_vm13, 1, %v1409_v44  ;;  %v840_v12 = vsel %vm839_vm0, 1, %v1409_v44 }
  0x9e   : > { %v409_v3 = vadd.f32 %v408_v0, %v351_v26  ;;  %v747_v0 = vshrl.u32 %v1564_v56, 16  ;;  %v885_v56 = vmul.u32 14564, %v882_v54  ;;  %v838_v1 = vadd.s32 %v836_v37, %v830_v46 }
  0x9f   : > { %v1646_v26 = vadd.f32 %v1585_v16, %v569_v4  ;;  %vm864_vm14 = vc.u32 %v856_v25, %v860_v30  ;;  %v866_v51 = vadd.s32 %v860_v30, %v856_v25  ;;  %v912_v4 = vshrl.u32 %v1667_v38, 16 }
  0xa0   : > { %vm893_vm15 = vc.u32 %v885_v56, %v889_v63  ;;  %v895_v58 = vadd.s32 %v889_v63, %v885_v56  ;;  %v865_v2 = vsel %vm864_vm14, 1, %v1409_v44  ;;  %v918_v21 = vshll.u32 %v1682_v10, 16 }
  0xa1   : > { %v1600_v32 = vpop.f32.mrf.mxu1  ;;  %vm868_vm1 = vc.u32 %v866_v51, %v862_v50  ;;  %v894_v11 = vsel %vm893_vm15, 1, %v1409_v44  ;;  %v1689_v18 = vmul.u32 14564, %v912_v4  ;;  %v757_v23 = vadd.s32 %v756_v39, %v747_v0 }
  0xa2   : > { %vm1685_vm2 = vc.u32 %v895_v58, %v891_v62  ;;  %v832_v25 = vshrl.u32 %v1619_v53, 16  ;;  %v869_v30 = vsel %vm868_vm1, 1, %v1409_v44  ;;  %v842_v36 = vadd.s32 %v840_v12, %v838_v1 }
  0xa3   : > { %v635_v55 = vpop.f32.mrf.mxu3  ;;  %v898_v31 = vsel %vm1685_vm2, 1, %v1409_v44  ;;  %v815_v37 = vadd.s32 %v814_v8, %v805_v61  ;;  %v920_v0 = vshll.u32 %v1689_v18, 16  ;;  %vm922_vm3 = vc.u32 %v914_v6, %v918_v21 }
  0xa4   : > { %v547_v49 = vpop.f32.mrf.mxu2  ;;  %v861_v39 = vshrl.u32 %v1631_v7, 16  ;;  %v917_v51 = vmul.u32 58254, %v912_v4  ;;  %v924_v62 = vadd.s32 %v918_v21, %v914_v6  ;;  %v843_v61 = vadd.s32 %v842_v36, %v832_v25 }
  0xa5   : > { %v354_v5 = vpop.f32.mrf.mxu0  ;;  %v570_v17 = vadd.f32 %v547_v49, %v409_v3  ;;  %v888_v3 = vmul.u32 58254, %v883_v13  ;;  %v701_v13 = vmul.u32 9, %v700_v52  ;;  %v730_v8 = vmul.u32 9, %v729_v20 }
  0xa6   : > { %v412_v49 = vadd.f32 %v1600_v32, %v354_v5  ;;  %v867_v5 = vadd.s32 %v865_v2, %v859_v59  ;;  %v758_v59 = vshrl.u32 %v757_v23, 3  ;;  %v787_v7 = vshrl.u32 %v786_v57, 3 }
  0xa7   : > { %v1648_v27 = vadd.f32 %v635_v55, %v570_v17  ;;  %v896_v56 = vadd.s32 %v894_v11, %v888_v3  ;;  %vm926_vm4 = vc.u32 %v924_v62, %v920_v0  ;;  %v863_v1 = vshrl.u32 %v1650_v28, 16 }
  0xa8   : > { %v871_v50 = vadd.s32 %v869_v30, %v867_v5  ;;  %v892_v4 = vshrl.u32 %v1658_v60, 16  ;;  %v927_v11 = vsel %vm926_vm4, 1, %v1409_v44  ;;  %v844_v12 = vadd.s32 %v843_v61, %v834_v45 }
  0xa9   : > { %v1634_v9 = vpop.f32.mrf.mxu1  ;;  %v1335_v16 = vpack.c.bf16 %v1648_v27, %v1646_v26  ;;  %v702_v17 = vsub.s32 %v1526_v22, %v701_v13  ;;  %v759_v6 = vmul.u32 9, %v758_v59  ;;  %v788_v20 = vmul.u32 9, %v787_v7 }
  0xaa   : > { %v872_v2 = vadd.s32 %v871_v50, %v861_v39  ;;  %v919_v28 = vshrl.u32 %v1682_v10, 16  ;;  %v731_v25 = vsub.s32 %v1530_v24, %v730_v8  ;;  %v921_v10 = vshrl.u32 %v1689_v18, 16 }
  0xab   : > { %v1663_v34 = vpop.f32.mrf.mxu3  ;;  %1336 = vst [vmem:[%s1656_s16] sm:$0xff] %v1335_v16   ;;  %vm937_vm5 = vcmp.ne.s32.totalorder %v702_v17, 0  ;;  %v1727_v22 = vsub.s32 %v1548_v40, %v788_v20  ;;  %vm946_vm6 = vcmp.lt.s32.totalorder %v702_v17, 0 }
  0xac   : > { %v550_v54 = vpop.f32.mrf.mxu2  ;;  %v873_v21 = vadd.s32 %v872_v2, %v863_v1  ;;  %vm938_vm7 = vcmp.ne.s32.totalorder %v731_v25, 0  ;;  %vm947_vm8 = vcmp.lt.s32.totalorder %v731_v25, 0  ;;  %vm1738_vm12 = vmand %vm946_vm6, %vm937_vm5 }
  0xad   : > { %v356_v47 = vpop.f32.mrf.mxu0  ;;  %v571_v16 = vadd.f32 %v550_v54, %v412_v49  ;;  %v923_v54 = vsel %vm922_vm3, 1, %v1409_v44  ;;  %vm940_vm11 = vcmp.ne.s32.totalorder %v1727_v22, 0  ;;  %vm949_vm13 = vcmp.lt.s32.totalorder %v1727_v22, 0  ;;  %vm1745_vm14 = vmand %vm947_vm8, %vm938_vm7 }
  0xae   : > { %v414_v63 = vadd.f32 %v1634_v9, %v356_v47  ;;  %v890_v9 = vshrl.u32 %v1638_v14, 16  ;;  %v900_v47 = vadd.s32 %v898_v31, %v896_v56  ;;  %v925_v3 = vadd.s32 %v923_v54, %v917_v51  ;;  %vm1761_vm2 = vmand %vm949_vm13, %vm940_vm11 }
  0xaf   : > { %v1706_v58 = vadd.f32 %v1663_v34, %v571_v16  ;;  %v816_v34 = vshrl.u32 %v815_v37, 3  ;;  %v845_v56 = vshrl.u32 %v844_v12, 3  ;;  %v874_v16 = vshrl.u32 %v873_v21, 3 }
  0xb0   : > { %v901_v49 = vadd.s32 %v900_v47, %v890_v9  ;;  %v929_v23 = vadd.s32 %v927_v11, %v925_v3  ;;  %v964_v31 = vadd.s32 9, %v702_v17  ;;  %v965_v37 = vadd.s32 9, %v731_v25 }
  0xb1   : > { %v1673_v55 = vpop.f32.mrf.mxu1  ;;  %v817_v60 = vmul.u32 9, %v816_v34  ;;  %v875_v0 = vmul.u32 9, %v874_v16  ;;  %v967_v8 = vadd.s32 9, %v1727_v22 }
  0xb2   : > { %v902_v30 = vadd.s32 %v901_v49, %v892_v4  ;;  %v930_v36 = vadd.s32 %v929_v23, %v919_v28  ;;  %v973_v45 = vsel %vm1738_vm12, %v964_v31, %v702_v17  ;;  %v974_v7 = vsel %vm1745_vm14, %v965_v37, %v731_v25 }
  0xb3   : > { %v640_v32 = vpop.f32.mrf.mxu3  ;;  %v818_v24 = vsub.s32 %v1551_v41, %v817_v60  ;;  %v876_v1 = vsub.s32 %v1596_v29, %v875_v0  ;;  %vm1775_vm4 = vcmp.lt.s32.totalorder %v973_v45, 8  ;;  %vm983_vm7 = vcmp.lt.s32.totalorder %v974_v7, 8 }
  0xb4   : > { %v552_v52 = vpop.f32.mrf.mxu2  ;;  %v976_v29 = vsel %vm1761_vm2, %v967_v8, %v1727_v22  ;;  %v1010_v21 = vsel %vm983_vm7, %v1648_v27, 0.0 }
  0xb5   : > { %v359_v35 = vpop.f32.mrf.mxu0  ;;  %v572_v53 = vadd.f32 %v552_v52, %v414_v63  ;;  %v1724_v63 = vsub.s32 %v1540_v33, %v759_v6  ;;  %v903_v52 = vshrl.u32 %v902_v30, 3  ;;  %v846_v33 = vmul.u32 9, %v845_v56 }
  0xb6   : > { %v417_v44 = vadd.f32 %v1673_v55, %v359_v35  ;;  %vm941_vm15 = vcmp.ne.s32.totalorder %v818_v24, 0  ;;  %vm950_vm0 = vcmp.lt.s32.totalorder %v818_v24, 0  ;;  %v968_v59 = vadd.s32 9, %v818_v24 }
  0xb7   : > { %v1708_v43 = vadd.f32 %v640_v32, %v572_v53  ;;  %vm939_vm9 = vcmp.ne.s32.totalorder %v1724_v63, 0  ;;  %vm948_vm10 = vcmp.lt.s32.totalorder %v1724_v63, 0  ;;  %v931_v53 = vadd.s32 %v930_v36, %v921_v10  ;;  %vm1768_vm3 = vmand %vm950_vm0, %vm941_vm15 }
  0xb8   : > { %v904_v50 = vmul.u32 9, %v903_v52  ;;  %vm1749_vm1 = vmand %vm948_vm10, %vm939_vm9  ;;  %v966_v9 = vadd.s32 9, %v1724_v63  ;;  %v847_v62 = vsub.s32 %v1583_v15, %v846_v33  ;;  %vm943_vm8 = vcmp.ne.s32.totalorder %v876_v1, 0 }
  0xb9   : > { %v418_v46 = vpop.f32.mrf.mxu1  ;;  %v1340_v14 = vpack.c.bf16 %v1708_v43, %v1706_v58  ;;  %v932_v2 = vshrl.u32 %v931_v53, 3  ;;  %vm952_vm9 = vcmp.lt.s32.totalorder %v876_v1, 0  ;;  %v970_v28 = vadd.s32 9, %v876_v1 }
  0xba   : > { %v905_v3 = vsub.s32 %v1613_v48, %v904_v50  ;;  %v975_v4 = vsel %vm1749_vm1, %v966_v9, %v1724_v63  ;;  %vm942_vm5 = vcmp.ne.s32.totalorder %v847_v62, 0  ;;  %vm951_vm6 = vcmp.lt.s32.totalorder %v847_v62, 0  ;;  %vm1802_vm0 = vmand %vm952_vm9, %vm943_vm8 }
  0xbb   : > { %v643_v42 = vpop.f32.mrf.mxu3  ;;  %1352 = vst [vmem:[%s1656_s16 + $0x8] sm:$0xff] %v1340_v14   ;;  %v977_v48 = vsel %vm1768_vm3, %v968_v59, %v818_v24  ;;  %v969_v11 = vadd.s32 9, %v847_v62  ;;  %v933_v6 = vmul.u32 9, %v932_v2  ;;  %vm984_vm10 = vcmp.lt.s32.totalorder %v975_v4, 8  ;;  %vm1790_vm11 = vmand %vm951_vm6, %vm942_vm5 }
  0xbc   : > { %v555_v32 = vpop.f32.mrf.mxu2  ;;  %vm944_vm12 = vcmp.ne.s32.totalorder %v905_v3, 0  ;;  %vm953_vm13 = vcmp.lt.s32.totalorder %v905_v3, 0  ;;  %vm985_vm14 = vcmp.lt.s32.totalorder %v976_v29, 8  ;;  %vm1798_vm15 = vcmp.lt.s32.totalorder %v977_v48, 8 }
  0xbd   : > { %v361_v19 = vpop.f32.mrf.mxu0  ;;  %v573_v35 = vadd.f32 %v555_v32, %v417_v44  ;;  %v1009_v32 = vsel %vm1775_vm4, %v1646_v26, 0.0  ;;  %v971_v25 = vadd.s32 9, %v905_v3  ;;  %v1011_v60 = vsel %vm984_vm10, %v1706_v58, 0.0  ;;  %vm1809_vm1 = vmand %vm953_vm13, %vm944_vm12 }
  0xbe   : > { %v419_v55 = vadd.f32 %v418_v46, %v361_v19  ;;  %v978_v30 = vsel %vm1790_vm11, %v969_v11, %v847_v62  ;;  %v934_v56 = vsub.s32 %v1667_v38, %v933_v6  ;;  %v1033_v63 = vmul.f32 %v1009_v32, %v1009_v32 }
  0xbf   : > { %v661_v47 = vadd.f32 %v643_v42, %v573_v35  ;;  %v1034_v22 = vmul.f32 %v1010_v21, %v1010_v21  ;;  %v1012_v16 = vsel %vm985_vm14, %v1708_v43, 0.0  ;;  %v979_v58 = vsel %vm1802_vm0, %v970_v28, %v876_v1 }
  0xc0   : > { %v1035_v31 = vmul.f32 %v1011_v60, %v1011_v60  ;;  %vm987_vm2 = vcmp.lt.s32.totalorder %v978_v30, 8  ;;  %v980_v38 = vsel %vm1809_vm1, %v971_v25, %v905_v3  ;;  %vm945_vm3 = vcmp.ne.s32.totalorder %v934_v56, 0 }
  0xc1   : > { %v1718_v5 = vpop.f32.mrf.mxu1  ;;  %v1013_v24 = vsel %vm1798_vm15, %v661_v47, 0.0  ;;  %vm954_vm4 = vcmp.lt.s32.totalorder %v934_v56, 0  ;;  %v1042_v43 = vadd.f32 %v1034_v22, %v1033_v63  ;;  %v1036_v37 = vmul.f32 %v1012_v16, %v1012_v16 }
  0xc2   : > { %vm988_vm5 = vcmp.lt.s32.totalorder %v979_v58, 8  ;;  %v972_v41 = vadd.s32 9, %v934_v56  ;;  %v1037_v53 = vmul.f32 %v1013_v24, %v1013_v24  ;;  %vm989_vm6 = vcmp.lt.s32.totalorder %v980_v38, 8  ;;  %vm1823_vm7 = vmand %vm954_vm4, %vm945_vm3 }
  0xc3   : > { %v645_v13 = vpop.f32.mrf.mxu3 }
  0xc4   : > { %v557_v40 = vpop.f32.mrf.mxu2  ;;  %v981_v59 = vsel %vm1823_vm7, %v972_v41, %v934_v56 }
  0xc5   : > { %v364_v57 = vpop.f32.mrf.mxu0  ;;  %v574_v46 = vadd.f32 %v557_v40, %v419_v55  ;;  %vm990_vm8 = vcmp.lt.s32.totalorder %v981_v59, 8 }
  0xc6   : > { %v422_v17 = vadd.f32 %v1718_v5, %v364_v57 }
  0xc7   : > { %v1754_v54 = vadd.f32 %v645_v13, %v574_v46  ;;  %v1018_v13 = vadd.f32 %v1010_v21, %v1009_v32  ;;  %v1043_v46 = vadd.f32 %v1042_v43, %v1035_v31 }
  0xc9   : > { %v1734_v18 = vpop.f32.mrf.mxu1  ;;  %v1345_v15 = vpack.c.bf16 %v1754_v54, %v661_v47  ;;  %v1019_v33 = vadd.f32 %v1018_v13, %v1011_v60  ;;  %v1014_v40 = vsel %vm987_vm2, %v1754_v54, 0.0  ;;  %v1044_v62 = vadd.f32 %v1043_v46, %v1036_v37 }
  0xca   : > { %v1038_v61 = vmul.f32 %v1014_v40, %v1014_v40 }
  0xcb   : > { %v648_v42 = vpop.f32.mrf.mxu3  ;;  %1353 = vst [vmem:[%s1656_s16 + $0x10] sm:$0xff] %v1345_v15   ;;  %v1020_v0 = vadd.f32 %v1019_v33, %v1012_v16  ;;  %v1045_v7 = vadd.f32 %v1044_v62, %v1037_v53 }
  0xcc   : > { %v560_v19 = vpop.f32.mrf.mxu2 }
  0xcd   : > { %v366_v49 = vpop.f32.mrf.mxu0  ;;  %v575_v44 = vadd.f32 %v560_v19, %v422_v17  ;;  %v1021_v45 = vadd.f32 %v1020_v0, %v1013_v24  ;;  %v1046_v2 = vadd.f32 %v1045_v7, %v1038_v61 }
  0xce   : > { %v424_v10 = vadd.f32 %v1734_v18, %v366_v49 }
  0xcf   : > { %v663_v35 = vadd.f32 %v648_v42, %v575_v44  ;;  %v1022_v14 = vadd.f32 %v1021_v45, %v1014_v40 }
  0xd1   : > { %v426_v12 = vpop.f32.mrf.mxu1  ;;  %v1015_v50 = vsel %vm988_vm5, %v663_v35, 0.0 }
  0xd2   : > { %v1039_v15 = vmul.f32 %v1015_v50, %v1015_v50  ;;  %v1023_v3 = vadd.f32 %v1022_v14, %v1015_v50 }
  0xd3   : > { %v650_v26 = vpop.f32.mrf.mxu3 }
  0xd4   : > { %v562_v52 = vpop.f32.mrf.mxu2  ;;  %v1047_v49 = vadd.f32 %v1046_v2, %v1039_v15 }
  0xd5   : > { %v369_v36 = vpop.f32.mrf.mxu0  ;;  %v576_v57 = vadd.f32 %v562_v52, %v424_v10 }
  0xd6   : > { %v427_v51 = vadd.f32 %v426_v12, %v369_v36 }
  0xd7   : > { %v664_v18 = vadd.f32 %v650_v26, %v576_v57 }
  0xd9   : > { %v428_v55 = vpop.f32.mrf.mxu1  ;;  %v1350_v9 = vpack.c.bf16 %v664_v18, %v663_v35  ;;  %v1016_v8 = vsel %vm989_vm6, %v664_v18, 0.0 }
  0xda   : > { %v1040_v34 = vmul.f32 %v1016_v8, %v1016_v8  ;;  %v1024_v29 = vadd.f32 %v1023_v3, %v1016_v8 }
  0xdb   : > { %v653_v47 = vpop.f32.mrf.mxu3  ;;  %1354 = vst [vmem:[%s1656_s16 + $0x18] sm:$0xff] %v1350_v9  }
  0xdc   : > { %v565_v42 = vpop.f32.mrf.mxu2  ;;  %v1048_v12 = vadd.f32 %v1047_v49, %v1040_v34 }
  0xdd   : > { %v371_v54 = vpop.f32.mrf.mxu0  ;;  %v577_v1 = vadd.f32 %v565_v42, %v427_v51 }
  0xdf   : > { %v665_v4 = vadd.f32 %v653_v47, %v577_v1 }
  0xe1   : > { %v1017_v48 = vsel %vm990_vm8, %v665_v4, 0.0  ;;  %v1065_v11 = vpack.c.bf16 %v665_v4, %v665_v4 }
  0xe2   : > { %v1025_v17 = vadd.f32 %v1024_v29, %v1017_v48  ;;  %v1041_v6 = vmul.f32 %v1017_v48, %v1017_v48 }
  0xe3   : > { %v655_v19 = vpop.f32.mrf.mxu3  ;;  %1074 = vst [vmem:[%s1656_s16 + $0x20] sm:$0xf] %v1065_v11 }
  0xe4   : > { %v1026_v20 = vrot.slane %v1025_v17, 4  ;;  %v1049_v32 = vadd.f32 %v1048_v12, %v1041_v6  ;;  %v567_v21 = vpop.f32.mrf.mxu2 }
  0xe6   : > { %v1027_v28 = vadd.f32 %v1026_v20, %v1025_v17  ;;  %v1050_v5 = vrot.slane %v1049_v32, 4 }
  0xe8   : > { %v1028_v23 = vrot.slane %v1027_v28, 2  ;;  %v1051_v25 = vadd.f32 %v1050_v5, %v1049_v32 }
  0xea   : > { %v1029_v60 = vadd.f32 %v1028_v23, %v1027_v28  ;;  %v1052_v30 = vrot.slane %v1051_v25, 2 }
  0xec   : > { %v1030_v44 = vrot.slane %v1029_v60, 1  ;;  %v1053_v26 = vadd.f32 %v1052_v30, %v1051_v25 }
  0xee   : > { %v1031_v27 = vadd.f32 %v1030_v44, %v1029_v60  ;;  %v1054_v56 = vrot.slane %v1053_v26, 1 }
  0xf0   : > { %1032 = vst [vmem:[%s226_s20] sm:$0x1] %v1031_v27  ;;  %v1055_v63 = vadd.f32 %v1054_v56, %v1053_v26 }
  0xf2   : > { %1056 = vst [vmem:[%s226_s20 + $0x1] sm:$0x1] %v1055_v63 }
  0xf3 PF: > { %s14_s14 = sadd.s32 1, %s1407_s14   ;;  %s1876_s12 = smov %s1403_s13 }
  0xf4   : > { %p11_p5 = scmp.ge.s32.totalorder %s14_s14, 4   ;;  %s1877_s13 = smov %s1879_s15 }
  0xf6   :  { %13 = sbr.rel (!%p11_p5) target bundleno = 2 (0x2), region = 76 }

// kernel: _lambda_.10
= control target key start
LH: loop header
LB: loop body
LE: loop exit
PB: predicated region body
PF: predicated region fallthrough
CT: control target
= control target key end

     0   :  { %s405_s12 = smov 0   ;;  %s461_s0 = inlined_call_operand.vmem [shape: bf16[2,72,128], index: 0, kind: input, shape index: {}]   ;;  %s462_s1 = inlined_call_operand.vmem [shape: f32[1,128], index: 1, kind: input, shape index: {}]   ;;  %s463_s2 = inlined_call_operand.vmem [shape: f32[1,128], index: 2, kind: input, shape index: {}]   ;;  %s464_s3 = inlined_call_operand.vmem [shape: bf16[2,72,128], index: 3, kind: output, shape index: {}]  }
   0x1 LB: > { %s315_s13 = sadd.s32 4294967295, %s383_s12   ;;  %p319_p0 = scmp.ge.s32.totalorder %s383_s12, 1  ;;  %s383_s12 = sphi %s405_s12, %s13_s12  }
   0x2   : > { %p137_p1 = scmp.lt.s32.totalorder %s383_s12, 3 }
   0x4   : > { %p138_p2 = pnand %p319_p0, %p137_p1 }
   0x5   : > { %p161_p3 = scmp.lt.s32.totalorder (!%p138_p2), %s315_s13, 1 }
   0x6   : > { %141 = sbr.rel (%p138_p2) target bundleno = 39 (0x27), region = 32 }
   0xb   : > { %s466_s13 = smov (!%p161_p3, %s315_s13), 1  ;;  %v426_v0 = vld [vmem:[%s462_s1] ss:$0 sm:$0xff] }
   0xc   : > { %s366_s14 = smul.u32 36, %s466_s13  ;;  %v376_v6 = vld [vmem:[%s463_s2] ss:$0 sm:$0xff] }
   0xe   : > { %s421_s17 = scalar_lea.vmem %s461_s0, %s366_s14  ;;  %s448_s24 = scalar_lea.vmem %s464_s3, %s366_s14 }
   0xf   : > { %v325_v1 = vld [vmem:[%s421_s17] sm:$0xff]   ;;  %v360_v2 = vld [vmem:[%s421_s17 + $0x8] sm:$0xff]   ;;  %v361_v3 = vld [vmem:[%s421_s17 + $0x10] sm:$0xff]  }
  0x10   : > { %v326_v4 = vunpack.c.l.bf16 %v325_v1  ;;  %v327_v5 = vunpack.c.h.bf16 %v325_v1  ;;  %v330_v7 = vunpack.c.l.bf16 %v360_v2  ;;  %v331_v8 = vunpack.c.h.bf16 %v360_v2  ;;  %v362_v9 = vld [vmem:[%s421_s17 + $0x18] sm:$0xff]   ;;  %v181_v36 = vld [vmem:[%s421_s17 + $0x20] sm:$0xf] }
  0x11   : > { %v334_v10 = vunpack.c.l.bf16 %v361_v3  ;;  %v335_v11 = vunpack.c.h.bf16 %v361_v3  ;;  %v338_v12 = vunpack.c.l.bf16 %v362_v9  ;;  %v339_v13 = vunpack.c.h.bf16 %v362_v9 }
  0x12   : > { %v194_v14 = vmul.f32 %v426_v0, %v326_v4  ;;  %v195_v15 = vmul.f32 %v426_v0, %v327_v5  ;;  %v196_v16 = vmul.f32 %v426_v0, %v330_v7  ;;  %v197_v17 = vmul.f32 %v426_v0, %v331_v8 }
  0x13   : > { %v198_v18 = vmul.f32 %v426_v0, %v334_v10  ;;  %v199_v19 = vmul.f32 %v426_v0, %v335_v11  ;;  %v200_v20 = vmul.f32 %v426_v0, %v338_v12  ;;  %v201_v21 = vmul.f32 %v426_v0, %v339_v13 }
  0x14   : > { %v206_v22 = vadd.f32 %v376_v6, %v194_v14  ;;  %v207_v23 = vadd.f32 %v376_v6, %v195_v15  ;;  %v208_v24 = vadd.f32 %v376_v6, %v196_v16  ;;  %v209_v25 = vadd.f32 %v376_v6, %v197_v17 }
  0x15   : > { %v210_v26 = vadd.f32 %v376_v6, %v198_v18  ;;  %v211_v27 = vadd.f32 %v376_v6, %v199_v19  ;;  %v212_v28 = vadd.f32 %v376_v6, %v200_v20  ;;  %v213_v29 = vadd.f32 %v376_v6, %v201_v21 }
  0x16   : > { %vm215_vm0 = vcmp.ge.f32.partialorder %v206_v22, 0.0  ;;  %vm216_vm1 = vcmp.ge.f32.partialorder %v207_v23, 0.0  ;;  %v224_v30 = vmul.f32 0.2, %v206_v22  ;;  %v225_v31 = vmul.f32 0.2, %v207_v23 }
  0x17   : > { %vm217_vm2 = vcmp.ge.f32.partialorder %v208_v24, 0.0  ;;  %vm218_vm3 = vcmp.ge.f32.partialorder %v209_v25, 0.0  ;;  %v226_v32 = vmul.f32 0.2, %v208_v24  ;;  %v227_v33 = vmul.f32 0.2, %v209_v25 }
  0x18   : > { %v233_v34 = vsel %vm215_vm0, %v206_v22, %v224_v30  ;;  %v234_v35 = vsel %vm216_vm1, %v207_v23, %v225_v31  ;;  %vm219_vm4 = vcmp.ge.f32.partialorder %v210_v26, 0.0  ;;  %vm220_vm5 = vcmp.ge.f32.partialorder %v211_v27, 0.0 }
  0x19   : > { %v343_v37 = vpack.c.bf16 %v234_v35, %v233_v34  ;;  %v235_v38 = vsel %vm217_vm2, %v208_v24, %v226_v32  ;;  %v236_v39 = vsel %vm218_vm3, %v209_v25, %v227_v33  ;;  %v228_v40 = vmul.f32 0.2, %v210_v26 }
  0x1a   : > { %v348_v41 = vpack.c.bf16 %v236_v39, %v235_v38  ;;  %v229_v42 = vmul.f32 0.2, %v211_v27  ;;  %vm221_vm6 = vcmp.ge.f32.partialorder %v212_v28, 0.0  ;;  %vm222_vm7 = vcmp.ge.f32.partialorder %v213_v29, 0.0 }
  0x1b   : > { %344 = vst [vmem:[%s448_s24] sm:$0xff] %v343_v37   ;;  %v237_v43 = vsel %vm219_vm4, %v210_v26, %v228_v40  ;;  %v230_v44 = vmul.f32 0.2, %v212_v28  ;;  %v231_v45 = vmul.f32 0.2, %v213_v29  ;;  %v190_v46 = vunpack.c.l.bf16 %v181_v36 }
  0x1c   : > { %363 = vst [vmem:[%s448_s24 + $0x8] sm:$0xff] %v348_v41   ;;  %v238_v47 = vsel %vm220_vm5, %v211_v27, %v229_v42 }
  0x1d   : > { %v353_v48 = vpack.c.bf16 %v238_v47, %v237_v43  ;;  %v239_v49 = vsel %vm221_vm6, %v212_v28, %v230_v44  ;;  %v240_v50 = vsel %vm222_vm7, %v213_v29, %v231_v45  ;;  %v202_v51 = vmul.f32 %v426_v0, %v190_v46 }
  0x1e   : > { %v358_v52 = vpack.c.bf16 %v240_v50, %v239_v49 }
  0x1f   : > { %364 = vst [vmem:[%s448_s24 + $0x10] sm:$0xff] %v353_v48   ;;  %v214_v53 = vadd.f32 %v376_v6, %v202_v51 }
  0x20   : > { %365 = vst [vmem:[%s448_s24 + $0x18] sm:$0xff] %v358_v52  }
  0x21   : > { %vm223_vm8 = vcmp.ge.f32.partialorder %v214_v53, 0.0  ;;  %v232_v54 = vmul.f32 0.2, %v214_v53 }
  0x23   : > { %v241_v55 = vsel %vm223_vm8, %v214_v53, %v232_v54 }
  0x24   : > { %v250_v56 = vpack.c.bf16 %v241_v55, %v241_v55 }
  0x26   : > { %259 = vst [vmem:[%s448_s24 + $0x20] sm:$0xf] %v250_v56 }
  0x27 PF: > { %s13_s12 = sadd.s32 1, %s383_s12  }
  0x28   : > { %p10_p4 = scmp.ge.s32.totalorder %s13_s12, 4  }
  0x2a   :  { %12 = sbr.rel (!%p10_p4) target bundleno = 1 (0x1), region = 62 }

// kernel: _lambda_.12
= control target key start
LH: loop header
LB: loop body
LE: loop exit
PB: predicated region body
PF: predicated region fallthrough
CT: control target
= control target key end

     0   :  { %s318_s12 = smov 0   ;;  %s341_s0 = inlined_call_operand.vmem [shape: bf16[2,20,128], index: 0, kind: input, shape index: {}]   ;;  %s342_s1 = inlined_call_operand.vmem [shape: f32[1,128], index: 1, kind: input, shape index: {}]   ;;  %s343_s2 = inlined_call_operand.vmem [shape: f32[1,128], index: 2, kind: input, shape index: {}]   ;;  %s344_s3 = inlined_call_operand.vmem [shape: bf16[2,20,128], index: 3, kind: output, shape index: {}]  }
   0x1 LB: > { %s261_s13 = sadd.s32 4294967295, %s296_s12   ;;  %p265_p0 = scmp.ge.s32.totalorder %s296_s12, 1  ;;  %s296_s12 = sphi %s318_s12, %s13_s12  }
   0x2   : > { %p137_p1 = scmp.lt.s32.totalorder %s296_s12, 3 }
   0x4   : > { %p138_p2 = pnand %p265_p0, %p137_p1 }
   0x5   : > { %p161_p3 = scmp.lt.s32.totalorder (!%p138_p2), %s261_s13, 1 }
   0x6   : > { %141 = sbr.rel (%p138_p2) target bundleno = 29 (0x1d), region = 32 }
   0xb   : > { %s346_s13 = smov (!%p161_p3, %s261_s13), 1  ;;  %v288_v0 = vld [vmem:[%s342_s1] ss:$0 sm:$0xff] }
   0xc   : > { %s279_s14 = smul.u32 12, %s346_s13  ;;  %v289_v6 = vld [vmem:[%s343_s2] ss:$0 sm:$0xff] }
   0xe   : > { %s165_s17 = scalar_lea.vmem %s341_s0, %s279_s14  ;;  %s170_s24 = scalar_lea.vmem %s344_s3, %s279_s14 }
   0xf   : > { %v271_v1 = vld [vmem:[%s165_s17] sm:$0xff]   ;;  %v175_v2 = vld [vmem:[%s165_s17 + $0x8] sm:$0x3] }
  0x10   : > { %v272_v3 = vunpack.c.l.bf16 %v271_v1  ;;  %v273_v4 = vunpack.c.h.bf16 %v271_v1  ;;  %v178_v5 = vunpack.c.l.bf16 %v175_v2 }
  0x12   : > { %v182_v7 = vmul.f32 %v288_v0, %v272_v3  ;;  %v183_v8 = vmul.f32 %v288_v0, %v273_v4  ;;  %v184_v9 = vmul.f32 %v288_v0, %v178_v5 }
  0x14   : > { %v188_v10 = vadd.f32 %v289_v6, %v182_v7  ;;  %v189_v11 = vadd.f32 %v289_v6, %v183_v8  ;;  %v190_v12 = vadd.f32 %v289_v6, %v184_v9 }
  0x16   : > { %vm191_vm0 = vcmp.ge.f32.partialorder %v188_v10, 0.0  ;;  %vm192_vm1 = vcmp.ge.f32.partialorder %v189_v11, 0.0  ;;  %v194_v13 = vmul.f32 0.2, %v188_v10  ;;  %v195_v14 = vmul.f32 0.2, %v189_v11 }
  0x17   : > { %vm193_vm2 = vcmp.ge.f32.partialorder %v190_v12, 0.0  ;;  %v196_v15 = vmul.f32 0.2, %v190_v12 }
  0x18   : > { %v197_v16 = vsel %vm191_vm0, %v188_v10, %v194_v13  ;;  %v198_v17 = vsel %vm192_vm1, %v189_v11, %v195_v14 }
  0x19   : > { %v277_v18 = vpack.c.bf16 %v198_v17, %v197_v16  ;;  %v199_v19 = vsel %vm193_vm2, %v190_v12, %v196_v15 }
  0x1a   : > { %v202_v20 = vpack.c.bf16 %v199_v19, %v199_v19 }
  0x1b   : > { %278 = vst [vmem:[%s170_s24] sm:$0xff] %v277_v18  }
  0x1c   : > { %205 = vst [vmem:[%s170_s24 + $0x8] sm:$0x3] %v202_v20 }
  0x1d PF: > { %s13_s12 = sadd.s32 1, %s296_s12  }
  0x1e   : > { %p10_p4 = scmp.ge.s32.totalorder %s13_s12, 4  }
  0x20   :  { %12 = sbr.rel (!%p10_p4) target bundleno = 1 (0x1), region = 62 }

// kernel: _lambda_.11
= control target key start
LH: loop header
LB: loop body
LE: loop exit
PB: predicated region body
PF: predicated region fallthrough
CT: control target
= control target key end

     0   :  { %s1025_s12 = smov 0   ;;  %s1027_s13 = smov 0   ;;  %s1157_s0 = inlined_call_operand.vmem [shape: bf16[2,30,64], index: 0, kind: input, shape index: {}]   ;;  %s1158_s1 = inlined_call_operand.vmem [shape: bf16[4,64,128], index: 1, kind: input, shape index: {}]   ;;  %s1159_s2 = inlined_call_operand.vmem [shape: bf16[2,20,128], index: 2, kind: output, shape index: {0}]   ;;  %s1160_s3 = inlined_call_operand.vmem [shape: f32[2,2,128], index: 3, kind: output, shape index: {1}]  }
   0x1   :  { %s1029_s14 = smov 0  }
   0x2 LB: > { %s26_s15 = sadd.s32 1, %s998_s13  ;;  %p819_p0 = scmp.ge.s32.totalorder %s1002_s14, 1  ;;  %s1002_s14 = sphi %s1029_s14, %s14_s14   ;;  %s998_s13 = sphi %s1027_s13, %s1164_s13   ;;  %s994_s12 = sphi %s1025_s12, %s1163_s12  }
   0x3   : > { %p28_p1 = scmp.ge.s32.totalorder %s26_s15, 2  ;;  %p165_p2 = scmp.lt.s32.totalorder %s1002_s14, 3 }
   0x5   : > { %s1166_s15 = smov (%p28_p1, %s26_s15), 0  ;;  %p166_p3 = pnand %p819_p0, %p165_p2 }
   0x6   : > { %p203_p4 = scmp.lt.s32.totalorder (!%p166_p3), %s994_s12, 1 }
   0x7   : > { %169 = sbr.rel (%p166_p3) target bundleno = 201 (0xc9), region = 28 }
   0xc   : > { %v939_v0 = vld [vmem:[%s1158_s1 + $0x38] sm:$0xff]  ;;  %v938_v4 = vld [vmem:[%s1158_s1 + $0x30] sm:$0xff]  ;;  %s1168_s12 = smov (!%p203_p4, %s994_s12), 1  ;;  %v937_v8 = vld [vmem:[%s1158_s1 + $0x28] sm:$0xff]  ;;  %vm257_vm0 = vsmask.f32 7424  ;;  %v532_v57 = vlaneseq }
   0xd   : > { %v935_v1 = vld [vmem:[%s1158_s1 + $0x18] sm:$0xff]  ;;  %308 = vmatpush.bf16.msra.mxu0 %v939_v0  ;;  %v934_v5 = vld [vmem:[%s1158_s1 + $0x10] sm:$0xff]  ;;  %s930_s7 = sshll.u32 %s1168_s12, 4  ;;  %v933_v9 = vld [vmem:[%s1158_s1 + $0x8] sm:$0xff]  ;;  %vm477_vm1 = vcmask 1044480   ;;  %vm297_vm2 = vcmask 523264  }
   0xe   : > { %v944_v2 = vld [vmem:[%s1158_s1 + $0x58] sm:$0xff]  ;;  %358 = vmatpush.bf16.msra.mxu1 %v935_v1  ;;  %v943_v6 = vld [vmem:[%s1158_s1 + $0x50] sm:$0xff]  ;;  %v942_v10 = vld [vmem:[%s1158_s1 + $0x48] sm:$0xff]  ;;  %s1085_s20 = scalar_lea.vmem %s1157_s0, %s930_s7  ;;  %vm395_vm3 = vsmask.f32 5376  ;;  %v1117_v58 = vshrl.u32 %v532_v57, 7 }
   0xf   : > { %v948_v3 = vld [vmem:[%s1158_s1 + $0x78] sm:$0xff]  ;;  %447 = vmatpush.bf16.msra.mxu2 %v944_v2  ;;  %v947_v7 = vld [vmem:[%s1158_s1 + $0x70] sm:$0xff]  ;;  %v946_v11 = vld [vmem:[%s1158_s1 + $0x68] sm:$0xff]  ;;  %s954_s29 = smul.u32 12, %s1168_s12  ;;  %s823_s6 = sshll.u32 %s1168_s12, 1 }
  0x10   : > { %515 = vmatpush.bf16.msra.mxu3 %v948_v3  ;;  %v931_v12 = vld [vmem:[%s1085_s20] sm:$0xff]  ;;  %v239_v13 = vld [vmem:[%s1085_s20 + $0x8] sm:$0x7]  ;;  %v940_v18 = vld [vmem:[%s1085_s20 + $0x8] sm:$0x10]  ;;  %v1120_v59 = vadd.s32 8, %v1117_v58  ;;  %s226_s9 = scalar_lea.vmem %s1160_s3, %s823_s6 }
  0x11   : > { %309 = vmatpush.bf16.msra.mxu0 %v938_v4  ;;  %v372_v14 = vld [vmem:[%s1085_s20] sm:$0xc]  ;;  %v254_v15 = vunpack.c.l.b16 %v239_v13  ;;  %v373_v16 = vld [vmem:[%s1085_s20 + $0x4] sm:$0xf]  ;;  %v882_v17 = vld [vmem:[%s1085_s20 + $0x8] sm:$0xf]  ;;  %s219_s5 = scalar_lea.vmem %s1159_s2, %s954_s29 }
  0x12   : > { %359 = vmatpush.bf16.msra.mxu1 %v934_v5  ;;  %v389_v19 = vunpack.c.l.b16 %v372_v14  ;;  %v259_v20 = vshrl.u32 %v931_v12, 16  ;;  %v261_v21 = vshll.u32 %v931_v12, 16  ;;  %v390_v22 = vunpack.c.l.b16 %v373_v16  ;;  %v464_v24 = vld [vmem:[%s1085_s20] sm:$0x8]  ;;  %v230_v52 = vld [vmem:[%s1085_s20 + $0x8] sm:$0x3] }
  0x13   : > { %448 = vmatpush.bf16.msra.mxu2 %v943_v6  ;;  %v883_v23 = vor.u32 %v940_v18, %v882_v17  ;;  %v256_v25 = vpack.c.b16 %v254_v15, %v254_v15  ;;  %v475_v26 = vunpack.c.l.b16 %v464_v24  ;;  %v936_v27 = vld [vmem:[%s1158_s1 + $0x20] sm:$0xff]  ;;  %v323_v54 = vunpack.c.l.b16 %v230_v52 }
  0x14   : > { %516 = vmatpush.bf16.msra.mxu3 %v947_v7  ;;  %v932_v28 = vld [vmem:[%s1158_s1] sm:$0xff]  ;;  %v263_v29 = vrot.slane %v261_v21, 1  ;;  %v393_v30 = vpack.c.b16 %v390_v22, %v389_v19  ;;  %v568_v60 = vand.u32 65535, %v1120_v59  ;;  %v539_v61 = vand.u32 65535, %v1117_v58 }
  0x15   : > { %310 = vmatpush.bf16.msra.mxu0 %v937_v8  ;;  %v405_v31 = vshrl.u32 %v883_v23, 16  ;;  %v408_v32 = vshll.u32 %v883_v23, 16  ;;  %v941_v33 = vld [vmem:[%s1158_s1 + $0x40] sm:$0xff]  ;;  %v266_v35 = vshll.u32 %v256_v25, 16  ;;  %v476_v36 = vpack.c.b16 %v390_v22, %v475_v26 }
  0x16   : > { %360 = vmatpush.bf16.msra.mxu1 %v933_v9  ;;  %v945_v34 = vld [vmem:[%s1158_s1 + $0x60] sm:$0xff]  ;;  %v479_v37 = vrot.slane %v883_v23, 3  ;;  %v264_v38 = vor.u32 %v263_v29, %v259_v20  ;;  %v397_v39 = vshrl.u32 %v393_v30, 16  ;;  %v400_v40 = vshll.u32 %v393_v30, 16 }
  0x17   : > { %449 = vmatpush.bf16.msra.mxu2 %v942_v10  ;;  %v407_v41 = vrot.slane %v405_v31, 2  ;;  %v268_v42 = vrot.slane %v266_v35, 1  ;;  %v410_v43 = vrot.slane %v408_v32, 3  ;;  %v478_v44 = vrot.slane %v476_v36, 3 }
  0x18   : > { %517 = vmatpush.bf16.msra.mxu3 %v946_v11  ;;  %v399_v45 = vrot.slane %v397_v39, 2  ;;  %v402_v46 = vrot.slane %v400_v40, 3  ;;  %v270_v53 = vshrl.u32 %v256_v25, 16  ;;  %v324_v56 = vpack.c.b16 %v323_v54, %v323_v54 }
  0x19   : > { %311 = vmatpush.bf16.msra.mxu0 %v936_v27  ;;  %v269_v47 = vsel %vm257_vm0, %v264_v38, %v268_v42  ;;  %v411_v48 = vor.u32 %v410_v43, %v407_v41  ;;  %v480_v49 = vsel %vm477_vm1, %v478_v44, %v479_v37  ;;  %v1125_v62 = vadd.s32 16, %v1117_v58 }
  0x1a   : > { %361 = vmatpush.bf16.msra.mxu1 %v932_v28  ;;  %v403_v50 = vor.u32 %v402_v46, %v399_v45  ;;  %v272_v55 = vor.u32 %v270_v53, %v268_v42  ;;  %v569_v63 = vshrl.u32 %v1120_v59, 16  ;;  %v572_v0 = vmul.u32 52428, %v568_v60 }
  0x1b   : > { %450 = vmatpush.bf16.msra.mxu2 %v941_v33  ;;  %v540_v1 = vshrl.u32 %v1117_v58, 16  ;;  %v597_v2 = vand.u32 65535, %v1125_v62  ;;  %v543_v3 = vmul.u32 52428, %v539_v61  ;;  %v571_v4 = vmul.u32 52429, %v568_v60 }
  0x1c   : > { %518 = vmatpush.bf16.msra.mxu3 %v945_v34  ;;  %852 = vmatmul.msk.bf16.vlgmr.msra.gmra.mxu0 %vm297_vm2, %v269_v47  ;;  %v412_v51 = vsel %vm395_vm3, %v403_v50, %v411_v48  ;;  %v573_v5 = vmul.u32 52429, %v569_v63  ;;  %v575_v6 = vshll.u32 %v572_v0, 16  ;;  %v598_v8 = vshrl.u32 %v1125_v62, 16 }
  0x1d   : > { %870 = vmatmul.msk.bf16.vlgmr.msra.gmra.mxu1 %vm297_vm2, %v931_v12  ;;  %v544_v7 = vmul.u32 52429, %v540_v1  ;;  %v601_v9 = vmul.u32 52428, %v597_v2  ;;  %v542_v10 = vmul.u32 52429, %v539_v61  ;;  %v546_v11 = vshll.u32 %v543_v3, 16 }
  0x1e   : > { %900 = vmatmul.msk.bf16.vlgmr.msra.gmra.mxu2 %vm297_vm2, %v412_v51  ;;  %v577_v12 = vshll.u32 %v573_v5, 16  ;;  %vm579_vm4 = vc.u32 %v571_v4, %v575_v6  ;;  %v581_v13 = vadd.s32 %v575_v6, %v571_v4  ;;  %v600_v15 = vmul.u32 52429, %v597_v2 }
  0x1f   : > { %926 = vmatmul.msk.bf16.vlgmr.msra.gmra.mxu3 %vm297_vm2, %v480_v49  ;;  %v548_v14 = vshll.u32 %v544_v7, 16  ;;  %v602_v16 = vmul.u32 52429, %v598_v8  ;;  %v604_v17 = vshll.u32 %v601_v9, 16  ;;  %vm550_vm5 = vc.u32 %v542_v10, %v546_v11 }
  0x20   : > { %v552_v18 = vadd.s32 %v546_v11, %v542_v10  ;;  %v574_v19 = vmul.u32 52428, %v569_v63  ;;  %v1004_v20 = vmov 0   ;;  %v545_v22 = vmul.u32 52428, %v540_v1 }
  0x21   : > { %v580_v21 = vsel %vm579_vm4, 1, %v1004_v20  ;;  %vm583_vm6 = vc.u32 %v581_v13, %v577_v12  ;;  %v551_v23 = vsel %vm550_vm5, 1, %v1004_v20  ;;  %v606_v24 = vshll.u32 %v602_v16, 16 }
  0x22   : > { %vm608_vm7 = vc.u32 %v600_v15, %v604_v17  ;;  %v610_v25 = vadd.s32 %v604_v17, %v600_v15  ;;  %vm554_vm8 = vc.u32 %v552_v18, %v548_v14  ;;  %v582_v26 = vadd.s32 %v580_v21, %v574_v19 }
  0x23   : > { %v584_v27 = vsel %vm583_vm6, 1, %v1004_v20  ;;  %v603_v28 = vmul.u32 52428, %v598_v8  ;;  %v553_v29 = vadd.s32 %v551_v23, %v545_v22  ;;  %v609_v30 = vsel %vm608_vm7, 1, %v1004_v20 }
  0x24   : > { %v555_v31 = vsel %vm554_vm8, 1, %v1004_v20  ;;  %vm612_vm9 = vc.u32 %v610_v25, %v606_v24  ;;  %v576_v32 = vshrl.u32 %v572_v0, 16  ;;  %v586_v33 = vadd.s32 %v584_v27, %v582_v26 }
  0x25   : > { %v611_v34 = vadd.s32 %v609_v30, %v603_v28  ;;  %v547_v35 = vshrl.u32 %v543_v3, 16  ;;  %v557_v36 = vadd.s32 %v555_v31, %v553_v29  ;;  %v578_v38 = vshrl.u32 %v573_v5, 16 }
  0x26   : > { %v587_v39 = vadd.s32 %v586_v33, %v576_v32  ;;  %v605_v40 = vshrl.u32 %v601_v9, 16  ;;  %v549_v42 = vshrl.u32 %v544_v7, 16  ;;  %v607_v45 = vshrl.u32 %v602_v16, 16 }
  0x27   : > { %v558_v43 = vadd.s32 %v557_v36, %v547_v35  ;;  %vm651_vm6 = vcmask 1043456  }
  0x28   : > { %v588_v44 = vadd.s32 %v587_v39, %v578_v38 }
  0x29   : > { %v559_v47 = vadd.s32 %v558_v43, %v549_v42 }
  0x2a   : > { %v589_v50 = vshrl.u32 %v588_v44, 2 }
  0x2b   : > { %v560_v52 = vshrl.u32 %v559_v47, 2 }
  0x2c   : > { %853 = vmatmul.msk.bf16.gmra.mxu0 %vm297_vm2, %v272_v55  ;;  %v590_v53 = vmul.u32 5, %v589_v50 }
  0x2d   : > { %871 = vmatmul.msk.bf16.gmra.mxu1 %vm297_vm2, %v324_v56  ;;  %v561_v55 = vmul.u32 5, %v560_v52 }
  0x2e   : > { %901 = vmatmul.msk.bf16.gmra.mxu2 %vm297_vm2, %v411_v48  ;;  %v591_v61 = vsub.s32 %v1120_v59, %v590_v53 }
  0x2f   : > { %927 = vmatmul.msk.bf16.gmra.mxu3 %vm297_vm2, %v479_v37  ;;  %v613_v37 = vsel %vm612_vm9, 1, %v1004_v20  ;;  %v562_v1 = vsub.s32 %v1117_v58, %v561_v55 }
  0x30   : > { %v615_v41 = vadd.s32 %v613_v37, %v611_v34  ;;  %vm624_vm10 = vcmp.ne.s32.totalorder %v591_v61, 0  ;;  %vm627_vm11 = vcmp.lt.s32.totalorder %v591_v61, 0  ;;  %v633_v4 = vadd.s32 5, %v591_v61 }
  0x31   : > { %vm623_vm12 = vcmp.ne.s32.totalorder %v562_v1, 0  ;;  %vm626_vm13 = vcmp.lt.s32.totalorder %v562_v1, 0  ;;  %vm1134_vm14 = vmand %vm627_vm11, %vm624_vm10  ;;  %v632_v59 = vadd.s32 5, %v562_v1 }
  0x32   : > { %v616_v46 = vadd.s32 %v615_v41, %v605_v40  ;;  %vm629_vm15 = vmand %vm626_vm13, %vm623_vm12 }
  0x33   : > { %v635_v15 = vsel %vm629_vm15, %v632_v59, %v562_v1 }
  0x34   : > { %v617_v51 = vadd.s32 %v616_v46, %v607_v45  ;;  %vm638_vm4 = vcmp.lt.s32.totalorder %v635_v15, 4 }
  0x36   : > { %v618_v54 = vshrl.u32 %v617_v51, 2 }
  0x38   : > { %v619_v0 = vmul.u32 5, %v618_v54 }
  0x3a   : > { %v620_v3 = vsub.s32 %v1125_v62, %v619_v0  ;;  %v636_v62 = vsel %vm1134_vm14, %v633_v4, %v591_v61 }
  0x3b   : > { %vm639_vm3 = vcmp.lt.s32.totalorder %v636_v62, 4 }
  0x3c   : > { %vm625_vm0 = vcmp.ne.s32.totalorder %v620_v3, 0  ;;  %vm628_vm1 = vcmp.lt.s32.totalorder %v620_v3, 0  ;;  %v634_v14 = vadd.s32 5, %v620_v3 }
  0x3d   : > { %vm631_vm2 = vmand %vm628_vm1, %vm625_vm0 }
  0x3e   : > { %v637_v19 = vsel %vm631_vm2, %v634_v14, %v620_v3 }
  0x3f   : > { %vm640_vm5 = vcmp.lt.s32.totalorder %v637_v19, 4 }
  0x99   : > { %v313_v48 = vpop.f32.mrf.mxu0 }
  0x9a   : > { %v363_v49 = vpop.f32.mrf.mxu1 }
  0x9b   : > { %v364_v2 = vadd.f32 %v363_v49, %v313_v48 }
  0xa1   : > { %v452_v57 = vpop.f32.mrf.mxu2  ;;  %v315_v60 = vpop.f32.mrf.mxu0 }
  0xa2   : > { %v520_v56 = vpop.f32.mrf.mxu3  ;;  %v365_v63 = vpop.f32.mrf.mxu1  ;;  %v461_v5 = vadd.f32 %v452_v57, %v364_v2 }
  0xa3   : > { %v366_v6 = vadd.f32 %v365_v63, %v315_v60 }
  0xa4   : > { %v529_v12 = vadd.f32 %v520_v56, %v461_v5 }
  0xa6   : > { %v647_v25 = vsel %vm638_vm4, %v529_v12, 0.0 }
  0xa7   : > { %v661_v28 = vmul.f32 %v647_v25, %v647_v25 }
  0xa9   : > { %v454_v9 = vpop.f32.mrf.mxu2  ;;  %v318_v10 = vpop.f32.mrf.mxu0 }
  0xaa   : > { %v522_v7 = vpop.f32.mrf.mxu3  ;;  %v462_v58 = vadd.f32 %v454_v9, %v366_v6  ;;  %v368_v11 = vpop.f32.mrf.mxu1 }
  0xab   : > { %v369_v17 = vadd.f32 %v368_v11, %v318_v10 }
  0xac   : > { %v530_v13 = vadd.f32 %v522_v7, %v462_v58 }
  0xae   : > { %v952_v16 = vpack.c.bf16 %v530_v13, %v529_v12  ;;  %v648_v20 = vsel %vm639_vm3, %v530_v13, 0.0 }
  0xaf   : > { %v662_v26 = vmul.f32 %v648_v20, %v648_v20  ;;  %v650_v29 = vadd.f32 %v648_v20, %v647_v25 }
  0xb0   : > { %953 = vst [vmem:[%s219_s5] sm:$0xff] %v952_v16  }
  0xb1   : > { %v457_v21 = vpop.f32.mrf.mxu2  ;;  %v320_v22 = vpop.f32.mrf.mxu0  ;;  %v664_v34 = vadd.f32 %v662_v26, %v661_v28 }
  0xb2   : > { %v525_v18 = vpop.f32.mrf.mxu3  ;;  %v463_v23 = vadd.f32 %v457_v21, %v369_v17  ;;  %v370_v24 = vpop.f32.mrf.mxu1 }
  0xb4   : > { %v531_v27 = vadd.f32 %v525_v18, %v463_v23 }
  0xb6   : > { %v649_v30 = vsel %vm640_vm5, %v531_v27, 0.0  ;;  %v676_v31 = vpack.c.bf16 %v531_v27, %v531_v27 }
  0xb7   : > { %v652_v32 = vsel %vm651_vm6, %v649_v30, 0.0  ;;  %v663_v33 = vmul.f32 %v649_v30, %v649_v30 }
  0xb8   : > { %v653_v35 = vadd.f32 %v652_v32, %v650_v29  ;;  %679 = vst [vmem:[%s219_s5 + $0x8] sm:$0x3] %v676_v31 }
  0xb9   : > { %v665_v37 = vsel %vm651_vm6, %v663_v33, 0.0  ;;  %v459_v38 = vpop.f32.mrf.mxu2 }
  0xba   : > { %v527_v36 = vpop.f32.mrf.mxu3  ;;  %v654_v39 = vrot.slane %v653_v35, 4  ;;  %v666_v40 = vadd.f32 %v665_v37, %v664_v34 }
  0xbc   : > { %v655_v41 = vadd.f32 %v654_v39, %v653_v35  ;;  %v667_v42 = vrot.slane %v666_v40, 4 }
  0xbe   : > { %v656_v43 = vrot.slane %v655_v41, 2  ;;  %v668_v44 = vadd.f32 %v667_v42, %v666_v40 }
  0xc0   : > { %v657_v45 = vadd.f32 %v656_v43, %v655_v41  ;;  %v669_v46 = vrot.slane %v668_v44, 2 }
  0xc2   : > { %v658_v47 = vrot.slane %v657_v45, 1  ;;  %v670_v48 = vadd.f32 %v669_v46, %v668_v44 }
  0xc4   : > { %v659_v49 = vadd.f32 %v658_v47, %v657_v45  ;;  %v671_v50 = vrot.slane %v670_v48, 1 }
  0xc6   : > { %660 = vst [vmem:[%s226_s9] sm:$0x1] %v659_v49  ;;  %v672_v51 = vadd.f32 %v671_v50, %v670_v48 }
  0xc8   : > { %673 = vst [vmem:[%s226_s9 + $0x1] sm:$0x1] %v672_v51 }
  0xc9 PF: > { %s14_s14 = sadd.s32 1, %s1002_s14   ;;  %s1163_s12 = smov %s998_s13 }
  0xca   : > { %p11_p5 = scmp.ge.s32.totalorder %s14_s14, 4   ;;  %s1164_s13 = smov %s1166_s15 }
  0xcc   :  { %13 = sbr.rel (!%p11_p5) target bundleno = 2 (0x2), region = 76 }

// kernel: _lambda_.14
= control target key start
LH: loop header
LB: loop body
LE: loop exit
PB: predicated region body
PF: predicated region fallthrough
CT: control target
= control target key end

     0   :  { %s318_s12 = smov 0   ;;  %s341_s0 = inlined_call_operand.vmem [shape: bf16[2,18,128], index: 0, kind: input, shape index: {}]   ;;  %s342_s1 = inlined_call_operand.vmem [shape: f32[1,128], index: 1, kind: input, shape index: {}]   ;;  %s343_s2 = inlined_call_operand.vmem [shape: f32[1,128], index: 2, kind: input, shape index: {}]   ;;  %s344_s3 = inlined_call_operand.vmem [shape: bf16[2,18,128], index: 3, kind: output, shape index: {}]  }
   0x1 LB: > { %s261_s13 = sadd.s32 4294967295, %s296_s12   ;;  %p265_p0 = scmp.ge.s32.totalorder %s296_s12, 1  ;;  %s296_s12 = sphi %s318_s12, %s13_s12  }
   0x2   : > { %p137_p1 = scmp.lt.s32.totalorder %s296_s12, 3 }
   0x4   : > { %p138_p2 = pnand %p265_p0, %p137_p1 }
   0x5   : > { %p161_p3 = scmp.lt.s32.totalorder (!%p138_p2), %s261_s13, 1 }
   0x6   : > { %141 = sbr.rel (%p138_p2) target bundleno = 29 (0x1d), region = 32 }
   0xb   : > { %s346_s13 = smov (!%p161_p3, %s261_s13), 1  ;;  %v288_v0 = vld [vmem:[%s342_s1] ss:$0 sm:$0xff] }
   0xc   : > { %s279_s14 = smul.u32 12, %s346_s13  ;;  %v289_v6 = vld [vmem:[%s343_s2] ss:$0 sm:$0xff] }
   0xe   : > { %s165_s17 = scalar_lea.vmem %s341_s0, %s279_s14  ;;  %s170_s24 = scalar_lea.vmem %s344_s3, %s279_s14 }
   0xf   : > { %v271_v1 = vld [vmem:[%s165_s17] sm:$0xff]   ;;  %v175_v2 = vld [vmem:[%s165_s17 + $0x8] sm:$0x1] }
  0x10   : > { %v272_v3 = vunpack.c.l.bf16 %v271_v1  ;;  %v273_v4 = vunpack.c.h.bf16 %v271_v1  ;;  %v178_v5 = vunpack.c.l.bf16 %v175_v2 }
  0x12   : > { %v182_v7 = vmul.f32 %v288_v0, %v272_v3  ;;  %v183_v8 = vmul.f32 %v288_v0, %v273_v4  ;;  %v184_v9 = vmul.f32 %v288_v0, %v178_v5 }
  0x14   : > { %v188_v10 = vadd.f32 %v289_v6, %v182_v7  ;;  %v189_v11 = vadd.f32 %v289_v6, %v183_v8  ;;  %v190_v12 = vadd.f32 %v289_v6, %v184_v9 }
  0x16   : > { %vm191_vm0 = vcmp.ge.f32.partialorder %v188_v10, 0.0  ;;  %vm192_vm1 = vcmp.ge.f32.partialorder %v189_v11, 0.0  ;;  %v194_v13 = vmul.f32 0.2, %v188_v10  ;;  %v195_v14 = vmul.f32 0.2, %v189_v11 }
  0x17   : > { %vm193_vm2 = vcmp.ge.f32.partialorder %v190_v12, 0.0  ;;  %v196_v15 = vmul.f32 0.2, %v190_v12 }
  0x18   : > { %v197_v16 = vsel %vm191_vm0, %v188_v10, %v194_v13  ;;  %v198_v17 = vsel %vm192_vm1, %v189_v11, %v195_v14 }
  0x19   : > { %v277_v18 = vpack.c.bf16 %v198_v17, %v197_v16  ;;  %v199_v19 = vsel %vm193_vm2, %v190_v12, %v196_v15 }
  0x1a   : > { %v202_v20 = vpack.c.bf16 %v199_v19, %v199_v19 }
  0x1b   : > { %278 = vst [vmem:[%s170_s24] sm:$0xff] %v277_v18  }
  0x1c   : > { %205 = vst [vmem:[%s170_s24 + $0x8] sm:$0x1] %v202_v20 }
  0x1d PF: > { %s13_s12 = sadd.s32 1, %s296_s12  }
  0x1e   : > { %p10_p4 = scmp.ge.s32.totalorder %s13_s12, 4  }
  0x20   :  { %12 = sbr.rel (!%p10_p4) target bundleno = 1 (0x1), region = 62 }

// kernel: _lambda_.13
= control target key start
LH: loop header
LB: loop body
LE: loop exit
PB: predicated region body
PF: predicated region fallthrough
CT: control target
= control target key end

     0   :  { %s1818_s12 = smov 0   ;;  %s1820_s13 = smov 0   ;;  %s2145_s0 = inlined_call_operand.vmem [shape: bf16[2,42,32], index: 0, kind: input, shape index: {}]   ;;  %s2146_s1 = inlined_call_operand.vmem [shape: bf16[16,32,128], index: 1, kind: input, shape index: {}]   ;;  %s2147_s2 = inlined_call_operand.vmem [shape: bf16[2,18,128], index: 2, kind: output, shape index: {0}]   ;;  %s2148_s3 = inlined_call_operand.vmem [shape: f32[2,2,128], index: 3, kind: output, shape index: {1}]  }
   0x1   :  { %s1822_s14 = smov 0  }
   0x2 LB: > { %s26_s15 = sadd.s32 1, %s1791_s13  ;;  %p1469_p0 = scmp.ge.s32.totalorder %s1795_s14, 1  ;;  %s1795_s14 = sphi %s1822_s14, %s14_s14   ;;  %s1791_s13 = sphi %s1820_s13, %s2152_s13   ;;  %s1787_s12 = sphi %s1818_s12, %s2151_s12  }
   0x3   : > { %p28_p1 = scmp.ge.s32.totalorder %s26_s15, 2  ;;  %p165_p2 = scmp.lt.s32.totalorder %s1795_s14, 3 }
   0x5   : > { %s2154_s15 = smov (%p28_p1, %s26_s15), 0  ;;  %p166_p3 = pnand %p1469_p0, %p165_p2 }
   0x6   : > { %p203_p4 = scmp.lt.s32.totalorder (!%p166_p3), %s1787_s12, 1 }
   0x7   : > { %169 = sbr.rel (%p166_p3) target bundleno = 295 (0x127), region = 28 }
   0xc   : > { %v1700_v0 = vld [vmem:[%s2146_s1 + $0x8] sm:$0xff]  ;;  %v1702_v2 = vld [vmem:[%s2146_s1 + $0x18] sm:$0xff]  ;;  %v1699_v4 = vld [vmem:[%s2146_s1] sm:$0xff]  ;;  %s2156_s12 = smov (!%p203_p4, %s1787_s12), 1  ;;  %vm277_vm0 = vcmask 261120   ;;  %vm349_vm1 = vcmask 1046528  }
   0xd   : > { %v1704_v1 = vld [vmem:[%s2146_s1 + $0x28] sm:$0xff]  ;;  %v1706_v3 = vld [vmem:[%s2146_s1 + $0x38] sm:$0xff]  ;;  %328 = vmatpush.bf16.msra.mxu1 %v1700_v0  ;;  %v1703_v5 = vld [vmem:[%s2146_s1 + $0x20] sm:$0xff]  ;;  %290 = vmatpush.bf16.msra.mxu0 %v1702_v2  ;;  %s1741_s5 = smul.u32 24, %s2156_s12  ;;  %vm249_vm2 = vsmask.f32 7424 }
   0xe   : > { %377 = vmatpush.bf16.msra.mxu2 %v1704_v1  ;;  %443 = vmatpush.bf16.msra.mxu3 %v1706_v3  ;;  %v1701_v6 = vld [vmem:[%s2146_s1 + $0x10] sm:$0xff]  ;;  %v1712_v8 = vld [vmem:[%s2146_s1 + $0x68] sm:$0xff]  ;;  %v1714_v10 = vld [vmem:[%s2146_s1 + $0x78] sm:$0xff]  ;;  %vm401_vm3 = vsmask.f32 6400  ;;  %vm471_vm5 = vcmask 1044480  }
   0xf   : > { %v1705_v7 = vld [vmem:[%s2146_s1 + $0x30] sm:$0xff]  ;;  %v1708_v9 = vld [vmem:[%s2146_s1 + $0x48] sm:$0xff]  ;;  %s1875_s18 = scalar_lea.vmem %s2145_s0, %s1741_s5  ;;  %v1710_v11 = vld [vmem:[%s2146_s1 + $0x58] sm:$0xff]  ;;  %vm533_vm4 = vsmask.f32 4352  ;;  %vm711_vm7 = vcmask 1045504  }
  0x10   : > { %v1881_v12 = vld [vmem:[%s1875_s18] sm:$0xff]   ;;  %v235_v14 = vld [vmem:[%s1875_s18 + $0x8] sm:$0x3]  ;;  %v1713_v24 = vld [vmem:[%s2146_s1 + $0x70] sm:$0xff]  ;;  %vm763_vm6 = vsmask.f32 5376 }
  0x11   : > { %329 = vmatpush.bf16.msra.mxu1 %v1699_v4  ;;  %v340_v13 = vld [vmem:[%s1875_s18] sm:$0xe]  ;;  %291 = vmatpush.bf16.msra.mxu0 %v1701_v6  ;;  %v1735_v15 = vunpack.c.h.b16 %v1881_v12  ;;  %v251_v16 = vshrl.u32 %v1881_v12, 16  ;;  %v253_v17 = vshll.u32 %v1881_v12, 16  ;;  %v392_v19 = vld [vmem:[%s1875_s18 + $0x8] sm:$0x7]  ;;  %v246_v22 = vunpack.c.l.b16 %v235_v14 }
  0x12   : > { %378 = vmatpush.bf16.msra.mxu2 %v1703_v5  ;;  %444 = vmatpush.bf16.msra.mxu3 %v1705_v7  ;;  %v347_v18 = vunpack.c.l.b16 %v340_v13  ;;  %v1711_v20 = vld [vmem:[%s2146_s1 + $0x60] sm:$0xff]  ;;  %v399_v23 = vunpack.c.l.b16 %v392_v19  ;;  %v1709_v27 = vld [vmem:[%s2146_s1 + $0x50] sm:$0xff]  ;;  %v230_v40 = vld [vmem:[%s1875_s18 + $0x8] sm:$0x1]  ;;  %s1472_s20 = sshll.u32 %s2156_s12, 1 }
  0x13   : > { %v1707_v21 = vld [vmem:[%s2146_s1 + $0x40] sm:$0xff]  ;;  %v255_v25 = vrot.slane %v253_v17, 1  ;;  %v248_v28 = vpack.c.b16 %v246_v22, %v246_v22  ;;  %v517_v48 = vld [vmem:[%s1875_s18 + $0xc] sm:$0x1]  ;;  %v303_v52 = vunpack.c.l.b16 %v230_v40  ;;  %v1723_v58 = vld [vmem:[%s2146_s1 + $0xb8] sm:$0xff]  ;;  %s226_s23 = scalar_lea.vmem %s2148_s3, %s1472_s20 }
  0x14   : > { %1495 = vmatmul.msk.bf16.vlgmr.msra.gmra.mxu1 %vm277_vm0, %v1881_v12  ;;  %v348_v26 = vpack.c.b16 %v1735_v15, %v347_v18  ;;  %v400_v29 = vpack.c.b16 %v399_v23, %v399_v23  ;;  %v1782_v41 = vld [vmem:[%s1875_s18] sm:$0x8]  ;;  %v1909_v46 = vld [vmem:[%s1875_s18 + $0x4] sm:$0xff]   ;;  %v1919_v54 = vunpack.c.l.b16 %v517_v48  ;;  %v1718_v60 = vld [vmem:[%s2146_s1 + $0x98] sm:$0xff] }
  0x15   : > { %499 = vmatpush.bf16.msrb.mxu0 %v1708_v9  ;;  %575 = vmatpush.bf16.msrb.mxu1 %v1710_v11  ;;  %v256_v31 = vor.u32 %v255_v25, %v251_v16  ;;  %v351_v34 = vrot.slane %v248_v28, 1  ;;  %v258_v35 = vshll.u32 %v248_v28, 16  ;;  %v1784_v47 = vld [vmem:[%s1875_s18] sm:$0xf0]   ;;  %v1917_v53 = vunpack.c.h.b16 %v1909_v46  ;;  %v1720_v55 = vld [vmem:[%s2146_s1 + $0xa8] sm:$0xff]  ;;  %v1717_v22 = vld [vmem:[%s2146_s1 + $0x90] sm:$0xff] }
  0x16   : > { %621 = vmatpush.bf16.msrb.mxu2 %v1712_v8  ;;  %683 = vmatpush.bf16.msrb.mxu3 %v1714_v10  ;;  %v350_v30 = vrot.slane %v348_v26, 1  ;;  %v403_v32 = vshrl.u32 %v348_v26, 16  ;;  %v406_v33 = vshll.u32 %v348_v26, 16  ;;  %v411_v36 = vshrl.u32 %v400_v29, 16  ;;  %v1716_v57 = vld [vmem:[%s2146_s1 + $0x88] sm:$0xff]  ;;  %v1719_v17 = vld [vmem:[%s2146_s1 + $0xa0] sm:$0xff] }
  0x17   : > { %v414_v37 = vshll.u32 %v400_v29, 16  ;;  %v260_v43 = vrot.slane %v258_v35, 1  ;;  %v304_v59 = vpack.c.b16 %v303_v52, %v303_v52  ;;  %v1783_v61 = vor.u32 %v1784_v47, %v1782_v41  ;;  %v636_v9 = vld [vmem:[%s1875_s18 + $0xc] sm:$0x3]  ;;  %v458_v10 = vld [vmem:[%s1875_s18] sm:$0x8] }
  0x18   : > { %v405_v38 = vrot.slane %v403_v32, 1  ;;  %v408_v39 = vrot.slane %v406_v33, 2  ;;  %v352_v42 = vsel %vm349_vm1, %v350_v30, %v351_v34  ;;  %v413_v44 = vrot.slane %v411_v36, 1  ;;  %v459_v11 = vld [vmem:[%s1875_s18 + $0x8] sm:$0xff]   ;;  %v698_v35 = vld [vmem:[%s1875_s18 + $0x4] sm:$0xc] }
  0x19   : > { %500 = vmatpush.bf16.msrb.mxu0 %v1707_v21  ;;  %576 = vmatpush.bf16.msrb.mxu1 %v1709_v27  ;;  %v416_v45 = vrot.slane %v414_v37, 2  ;;  %v261_v50 = vsel %vm249_vm2, %v256_v31, %v260_v43  ;;  %v532_v62 = vpack.c.b16 %v1919_v54, %v1917_v53  ;;  %v262_v63 = vshrl.u32 %v248_v28, 16  ;;  %v1722_v21 = vld [vmem:[%s2146_s1 + $0xb0] sm:$0xff]  ;;  %v1731_v40 = vld [vmem:[%s2146_s1 + $0xf8] sm:$0xff] }
  0x1a   : > { %622 = vmatpush.bf16.msrb.mxu2 %v1711_v20  ;;  %684 = vmatpush.bf16.msrb.mxu3 %v1713_v24  ;;  %v409_v49 = vor.u32 %v408_v39, %v405_v38  ;;  %v535_v0 = vshrl.u32 %v1783_v61, 16  ;;  %v538_v1 = vshll.u32 %v1783_v61, 16  ;;  %v643_v13 = vunpack.c.l.b16 %v636_v9  ;;  %v1715_v20 = vld [vmem:[%s2146_s1 + $0x80] sm:$0xff]  ;;  %v1729_v38 = vld [vmem:[%s2146_s1 + $0xe8] sm:$0xff]  ;;  %v1727_v41 = vld [vmem:[%s2146_s1 + $0xd8] sm:$0xff] }
  0x1b   : > { %1509 = vmatmul.msk.bf16.vlgmr.msra.gmra.mxu2 %vm277_vm0, %v352_v42  ;;  %v417_v51 = vor.u32 %v416_v45, %v413_v44  ;;  %1485 = vmatmul.msk.bf16.vlgmr.msra.gmra.mxu0 %vm277_vm0, %v261_v50  ;;  %v543_v2 = vshrl.u32 %v532_v62, 16  ;;  %v546_v3 = vshll.u32 %v532_v62, 16  ;;  %v264_v4 = vor.u32 %v262_v63, %v260_v43  ;;  %v1725_v39 = vld [vmem:[%s2146_s1 + $0xc8] sm:$0xff]  ;;  %v1629_v61 = vld [vmem:[%s1875_s18 + $0x4] sm:$0x8]  ;;  %v1730_v9 = vld [vmem:[%s2146_s1 + $0xf0] sm:$0xff] }
  0x1c   : > { %v537_v5 = vrot.slane %v535_v0, 3  ;;  %v540_v6 = vrot.slane %v538_v1, 4  ;;  %v467_v18 = vunpack.c.l.b16 %v458_v10  ;;  %v468_v19 = vunpack.c.l.b16 %v459_v11  ;;  %v1992_v48 = vld [vmem:[%s1875_s18 + $0xc] sm:$0xff]   ;;  %v1721_v62 = vld [vmem:[%s1875_s18 + $0x4] sm:$0xf0] }
  0x1d   : > { %v418_v56 = vsel %vm401_vm3, %v409_v49, %v417_v51  ;;  %739 = vmatpush.bf16.msra.mxu0 %v1716_v57  ;;  %805 = vmatpush.bf16.msra.mxu1 %v1718_v60  ;;  %v545_v7 = vrot.slane %v543_v2, 3  ;;  %v548_v8 = vrot.slane %v546_v3, 4  ;;  %v644_v23 = vpack.c.b16 %v643_v13, %v643_v13  ;;  %v874_v49 = vld [vmem:[%s1875_s18 + $0x10] sm:$0x1]  ;;  %v699_v1 = vld [vmem:[%s1875_s18 + $0xc] sm:$0x7] }
  0x1e   : > { %1523 = vmatmul.msk.bf16.vlgmr.msra.gmra.mxu3 %vm277_vm0, %v418_v56  ;;  %856 = vmatpush.bf16.msra.mxu2 %v1720_v55  ;;  %v541_v14 = vor.u32 %v540_v6, %v537_v5  ;;  %v647_v24 = vshll.u32 %v1909_v46, 16  ;;  %v469_v26 = vpack.c.b16 %v1735_v15, %v467_v18  ;;  %v470_v27 = vpack.c.b16 %v468_v19, %v468_v19  ;;  %v820_v56 = vld [vmem:[%s1875_s18 + $0x4] sm:$0x8]  ;;  %v1726_v10 = vld [vmem:[%s2146_s1 + $0xd0] sm:$0xff] }
  0x1f   : > { %931 = vmatpush.bf16.msra.mxu3 %v1723_v58  ;;  %v549_v16 = vor.u32 %v548_v8, %v545_v7  ;;  %v645_v28 = vshrl.u32 %v1909_v46, 16  ;;  %v652_v30 = vshll.u32 %v644_v23, 16  ;;  %v707_v15 = vunpack.c.l.b16 %v698_v35  ;;  %v1728_v5 = vld [vmem:[%s2146_s1 + $0xe0] sm:$0xff] }
  0x20   : > { %v649_v29 = vrot.slane %v647_v24, 1  ;;  %v472_v31 = vrot.slane %v469_v26, 3  ;;  %v473_v32 = vrot.slane %v470_v27, 3  ;;  %v761_v37 = vunpack.c.h.b16 %v459_v11  ;;  %v1724_v8 = vld [vmem:[%s2146_s1 + $0xc0] sm:$0xff] }
  0x21   : > { %v550_v25 = vsel %vm533_vm4, %v541_v14, %v549_v16  ;;  %740 = vmatpush.bf16.msra.mxu0 %v1715_v20  ;;  %806 = vmatpush.bf16.msra.mxu1 %v1717_v22  ;;  %v1982_v42 = vpack.c.b16 %v1917_v53, %v707_v15  ;;  %v596_v50 = vpack.c.b16 %v1919_v54, %v1919_v54  ;;  %v1999_v57 = vunpack.c.l.b16 %v1992_v48 }
  0x22   : > { %857 = vmatpush.bf16.msra.mxu2 %v1719_v17  ;;  %v650_v33 = vor.u32 %v649_v29, %v645_v28  ;;  %v474_v36 = vsel %vm471_vm5, %v472_v31, %v473_v32  ;;  %v1984_v43 = vpack.c.b16 %v761_v37, %v761_v37  ;;  %v887_v58 = vunpack.c.l.b16 %v874_v49  ;;  %v1001_v31 = vld [vmem:[%s1875_s18 + $0x10] sm:$0x7] }
  0x23   : > { %932 = vmatpush.bf16.msra.mxu3 %v1722_v21  ;;  %v765_v44 = vshrl.u32 %v1982_v42, 16  ;;  %v768_v45 = vshll.u32 %v1982_v42, 16  ;;  %v827_v0 = vunpack.c.l.b16 %v820_v56  ;;  %v1630_v2 = vor.u32 %v1721_v62, %v1629_v61 }
  0x24   : > { %1496 = vmatmul.msk.bf16.gmra.mxu1 %vm277_vm0, %v304_v59  ;;  %v776_v47 = vshll.u32 %v1984_v43, 16  ;;  %v889_v54 = vpack.c.b16 %v887_v58, %v1999_v57  ;;  %v708_v6 = vunpack.c.l.b16 %v699_v1  ;;  %v830_v19 = vrot.slane %v1984_v43, 3 }
  0x25   : > { %v767_v52 = vrot.slane %v765_v44, 2  ;;  %v770_v55 = vrot.slane %v768_v45, 3  ;;  %v828_v7 = vpack.c.b16 %v1917_v53, %v827_v0  ;;  %v891_v11 = vshrl.u32 %v1630_v2, 16 }
  0x26   : > { %v778_v60 = vrot.slane %v776_v47, 3  ;;  %v894_v13 = vshll.u32 %v1630_v2, 16  ;;  %v899_v14 = vshrl.u32 %v889_v54, 16  ;;  %v710_v53 = vpack.c.b16 %v708_v6, %v708_v6 }
  0x27   : > { %v771_v3 = vor.u32 %v770_v55, %v767_v52  ;;  %v829_v18 = vrot.slane %v828_v7, 3  ;;  %v893_v20 = vrot.slane %v891_v11, 3  ;;  %v712_v24 = vrot.slane %v1982_v42, 2 }
  0x28   : > { %v896_v21 = vrot.slane %v894_v13, 4  ;;  %v901_v22 = vrot.slane %v899_v14, 3 }
  0x29   : > { %v831_v26 = vsel %vm471_vm5, %v829_v18, %v830_v19 }
  0x2a   : > { %v897_v27 = vor.u32 %v896_v21, %v893_v20 }
  0x2b   : > { %1510 = vmatmul.msk.bf16.gmra.mxu2 %vm277_vm0, %v351_v34  ;;  %1486 = vmatmul.msk.bf16.gmra.mxu0 %vm277_vm0, %v264_v4  ;;  %v654_v34 = vrot.slane %v652_v30, 1  ;;  %v946_v30 = vld [vmem:[%s1875_s18 + $0x8] sm:$0xe] }
  0x2d   : > { %v655_v12 = vsel %vm249_vm2, %v650_v33, %v654_v34  ;;  %v955_v33 = vunpack.c.l.b16 %v946_v30 }
  0x2e   : > { %1524 = vmatmul.msk.bf16.gmra.mxu3 %vm277_vm0, %v417_v51  ;;  %v656_v51 = vshrl.u32 %v644_v23, 16 }
  0x2f   : > { %v957_v35 = vpack.c.b16 %v1999_v57, %v955_v33 }
  0x30   : > { %v658_v63 = vor.u32 %v656_v51, %v654_v34  ;;  %v1008_v34 = vunpack.c.l.b16 %v1001_v31 }
  0x31   : > { %v1014_v15 = vshll.u32 %v957_v35, 16  ;;  %v959_v2 = vrot.slane %v957_v35, 1 }
  0x34   : > { %1551 = vmatmul.msk.bf16.vlgmr.msrb.gmra.mxu1 %vm277_vm0, %v550_v25  ;;  %v713_v25 = vrot.slane %v710_v53, 2 }
  0x35   : > { %1051 = vmatpush.bf16.msrb.mxu1 %v1727_v41  ;;  %v1124_v41 = vunpack.c.h.b16 %v1992_v48 }
  0x36   : > { %v714_v29 = vsel %vm711_vm7, %v712_v24, %v713_v25 }
  0x37   : > { %v1125_v49 = vpack.c.b16 %v1124_v41, %v1124_v41 }
  0x39   : > { %1052 = vmatpush.bf16.msrb.mxu1 %v1726_v10  ;;  %v1135_v48 = vshrl.u32 %v1125_v49, 16  ;;  %v1138_v58 = vshll.u32 %v1125_v49, 16 }
  0x3b   : > { %1565 = vmatmul.msk.bf16.vlgmr.msrb.gmra.mxu2 %vm277_vm0, %v1909_v46  ;;  %1537 = vmatmul.msk.bf16.vlgmr.msrb.gmra.mxu0 %vm277_vm0, %v474_v36  ;;  %v773_v46 = vshrl.u32 %v1984_v43, 16  ;;  %v1009_v36 = vpack.c.b16 %v1008_v34, %v1008_v34  ;;  %v1016_v43 = vrot.slane %v1014_v15, 2  ;;  %v1137_v0 = vrot.slane %v1135_v48, 2 }
  0x3c   : > { %1102 = vmatpush.bf16.msrb.mxu2 %v1729_v38  ;;  %986 = vmatpush.bf16.msrb.mxu0 %v1725_v39  ;;  %v1066_v39 = vld [vmem:[%s1875_s18 + $0x8] sm:$0xc]  ;;  %v1140_v1 = vrot.slane %v1138_v58, 3 }
  0x3d   : > { %v775_v59 = vrot.slane %v773_v46, 2  ;;  %v1019_v37 = vshrl.u32 %v1009_v36, 16  ;;  %v1022_v38 = vshll.u32 %v1009_v36, 16  ;;  %v947_v46 = vld [vmem:[%s1875_s18 + $0x10] sm:$0x3]  ;;  %v1076_v62 = vrot.slane %v1009_v36, 2 }
  0x3e   : > { %1579 = vmatmul.msk.bf16.vlgmr.msrb.gmra.mxu3 %vm277_vm0, %v655_v12  ;;  %v1011_v12 = vshrl.u32 %v957_v35, 16  ;;  %v956_v52 = vunpack.c.l.b16 %v947_v46  ;;  %s1742_s18 = smul.u32 12, %s2156_s12 }
  0x3f   : > { %1167 = vmatpush.bf16.msrb.mxu3 %v1731_v40  ;;  %v779_v4 = vor.u32 %v778_v60, %v775_v59  ;;  %v1073_v40 = vunpack.c.l.b16 %v1066_v39  ;;  %v1021_v44 = vrot.slane %v1019_v37, 1  ;;  %v1024_v45 = vrot.slane %v1022_v38, 2 }
  0x40   : > { %1103 = vmatpush.bf16.msrb.mxu2 %v1728_v5  ;;  %987 = vmatpush.bf16.msrb.mxu0 %v1724_v8  ;;  %v1013_v42 = vrot.slane %v1011_v12, 1  ;;  %v958_v60 = vpack.c.b16 %v956_v52, %v956_v52  ;;  %v1141_v5 = vor.u32 %v1140_v1, %v1137_v0  ;;  %s219_s19 = scalar_lea.vmem %s2147_s2, %s1742_s18 }
  0x41   : > { %v780_v17 = vsel %vm763_vm6, %v771_v3, %v779_v4  ;;  %v1074_v47 = vpack.c.b16 %v1999_v57, %v1073_v40  ;;  %v1025_v51 = vor.u32 %v1024_v45, %v1021_v44 }
  0x43   : > { %1168 = vmatpush.bf16.msrb.mxu3 %v1730_v9  ;;  %v1127_v55 = vshrl.u32 %v1074_v47, 16  ;;  %v1130_v56 = vshll.u32 %v1074_v47, 16  ;;  %v1075_v61 = vrot.slane %v1074_v47, 2 }
  0x44   : > { %1552 = vmatmul.msk.bf16.gmra.mxu1 %vm277_vm0, %v549_v16  ;;  %v902_v16 = vshll.u32 %v889_v54, 16  ;;  %v960_v54 = vrot.slane %v958_v60, 1 }
  0x45   : > { %v1129_v57 = vrot.slane %v1127_v55, 2  ;;  %v1077_v3 = vsel %vm711_vm7, %v1075_v61, %v1076_v62 }
  0x46   : > { %v904_v23 = vrot.slane %v902_v16, 4  ;;  %v961_v6 = vsel %vm349_vm1, %v959_v2, %v960_v54 }
  0x48   : > { %v905_v28 = vor.u32 %v904_v23, %v901_v22 }
  0x4b   : > { %1566 = vmatmul.msk.bf16.gmra.mxu2 %vm277_vm0, %v596_v50  ;;  %1538 = vmatmul.msk.bf16.gmra.mxu0 %vm277_vm0, %v473_v32  ;;  %v906_v32 = vsel %vm533_vm4, %v897_v27, %v905_v28  ;;  %v1017_v50 = vor.u32 %v1016_v43, %v1013_v42  ;;  %v1182_v43 = vlaneseq }
  0x4d   : > { %v1026_v59 = vsel %vm401_vm3, %v1017_v50, %v1025_v51  ;;  %v2076_v46 = vshrl.u32 %v1182_v43, 7 }
  0x4e   : > { %1580 = vmatmul.msk.bf16.gmra.mxu3 %vm277_vm0, %v658_v63  ;;  %v1132_v63 = vrot.slane %v1130_v56, 3 }
  0x4f   : > { %v1189_v50 = vand.u32 65535, %v2076_v46  ;;  %v2086_v55 = vadd.s32 8, %v2076_v46  ;;  %v1190_v48 = vshrl.u32 %v2076_v46, 16  ;;  %v2094_v1 = vadd.s32 16, %v2076_v46 }
  0x51   : > { %v1218_v56 = vand.u32 65535, %v2086_v55  ;;  %v1193_v58 = vmul.u32 43690, %v1189_v50  ;;  %v1219_v60 = vshrl.u32 %v2086_v55, 16 }
  0x53   : > { %v1222_v61 = vmul.u32 43690, %v1218_v56  ;;  %v1196_v0 = vshll.u32 %v1193_v58, 16 }
  0x54   : > { %1607 = vmatmul.msk.bf16.vlgmr.msra.gmra.mxu1 %vm277_vm0, %v780_v17 }
  0x5b   : > { %1621 = vmatmul.msk.bf16.vlgmr.msra.gmra.mxu2 %vm277_vm0, %v831_v26  ;;  %1593 = vmatmul.msk.bf16.vlgmr.msra.gmra.mxu0 %vm277_vm0, %v714_v29 }
  0x5e   : > { %1639 = vmatmul.msk.bf16.vlgmr.msra.gmra.mxu3 %vm277_vm0, %v906_v32 }
  0x64   : > { %1608 = vmatmul.msk.bf16.gmra.mxu1 %vm277_vm0, %v779_v4  ;;  %v1133_v4 = vor.u32 %v1132_v63, %v1129_v57  ;;  %v1192_v57 = vmul.u32 43691, %v1189_v50  ;;  %v1194_v63 = vmul.u32 43691, %v1190_v48 }
  0x66   : > { %v1142_v7 = vsel %vm763_vm6, %v1133_v4, %v1141_v5  ;;  %v1223_v4 = vmul.u32 43691, %v1219_v60  ;;  %vm1200_vm8 = vc.u32 %v1192_v57, %v1196_v0 }
  0x6b   : > { %1622 = vmatmul.msk.bf16.gmra.mxu2 %vm277_vm0, %v830_v19  ;;  %1594 = vmatmul.msk.bf16.gmra.mxu0 %vm277_vm0, %v713_v25 }
  0x6e   : > { %1640 = vmatmul.msk.bf16.gmra.mxu3 %vm277_vm0, %v905_v28 }
  0x74   : > { %1667 = vmatmul.msk.bf16.vlgmr.msrb.gmra.mxu1 %vm277_vm0, %v1026_v59 }
  0x7b   : > { %1681 = vmatmul.msk.bf16.vlgmr.msrb.gmra.mxu2 %vm277_vm0, %v1077_v3  ;;  %1653 = vmatmul.msk.bf16.vlgmr.msrb.gmra.mxu0 %vm277_vm0, %v961_v6  ;;  %v1221_v3 = vmul.u32 43691, %v1218_v56  ;;  %v1247_v6 = vand.u32 65535, %v2094_v1 }
  0x7e   : > { %1695 = vmatmul.msk.bf16.vlgmr.msrb.gmra.mxu3 %vm277_vm0, %v1142_v7  ;;  %v1198_v7 = vshll.u32 %v1194_v63, 16 }
  0x84   : > { %1668 = vmatmul.msk.bf16.gmra.mxu1 %vm277_vm0, %v1025_v51 }
  0x8b   : > { %1682 = vmatmul.msk.bf16.gmra.mxu2 %vm277_vm0, %v1076_v62  ;;  %1654 = vmatmul.msk.bf16.gmra.mxu0 %vm277_vm0, %v960_v54 }
  0x8e   : > { %1696 = vmatmul.msk.bf16.gmra.mxu3 %vm277_vm0, %v1141_v5  ;;  %v1225_v5 = vshll.u32 %v1222_v61, 16 }
  0x90   : > { %vm1229_vm9 = vc.u32 %v1221_v3, %v1225_v5 }
  0x91   : > { %v331_v8 = vpop.f32.mrf.mxu1 }
  0x98   : > { %v293_v10 = vpop.f32.mrf.mxu0 }
  0x99   : > { %v333_v9 = vpop.f32.mrf.mxu1  ;;  %v332_v11 = vadd.f32 %v331_v8, %v293_v10  ;;  %v1202_v8 = vadd.s32 %v1196_v0, %v1192_v57  ;;  %v1227_v10 = vshll.u32 %v1223_v4, 16  ;;  %v1199_v57 = vshrl.u32 %v1194_v63, 16 }
  0x9b   : > { %vm1204_vm10 = vc.u32 %v1202_v8, %v1198_v7 }
  0x9e   : > { %v380_v13 = vpop.f32.mrf.mxu2 }
  0x9f   : > { %v389_v14 = vadd.f32 %v380_v13, %v332_v11  ;;  %v1231_v11 = vadd.s32 %v1225_v5, %v1221_v3  ;;  %v1195_v13 = vmul.u32 43690, %v1190_v48 }
  0xa0   : > { %v295_v17 = vpop.f32.mrf.mxu0 }
  0xa1   : > { %v336_v16 = vpop.f32.mrf.mxu1  ;;  %v446_v53 = vpop.f32.mrf.mxu3  ;;  %v334_v18 = vadd.f32 %v333_v9, %v295_v17  ;;  %v1797_v17 = vmov 0   ;;  %vm1233_vm11 = vc.u32 %v1231_v11, %v1227_v10 }
  0xa2   : > { %v455_v19 = vadd.f32 %v446_v53, %v389_v14  ;;  %v1248_v14 = vshrl.u32 %v2094_v1, 16  ;;  %v1201_v53 = vsel %vm1200_vm8, 1, %v1797_v17 }
  0xa6   : > { %v382_v20 = vpop.f32.mrf.mxu2 }
  0xa7   : > { %v390_v21 = vadd.f32 %v382_v20, %v334_v18  ;;  %v1224_v18 = vmul.u32 43690, %v1219_v60  ;;  %v1230_v20 = vsel %vm1229_vm9, 1, %v1797_v17 }
  0xa8   : > { %v298_v23 = vpop.f32.mrf.mxu0 }
  0xa9   : > { %v338_v22 = vpop.f32.mrf.mxu1  ;;  %v448_v24 = vpop.f32.mrf.mxu3  ;;  %v337_v25 = vadd.f32 %v336_v16, %v298_v23  ;;  %v1251_v16 = vmul.u32 43690, %v1247_v6  ;;  %v1203_v23 = vadd.s32 %v1201_v53, %v1195_v13 }
  0xaa   : > { %v2054_v26 = vadd.f32 %v448_v24, %v390_v21  ;;  %v1250_v24 = vmul.u32 43691, %v1247_v6 }
  0xae   : > { %v385_v27 = vpop.f32.mrf.mxu2 }
  0xaf   : > { %v391_v28 = vadd.f32 %v385_v27, %v337_v25  ;;  %v1252_v25 = vmul.u32 43691, %v1248_v14  ;;  %v1254_v27 = vshll.u32 %v1251_v16, 16 }
  0xb0   : > { %v300_v30 = vpop.f32.mrf.mxu0 }
  0xb1   : > { %v578_v29 = vpop.f32.mrf.mxu1  ;;  %v451_v31 = vpop.f32.mrf.mxu3  ;;  %v1234_v30 = vsel %vm1233_vm11, 1, %v1797_v17  ;;  %vm1258_vm12 = vc.u32 %v1250_v24, %v1254_v27 }
  0xb2   : > { %v2056_v32 = vadd.f32 %v451_v31, %v391_v28  ;;  %v1205_v28 = vsel %vm1204_vm10, 1, %v1797_v17  ;;  %vm1301_vm10 = vcmask 1041408  }
  0xb6   : > { %v387_v33 = vpop.f32.mrf.mxu2 }
  0xb7   : > { %v1197_v33 = vshrl.u32 %v1193_v58, 16 }
  0xb8   : > { %v502_v36 = vpop.f32.mrf.mxu0 }
  0xb9   : > { %v2058_v34 = vpop.f32.mrf.mxu1  ;;  %v453_v35 = vpop.f32.mrf.mxu3  ;;  %v511_v12 = vadd.f32 %v502_v36, %v455_v19  ;;  %v1256_v36 = vshll.u32 %v1252_v25, 16 }
  0xba   : > { %v1207_v35 = vadd.s32 %v1205_v28, %v1203_v23 }
  0xbb   : > { %v2060_v15 = vadd.f32 %v578_v29, %v511_v12  ;;  %v1232_v29 = vadd.s32 %v1230_v20, %v1224_v18  ;;  %v1260_v12 = vadd.s32 %v1254_v27, %v1250_v24 }
  0xbc   : > { %v1208_v0 = vadd.s32 %v1207_v35, %v1197_v33 }
  0xbd   : > { %v1236_v43 = vadd.s32 %v1234_v30, %v1232_v29  ;;  %vm1262_vm13 = vc.u32 %v1260_v12, %v1256_v36 }
  0xbe   : > { %v2062_v37 = vpop.f32.mrf.mxu2  ;;  %v1209_v10 = vadd.s32 %v1208_v0, %v1199_v57 }
  0xbf   : > { %v633_v58 = vadd.f32 %v2062_v37, %v2060_v15 }
  0xc0   : > { %v2066_v39 = vpop.f32.mrf.mxu0  ;;  %v1210_v37 = vshrl.u32 %v1209_v10, 2 }
  0xc1   : > { %v2064_v38 = vpop.f32.mrf.mxu1  ;;  %v2068_v40 = vpop.f32.mrf.mxu3  ;;  %v512_v60 = vadd.f32 %v2066_v39, %v2054_v26  ;;  %v1255_v26 = vshrl.u32 %v1251_v16, 16 }
  0xc2   : > { %v695_v7 = vadd.f32 %v2068_v40, %v633_v58  ;;  %v1211_v24 = vmul.u32 6, %v1210_v37 }
  0xc3   : > { %v588_v8 = vadd.f32 %v2058_v34, %v512_v60  ;;  %v1257_v34 = vshrl.u32 %v1252_v25, 16 }
  0xc6   : > { %v2070_v41 = vpop.f32.mrf.mxu2 }
  0xc8   : > { %v2072_v44 = vpop.f32.mrf.mxu0 }
  0xc9   : > { %v585_v42 = vpop.f32.mrf.mxu1  ;;  %v2074_v45 = vpop.f32.mrf.mxu3  ;;  %v513_v15 = vadd.f32 %v2072_v44, %v2056_v32 }
  0xca   : > { %v1226_v42 = vshrl.u32 %v1222_v61, 16  ;;  %v1263_v61 = vsel %vm1262_vm13, 1, %v1797_v17 }
  0xcc   : > { %v1237_v3 = vadd.s32 %v1236_v43, %v1226_v42 }
  0xce   : > { %v2078_v47 = vpop.f32.mrf.mxu2 }
  0xd0   : > { %v509_v51 = vpop.f32.mrf.mxu0 }
  0xd1   : > { %v2080_v49 = vpop.f32.mrf.mxu1  ;;  %v2083_v52 = vpop.f32.mrf.mxu3  ;;  %v1253_v51 = vmul.u32 43690, %v1248_v14 }
  0xd6   : > { %v631_v59 = vpop.f32.mrf.mxu2 }
  0xd7   : > { %v1259_v59 = vsel %vm1258_vm12, 1, %v1797_v17 }
  0xd8   : > { %v742_v54 = vpop.f32.mrf.mxu0  ;;  %v1261_v5 = vadd.s32 %v1259_v59, %v1253_v51 }
  0xd9   : > { %v2091_v62 = vpop.f32.mrf.mxu1  ;;  %v693_v2 = vpop.f32.mrf.mxu3  ;;  %v751_v13 = vadd.f32 %v742_v54, %v695_v7  ;;  %v589_v54 = vadd.f32 %v2064_v38, %v513_v15 }
  0xda   : > { %v1228_v2 = vshrl.u32 %v1223_v4, 16  ;;  %v1265_v39 = vadd.s32 %v1263_v61, %v1261_v5  ;;  %v634_v4 = vadd.f32 %v2070_v41, %v588_v8 }
  0xdb   : > { %v817_v40 = vadd.f32 %v2080_v49, %v751_v13  ;;  %v635_v44 = vadd.f32 %v2078_v47, %v589_v54  ;;  %v1212_v49 = vsub.s32 %v2076_v46, %v1211_v24 }
  0xdc   : > { %v1238_v11 = vadd.s32 %v1237_v3, %v1228_v2  ;;  %v696_v17 = vadd.f32 %v2074_v45, %v634_v4  ;;  %v1266_v20 = vadd.s32 %v1265_v39, %v1255_v26 }
  0xdd   : > { %v697_v38 = vadd.f32 %v2083_v52, %v635_v44  ;;  %vm1273_vm14 = vcmp.ne.s32.totalorder %v1212_v49, 0  ;;  %vm1276_vm15 = vcmp.lt.s32.totalorder %v1212_v49, 0  ;;  %v1282_v42 = vadd.s32 6, %v1212_v49 }
  0xde   : > { %v2097_v9 = vpop.f32.mrf.mxu2  ;;  %v1239_v18 = vshrl.u32 %v1238_v11, 2  ;;  %v1267_v29 = vadd.s32 %v1266_v20, %v1257_v34  ;;  %vm1279_vm2 = vmand %vm1276_vm15, %vm1273_vm14 }
  0xdf   : > { %v868_v28 = vadd.f32 %v2097_v9, %v817_v40  ;;  %v1285_v59 = vsel %vm1279_vm2, %v1282_v42, %v1212_v49 }
  0xe0   : > { %v744_v21 = vpop.f32.mrf.mxu0  ;;  %v1240_v27 = vmul.u32 6, %v1239_v18  ;;  %v1268_v35 = vshrl.u32 %v1267_v29, 2  ;;  %vm1288_vm4 = vcmp.lt.s32.totalorder %v1285_v59, 3 }
  0xe1   : > { %v2100_v19 = vpop.f32.mrf.mxu1  ;;  %v934_v22 = vpop.f32.mrf.mxu3  ;;  %v752_v16 = vadd.f32 %v744_v21, %v696_v17 }
  0xe2   : > { %v943_v33 = vadd.f32 %v934_v22, %v868_v28  ;;  %v1241_v25 = vsub.s32 %v2086_v55, %v1240_v27 }
  0xe3   : > { %v818_v45 = vadd.f32 %v2091_v62, %v752_v16  ;;  %v1269_v62 = vmul.u32 6, %v1268_v35 }
  0xe4   : > { %vm1274_vm0 = vcmp.ne.s32.totalorder %v1241_v25, 0  ;;  %vm1277_vm1 = vcmp.lt.s32.totalorder %v1241_v25, 0  ;;  %v1283_v51 = vadd.s32 6, %v1241_v25 }
  0xe5   : > { %vm2121_vm3 = vmand %vm1277_vm1, %vm1274_vm0 }
  0xe6   : > { %v861_v31 = vpop.f32.mrf.mxu2  ;;  %v1286_v3 = vsel %vm2121_vm3, %v1283_v51, %v1241_v25 }
  0xe7   : > { %v869_v12 = vadd.f32 %v861_v31, %v818_v45  ;;  %vm1289_vm7 = vcmp.lt.s32.totalorder %v1286_v3, 3 }
  0xe8   : > { %v747_v56 = vpop.f32.mrf.mxu0 }
  0xe9   : > { %v815_v50 = vpop.f32.mrf.mxu1  ;;  %v936_v48 = vpop.f32.mrf.mxu3  ;;  %v753_v9 = vadd.f32 %v747_v56, %v697_v38 }
  0xea   : > { %v944_v43 = vadd.f32 %v936_v48, %v869_v12  ;;  %v1270_v48 = vsub.s32 %v2094_v1, %v1269_v62 }
  0xeb   : > { %v819_v52 = vadd.f32 %v2100_v19, %v753_v9 }
  0xec   : > { %vm1275_vm5 = vcmp.ne.s32.totalorder %v1270_v48, 0  ;;  %vm1278_vm6 = vcmp.lt.s32.totalorder %v1270_v48, 0  ;;  %v1284_v1 = vadd.s32 6, %v1270_v48 }
  0xed   : > { %vm1281_vm8 = vmand %vm1278_vm6, %vm1275_vm5 }
  0xee   : > { %v864_v6 = vpop.f32.mrf.mxu2  ;;  %v1287_v4 = vsel %vm1281_vm8, %v1284_v1, %v1270_v48 }
  0xef   : > { %v870_v0 = vadd.f32 %v864_v6, %v819_v52  ;;  %vm1290_vm9 = vcmp.lt.s32.totalorder %v1287_v4, 3 }
  0xf0   : > { %v749_v63 = vpop.f32.mrf.mxu0 }
  0xf1   : > { %v1054_v14 = vpop.f32.mrf.mxu1  ;;  %v939_v53 = vpop.f32.mrf.mxu3 }
  0xf2   : > { %v945_v19 = vadd.f32 %v939_v53, %v870_v0 }
  0xf6   : > { %v866_v23 = vpop.f32.mrf.mxu2 }
  0xf8   : > { %v989_v32 = vpop.f32.mrf.mxu0 }
  0xf9   : > { %v1056_v41 = vpop.f32.mrf.mxu1  ;;  %v941_v30 = vpop.f32.mrf.mxu3  ;;  %v998_v21 = vadd.f32 %v989_v32, %v943_v33 }
  0xfb   : > { %v1063_v47 = vadd.f32 %v1054_v14, %v998_v21 }
  0xfe   : > { %v1105_v36 = vpop.f32.mrf.mxu2 }
  0xff   : > { %v1114_v56 = vadd.f32 %v1105_v36, %v1063_v47 }
 0x100   : > { %v991_v50 = vpop.f32.mrf.mxu0 }
 0x101   : > { %v1059_v22 = vpop.f32.mrf.mxu1  ;;  %v1170_v46 = vpop.f32.mrf.mxu3  ;;  %v999_v55 = vadd.f32 %v991_v50, %v944_v43 }
 0x102   : > { %v1179_v2 = vadd.f32 %v1170_v46, %v1114_v56 }
 0x103   : > { %v1064_v60 = vadd.f32 %v1056_v41, %v999_v55 }
 0x104   : > { %v1297_v8 = vsel %vm1288_vm4, %v1179_v2, 0.0 }
 0x105   : > { %v1311_v26 = vmul.f32 %v1297_v8, %v1297_v8 }
 0x106   : > { %v1107_v57 = vpop.f32.mrf.mxu2 }
 0x107   : > { %v1115_v58 = vadd.f32 %v1107_v57, %v1064_v60 }
 0x108   : > { %v994_v61 = vpop.f32.mrf.mxu0 }
 0x109   : > { %v1061_v5 = vpop.f32.mrf.mxu1  ;;  %v1172_v7 = vpop.f32.mrf.mxu3  ;;  %v1000_v10 = vadd.f32 %v994_v61, %v945_v19 }
 0x10a   : > { %v1180_v11 = vadd.f32 %v1172_v7, %v1115_v58 }
 0x10b   : > { %v1065_v14 = vadd.f32 %v1059_v22, %v1000_v10 }
 0x10c   : > { %v1298_v6 = vsel %vm1289_vm7, %v1180_v11, 0.0  ;;  %v1739_v13 = vpack.c.bf16 %v1180_v11, %v1179_v2 }
 0x10d   : > { %v1300_v39 = vadd.f32 %v1298_v6, %v1297_v8  ;;  %v1312_v63 = vmul.f32 %v1298_v6, %v1298_v6 }
 0x10e   : > { %v1110_v53 = vpop.f32.mrf.mxu2  ;;  %1740 = vst [vmem:[%s219_s19] sm:$0xff] %v1739_v13  }
 0x10f   : > { %v1314_v15 = vadd.f32 %v1312_v63, %v1311_v26  ;;  %v1116_v37 = vadd.f32 %v1110_v53, %v1065_v14 }
 0x110   : > { %v996_v18 = vpop.f32.mrf.mxu0 }
 0x111   : > { %v1175_v17 = vpop.f32.mrf.mxu3 }
 0x112   : > { %v1181_v40 = vadd.f32 %v1175_v17, %v1116_v37 }
 0x114   : > { %v1299_v34 = vsel %vm1290_vm9, %v1181_v40, 0.0  ;;  %v1326_v20 = vpack.c.bf16 %v1181_v40, %v1181_v40 }
 0x115   : > { %v1302_v23 = vsel %vm1301_vm10, %v1299_v34, 0.0  ;;  %v1313_v54 = vmul.f32 %v1299_v34, %v1299_v34 }
 0x116   : > { %v1112_v16 = vpop.f32.mrf.mxu2  ;;  %v1303_v24 = vadd.f32 %v1302_v23, %v1300_v39  ;;  %1329 = vst [vmem:[%s219_s19 + $0x8] sm:$0x1] %v1326_v20 }
 0x117   : > { %v1315_v27 = vsel %vm1301_vm10, %v1313_v54, 0.0 }
 0x118   : > { %v1304_v28 = vrot.slane %v1303_v24, 4  ;;  %v1316_v41 = vadd.f32 %v1315_v27, %v1314_v15 }
 0x119   : > { %v1177_v29 = vpop.f32.mrf.mxu3 }
 0x11a   : > { %v1305_v30 = vadd.f32 %v1304_v28, %v1303_v24  ;;  %v1317_v32 = vrot.slane %v1316_v41, 4 }
 0x11c   : > { %v1306_v44 = vrot.slane %v1305_v30, 2  ;;  %v1318_v33 = vadd.f32 %v1317_v32, %v1316_v41 }
 0x11e   : > { %v1307_v45 = vadd.f32 %v1306_v44, %v1305_v30  ;;  %v1319_v49 = vrot.slane %v1318_v33, 2 }
 0x120   : > { %v1308_v25 = vrot.slane %v1307_v45, 1  ;;  %v1320_v38 = vadd.f32 %v1319_v49, %v1318_v33 }
 0x122   : > { %v1309_v21 = vadd.f32 %v1308_v25, %v1307_v45  ;;  %v1321_v35 = vrot.slane %v1320_v38, 1 }
 0x124   : > { %1310 = vst [vmem:[%s226_s23] sm:$0x1] %v1309_v21  ;;  %v1322_v36 = vadd.f32 %v1321_v35, %v1320_v38 }
 0x126   : > { %1323 = vst [vmem:[%s226_s23 + $0x1] sm:$0x1] %v1322_v36 }
 0x127 PF: > { %s14_s14 = sadd.s32 1, %s1795_s14   ;;  %s2151_s12 = smov %s1791_s13 }
 0x128   : > { %p11_p5 = scmp.ge.s32.totalorder %s14_s14, 4   ;;  %s2152_s13 = smov %s2154_s15 }
 0x12a   :  { %13 = sbr.rel (!%p11_p5) target bundleno = 2 (0x2), region = 88 }

// kernel: _lambda_.15
= control target key start
LH: loop header
LB: loop body
LE: loop exit
PB: predicated region body
PF: predicated region fallthrough
CT: control target
= control target key end

     0   :  { %s1863_s12 = smov 0   ;;  %s1865_s13 = smov 0   ;;  %s2159_s0 = inlined_call_operand.vmem [shape: bf16[2,30,64], index: 0, kind: input, shape index: {}]   ;;  %s2160_s1 = inlined_call_operand.vmem [shape: bf16[16,64,128], index: 1, kind: input, shape index: {}]   ;;  %s2161_s2 = inlined_call_operand.vmem [shape: f32[1,128], index: 2, kind: input, shape index: {}]   ;;  %s2162_s3 = inlined_call_operand.vmem [shape: f32[2,10,128], index: 3, kind: output, shape index: {}]  }
   0x1   :  { %s1867_s14 = smov 0  }
   0x2 LB: > { %s25_s15 = sadd.s32 1, %s1837_s13  ;;  %p1329_p0 = scmp.ge.s32.totalorder %s1841_s14, 1  ;;  %s1841_s14 = sphi %s1867_s14, %s13_s14   ;;  %s1837_s13 = sphi %s1865_s13, %s2164_s13   ;;  %s1833_s12 = sphi %s1863_s12, %s2163_s12  }
   0x3   : > { %p27_p1 = scmp.ge.s32.totalorder %s25_s15, 2  ;;  %p168_p2 = scmp.lt.s32.totalorder %s1841_s14, 3 }
   0x5   : > { %s2166_s15 = smov (%p27_p1, %s25_s15), 0  ;;  %p169_p3 = pnand %p1329_p0, %p168_p2 }
   0x6   : > { %p202_p4 = scmp.lt.s32.totalorder (!%p169_p3), %s1833_s12, 1 }
   0x7   : > { %172 = sbr.rel (%p169_p3) target bundleno = 225 (0xe1), region = 32 }
   0xc   : > { %v1737_v0 = vld [vmem:[%s2160_s1 + $0x38] sm:$0xff]  ;;  %v1736_v4 = vld [vmem:[%s2160_s1 + $0x30] sm:$0xff]  ;;  %s2168_s12 = smov (!%p202_p4, %s1833_s12), 1  ;;  %v1735_v8 = vld [vmem:[%s2160_s1 + $0x28] sm:$0xff]  ;;  %vm279_vm0 = vcmask 523264  }
   0xd   : > { %v1733_v1 = vld [vmem:[%s2160_s1 + $0x18] sm:$0xff]  ;;  %287 = vmatpush.bf16.msra.mxu0 %v1737_v0  ;;  %v1732_v5 = vld [vmem:[%s2160_s1 + $0x10] sm:$0xff]  ;;  %s1728_s5 = sshll.u32 %s2168_s12, 4  ;;  %v1731_v9 = vld [vmem:[%s2160_s1 + $0x8] sm:$0xff]  ;;  %vm606_vm1 = vsmask.f32 4352 }
   0xe   : > { %v1741_v2 = vld [vmem:[%s2160_s1 + $0x58] sm:$0xff]  ;;  %331 = vmatpush.bf16.msra.mxu1 %v1733_v1  ;;  %v1740_v6 = vld [vmem:[%s2160_s1 + $0x50] sm:$0xff]  ;;  %v1739_v10 = vld [vmem:[%s2160_s1 + $0x48] sm:$0xff]  ;;  %s1922_s18 = scalar_lea.vmem %s2159_s0, %s1728_s5  ;;  %s221_s23 = scalar_lea.vmem %s2162_s3, %s1728_s5 }
   0xf   : > { %v1745_v3 = vld [vmem:[%s2160_s1 + $0x78] sm:$0xff]  ;;  %386 = vmatpush.bf16.msra.mxu2 %v1741_v2  ;;  %v1744_v7 = vld [vmem:[%s2160_s1 + $0x70] sm:$0xff]  ;;  %v1925_v11 = vld [vmem:[%s1922_s18] sm:$0xff]  }
  0x10   : > { %450 = vmatpush.bf16.msra.mxu3 %v1745_v3  ;;  %v233_v12 = vld [vmem:[%s1922_s18 + $0x4] sm:$0x3]  ;;  %v1743_v14 = vld [vmem:[%s2160_s1 + $0x68] sm:$0xff]  ;;  %v245_v15 = vunpack.c.l.b16 %v1925_v11  ;;  %v341_v17 = vld [vmem:[%s1922_s18] sm:$0xe]  ;;  %v476_v39 = vunpack.c.h.b16 %v1925_v11 }
  0x11   : > { %288 = vmatpush.bf16.msra.mxu0 %v1736_v4  ;;  %v224_v13 = vld [vmem:[%s1922_s18 + $0x4] sm:$0x1]  ;;  %v246_v16 = vunpack.c.l.b16 %v233_v12  ;;  %v352_v19 = vunpack.c.l.b16 %v341_v17  ;;  %v1757_v33 = vld [vmem:[%s2160_s1 + $0xd8] sm:$0xff]  ;;  %v462_v35 = vld [vmem:[%s1922_s18] sm:$0xc] }
  0x12   : > { %332 = vmatpush.bf16.msra.mxu1 %v1732_v5  ;;  %v398_v18 = vld [vmem:[%s1922_s18 + $0x4] sm:$0x7]  ;;  %v298_v22 = vunpack.c.l.b16 %v224_v13  ;;  %v1749_v34 = vld [vmem:[%s2160_s1 + $0x98] sm:$0xff]  ;;  %v475_v38 = vunpack.c.l.b16 %v462_v35  ;;  %v586_v40 = vld [vmem:[%s1922_s18] sm:$0x8] }
  0x13   : > { %387 = vmatpush.bf16.msra.mxu2 %v1740_v6  ;;  %v409_v20 = vunpack.c.l.b16 %v398_v18  ;;  %v247_v21 = vpack.c.b16 %v246_v16, %v245_v15  ;;  %v1734_v23 = vld [vmem:[%s2160_s1 + $0x20] sm:$0xff]  ;;  %v353_v25 = vpack.c.b16 %v246_v16, %v352_v19  ;;  %v588_v45 = vld [vmem:[%s1922_s18 + $0x8] sm:$0x1]  ;;  %v601_v46 = vunpack.c.l.b16 %v586_v40  ;;  %v1753_v48 = vld [vmem:[%s2160_s1 + $0xb8] sm:$0xff] }
  0x14   : > { %451 = vmatpush.bf16.msra.mxu3 %v1744_v7  ;;  %v1730_v24 = vld [vmem:[%s2160_s1] sm:$0xff]  ;;  %v299_v37 = vpack.c.b16 %v298_v22, %v245_v15  ;;  %v1761_v49 = vld [vmem:[%s2160_s1 + $0xf8] sm:$0xff]  ;;  %v1967_v51 = vunpack.c.l.b16 %v588_v45  ;;  %v1756_v53 = vld [vmem:[%s2160_s1 + $0xd0] sm:$0xff]  ;;  %v477_v55 = vpack.c.b16 %v476_v39, %v475_v38 }
  0x15   : > { %289 = vmatpush.bf16.msra.mxu0 %v1735_v8  ;;  %v410_v26 = vpack.c.b16 %v409_v20, %v352_v19  ;;  %v1738_v27 = vld [vmem:[%s2160_s1 + $0x40] sm:$0xff]  ;;  %v249_v29 = vshrl.u32 %v247_v21, 16  ;;  %v251_v30 = vshll.u32 %v247_v21, 16  ;;  %v354_v42 = vrot.slane %v353_v25, 1  ;;  %v1748_v54 = vld [vmem:[%s2160_s1 + $0x90] sm:$0xff]  ;;  %v1755_v63 = vld [vmem:[%s2160_s1 + $0xc8] sm:$0xff] }
  0x16   : > { %333 = vmatpush.bf16.msra.mxu1 %v1731_v9  ;;  %v1742_v28 = vld [vmem:[%s2160_s1 + $0x60] sm:$0xff]  ;;  %v1752_v57 = vld [vmem:[%s2160_s1 + $0xb0] sm:$0xff]  ;;  %v605_v60 = vpack.c.b16 %v1967_v51, %v1967_v51  ;;  %v1747_v0 = vld [vmem:[%s2160_s1 + $0x88] sm:$0xff]  ;;  %v479_v1 = vshrl.u32 %v477_v55, 16  ;;  %v482_v2 = vshll.u32 %v477_v55, 16 }
  0x17   : > { %388 = vmatpush.bf16.msra.mxu2 %v1739_v10  ;;  %v412_v31 = vshrl.u32 %v410_v26, 16  ;;  %v415_v32 = vshll.u32 %v410_v26, 16  ;;  %v253_v36 = vrot.slane %v251_v30, 1  ;;  %v1957_v41 = vld [vmem:[%s1922_s18 + $0x4] sm:$0xff]   ;;  %v1760_v58 = vld [vmem:[%s2160_s1 + $0xf0] sm:$0xff]  ;;  %v1773_v13 = vld [vmem:[%s2160_s1 + $0x158] sm:$0xff] }
  0x18   : > { %452 = vmatpush.bf16.msra.mxu3 %v1743_v14  ;;  %v602_v50 = vunpack.c.l.b16 %v1957_v41  ;;  %v529_v59 = vld [vmem:[%s1922_s18] sm:$0x8]  ;;  %v1751_v4 = vld [vmem:[%s2160_s1 + $0xa8] sm:$0xff]  ;;  %v616_v8 = vshll.u32 %v605_v60, 16  ;;  %v481_v11 = vrot.slane %v479_v1, 2  ;;  %v484_v12 = vrot.slane %v482_v2, 3 }
  0x19   : > { %290 = vmatpush.bf16.msra.mxu0 %v1734_v23  ;;  %v414_v43 = vrot.slane %v412_v31, 1  ;;  %v417_v44 = vrot.slane %v415_v32, 2  ;;  %v254_v47 = vor.u32 %v253_v36, %v249_v29  ;;  %v540_v3 = vunpack.c.l.b16 %v529_v59  ;;  %v1759_v5 = vld [vmem:[%s2160_s1 + $0xe8] sm:$0xff]  ;;  %v1754_v9 = vld [vmem:[%s2160_s1 + $0xc0] sm:$0xff]  ;;  %v1765_v14 = vld [vmem:[%s2160_s1 + $0x118] sm:$0xff] }
  0x1a   : > { %334 = vmatpush.bf16.msra.mxu1 %v1730_v24  ;;  %v604_v56 = vpack.c.b16 %v602_v50, %v601_v46  ;;  %v1746_v10 = vld [vmem:[%s2160_s1 + $0x80] sm:$0xff]  ;;  %v618_v19 = vrot.slane %v616_v8, 4  ;;  %v776_v21 = vld [vmem:[%s1922_s18 + $0x8] sm:$0x7]  ;;  %v1769_v22 = vld [vmem:[%s2160_s1 + $0x138] sm:$0xff]  ;;  %v485_v25 = vor.u32 %v484_v12, %v481_v11  ;;  %v672_v31 = vpack.c.b16 %v1967_v51, %v602_v50 }
  0x1b   : > { %389 = vmatpush.bf16.msra.mxu2 %v1738_v27  ;;  %v418_v52 = vor.u32 %v417_v44, %v414_v43  ;;  %v1750_v15 = vld [vmem:[%s2160_s1 + $0xa0] sm:$0xff]  ;;  %v541_v16 = vpack.c.b16 %v476_v39, %v540_v3  ;;  %v1777_v23 = vld [vmem:[%s2160_s1 + $0x178] sm:$0xff]  ;;  %v1772_v26 = vld [vmem:[%s2160_s1 + $0x150] sm:$0xff]  ;;  %v787_v29 = vunpack.c.l.b16 %v776_v21 }
  0x1c   : > { %453 = vmatpush.bf16.msra.mxu3 %v1742_v28  ;;  %1358 = vmatmul.msk.bf16.vlgmr.msra.gmra.mxu0 %vm279_vm0, %v254_v47  ;;  %v608_v61 = vshrl.u32 %v604_v56, 16  ;;  %v611_v62 = vshll.u32 %v604_v56, 16  ;;  %v1758_v17 = vld [vmem:[%s2160_s1 + $0xe0] sm:$0xff]  ;;  %v1764_v32 = vld [vmem:[%s2160_s1 + $0x110] sm:$0xff]  ;;  %v717_v38 = vld [vmem:[%s1922_s18 + $0x8] sm:$0x3] }
  0x1d   : > { %517 = vmatpush.bf16.msrb.mxu0 %v1749_v34  ;;  %1375 = vmatmul.msk.bf16.vlgmr.msra.gmra.mxu1 %vm279_vm0, %v299_v37  ;;  %v716_v20 = vld [vmem:[%s1922_s18 + $0x4] sm:$0xe]  ;;  %v542_v27 = vrot.slane %v541_v16, 3  ;;  %v908_v34 = vunpack.c.h.b16 %v1957_v41  ;;  %v1768_v35 = vld [vmem:[%s2160_s1 + $0x130] sm:$0xff]  ;;  %v1771_v37 = vld [vmem:[%s2160_s1 + $0x148] sm:$0xff]  ;;  %v730_v45 = vunpack.c.l.b16 %v717_v38 }
  0x1e   : > { %1400 = vmatmul.msk.bf16.vlgmr.msra.gmra.mxu2 %vm279_vm0, %v354_v42  ;;  %574 = vmatpush.bf16.msrb.mxu1 %v1753_v48  ;;  %v610_v6 = vrot.slane %v608_v61, 3  ;;  %v613_v7 = vrot.slane %v611_v62, 4  ;;  %v840_v24 = vld [vmem:[%s1922_s18 + $0x4] sm:$0xc]  ;;  %v729_v28 = vunpack.c.l.b16 %v716_v20  ;;  %v1776_v36 = vld [vmem:[%s2160_s1 + $0x170] sm:$0xff]  ;;  %v1763_v40 = vld [vmem:[%s2160_s1 + $0x108] sm:$0xff] }
  0x1f   : > { %651 = vmatpush.bf16.msrb.mxu2 %v1757_v33  ;;  %1425 = vmatmul.msk.bf16.vlgmr.msra.gmra.mxu3 %vm279_vm0, %v418_v52  ;;  %v851_v33 = vunpack.c.l.b16 %v840_v24  ;;  %v1767_v42 = vld [vmem:[%s2160_s1 + $0x128] sm:$0xff]  ;;  %v1770_v44 = vld [vmem:[%s2160_s1 + $0x140] sm:$0xff]  ;;  %v1785_v59 = vld [vmem:[%s2160_s1 + $0x1b8] sm:$0xff] }
  0x20   : > { %704 = vmatpush.bf16.msrb.mxu3 %v1761_v49  ;;  %v614_v18 = vor.u32 %v613_v7, %v610_v6  ;;  %v788_v39 = vpack.c.b16 %v787_v29, %v729_v28  ;;  %v1775_v43 = vld [vmem:[%s2160_s1 + $0x168] sm:$0xff]  ;;  %v1762_v46 = vld [vmem:[%s2160_s1 + $0x100] sm:$0xff]  ;;  %v1789_v49 = vld [vmem:[%s2160_s1 + $0x1d8] sm:$0xff]  ;;  %v731_v56 = vpack.c.b16 %v730_v45, %v729_v28 }
  0x21   : > { %518 = vmatpush.bf16.msrb.mxu0 %v1748_v54  ;;  %v909_v41 = vpack.c.b16 %v908_v34, %v851_v33  ;;  %v961_v52 = vld [vmem:[%s1922_s18 + $0x4] sm:$0x8]  ;;  %v1793_v62 = vld [vmem:[%s2160_s1 + $0x1f8] sm:$0xff]  ;;  %v1784_v8 = vld [vmem:[%s2160_s1 + $0x1b0] sm:$0xff] }
  0x22   : > { %575 = vmatpush.bf16.msrb.mxu1 %v1752_v57  ;;  %v619_v30 = vsel %vm606_vm1, %v614_v18, %v618_v19  ;;  %v790_v47 = vshrl.u32 %v788_v39, 16  ;;  %v793_v48 = vshll.u32 %v788_v39, 16  ;;  %v1766_v54 = vld [vmem:[%s2160_s1 + $0x120] sm:$0xff]  ;;  %v852_v57 = vpack.c.b16 %v787_v29, %v851_v33  ;;  %v1787_v16 = vld [vmem:[%s2160_s1 + $0x1c8] sm:$0xff] }
  0x23   : > { %652 = vmatpush.bf16.msrb.mxu2 %v1756_v53  ;;  %v911_v50 = vshrl.u32 %v909_v41, 16  ;;  %v914_v51 = vshll.u32 %v909_v41, 16  ;;  %v962_v53 = vld [vmem:[%s1922_s18 + $0x8] sm:$0xf]  ;;  %v1774_v55 = vld [vmem:[%s2160_s1 + $0x160] sm:$0xff]  ;;  %v732_v6 = vrot.slane %v731_v56, 1 }
  0x24   : > { %705 = vmatpush.bf16.msrb.mxu3 %v1760_v58  ;;  %v1781_v58 = vld [vmem:[%s2160_s1 + $0x198] sm:$0xff]  ;;  %v792_v60 = vrot.slane %v790_v47, 1  ;;  %v795_v61 = vrot.slane %v793_v48, 2  ;;  %v2092_v1 = vunpack.c.l.b16 %v962_v53  ;;  %v853_v7 = vrot.slane %v852_v57, 2  ;;  %v1786_v24 = vld [vmem:[%s2160_s1 + $0x1c0] sm:$0xff] }
  0x25   : > { %519 = vmatpush.bf16.msrb.mxu0 %v1747_v0  ;;  %v976_v0 = vunpack.c.l.b16 %v961_v52  ;;  %v913_v2 = vrot.slane %v911_v50, 2  ;;  %v916_v3 = vrot.slane %v914_v51, 3  ;;  %v1790_v33 = vld [vmem:[%s2160_s1 + $0x1e0] sm:$0xff] }
  0x26   : > { %576 = vmatpush.bf16.msrb.mxu1 %v1751_v4  ;;  %v963_v4 = vld [vmem:[%s1922_s18 + $0xc] sm:$0x1] }
  0x27   : > { %653 = vmatpush.bf16.msrb.mxu2 %v1755_v63  ;;  %v1788_v63 = vld [vmem:[%s2160_s1 + $0x1d0] sm:$0xff]  ;;  %v979_v11 = vpack.c.b16 %v2092_v1, %v976_v0 }
  0x28   : > { %706 = vmatpush.bf16.msrb.mxu3 %v1759_v5  ;;  %v1090_v5 = vld [vmem:[%s1922_s18 + $0xc] sm:$0x3] }
  0x29   : > { %520 = vmatpush.bf16.msrb.mxu0 %v1746_v10  ;;  %v978_v10 = vunpack.c.l.b16 %v963_v4  ;;  %v1101_v12 = vunpack.c.l.b16 %v1090_v5  ;;  %v982_v19 = vshrl.u32 %v979_v11, 16  ;;  %v985_v20 = vshll.u32 %v979_v11, 16 }
  0x2a   : > { %577 = vmatpush.bf16.msrb.mxu1 %v1750_v15  ;;  %v1792_v15 = vld [vmem:[%s2160_s1 + $0x1f0] sm:$0xff] }
  0x2b   : > { %654 = vmatpush.bf16.msrb.mxu2 %v1754_v9  ;;  %v796_v9 = vor.u32 %v795_v61, %v792_v60  ;;  %v980_v18 = vpack.c.b16 %v978_v10, %v978_v10  ;;  %v1102_v21 = vpack.c.b16 %v1101_v12, %v2092_v1  ;;  %v987_v28 = vrot.slane %v985_v20, 4 }
  0x2c   : > { %707 = vmatpush.bf16.msrb.mxu3 %v1758_v17  ;;  %1450 = vmatmul.msk.bf16.vlgmr.msrb.gmra.mxu0 %vm279_vm0, %v485_v25  ;;  %v1783_v17 = vld [vmem:[%s2160_s1 + $0x1a8] sm:$0xff] }
  0x2d   : > { %764 = vmatpush.bf16.msra.mxu0 %v1765_v14  ;;  %1475 = vmatmul.msk.bf16.vlgmr.msrb.gmra.mxu1 %vm279_vm0, %v542_v27  ;;  %v1780_v14 = vld [vmem:[%s2160_s1 + $0x190] sm:$0xff]  ;;  %v1153_v25 = vld [vmem:[%s1922_s18 + $0x8] sm:$0xe]  ;;  %v984_v27 = vrot.slane %v982_v19, 3  ;;  %v990_v29 = vshll.u32 %v980_v18, 16 }
  0x2e   : > { %828 = vmatpush.bf16.msra.mxu1 %v1769_v22  ;;  %1500 = vmatmul.msk.bf16.vlgmr.msrb.gmra.mxu2 %vm279_vm0, %v619_v30  ;;  %v1779_v22 = vld [vmem:[%s2160_s1 + $0x188] sm:$0xff]  ;;  %v1106_v30 = vshll.u32 %v1102_v21, 16 }
  0x2f   : > { %885 = vmatpush.bf16.msra.mxu2 %v1773_v13  ;;  %1525 = vmatmul.msk.bf16.vlgmr.msrb.gmra.mxu3 %vm279_vm0, %v672_v31  ;;  %v917_v13 = vor.u32 %v916_v3, %v913_v2  ;;  %v1778_v31 = vld [vmem:[%s2160_s1 + $0x180] sm:$0xff]  ;;  %v988_v34 = vor.u32 %v987_v28, %v984_v27 }
  0x30   : > { %949 = vmatpush.bf16.msra.mxu3 %v1777_v23  ;;  %v1791_v23 = vld [vmem:[%s2160_s1 + $0x1e8] sm:$0xff] }
  0x31   : > { %765 = vmatpush.bf16.msra.mxu0 %v1764_v32  ;;  %v1164_v32 = vunpack.c.l.b16 %v1153_v25 }
  0x32   : > { %829 = vmatpush.bf16.msra.mxu1 %v1768_v35  ;;  %v992_v35 = vrot.slane %v990_v29, 4 }
  0x33   : > { %886 = vmatpush.bf16.msra.mxu2 %v1772_v26  ;;  %v1782_v26 = vld [vmem:[%s2160_s1 + $0x1a0] sm:$0xff]  ;;  %v1165_v38 = vpack.c.b16 %v1101_v12, %v1164_v32 }
  0x34   : > { %950 = vmatpush.bf16.msra.mxu3 %v1776_v36  ;;  %v1104_v36 = vshrl.u32 %v1102_v21, 16  ;;  %v993_v39 = vsel %vm606_vm1, %v988_v34, %v992_v35  ;;  %v1818_v32 = vld [vmem:[%s2161_s2] ss:$0 sm:$0xff] }
  0x35   : > { %766 = vmatpush.bf16.msra.mxu0 %v1763_v40  ;;  %v1046_v40 = vpack.c.b16 %v978_v10, %v2092_v1 }
  0x36   : > { %830 = vmatpush.bf16.msra.mxu1 %v1767_v42  ;;  %v1166_v42 = vrot.slane %v1165_v38, 1 }
  0x37   : > { %887 = vmatpush.bf16.msra.mxu2 %v1771_v37  ;;  %v1108_v37 = vrot.slane %v1106_v30, 1 }
  0x38   : > { %951 = vmatpush.bf16.msra.mxu3 %v1775_v43 }
  0x39   : > { %767 = vmatpush.bf16.msra.mxu0 %v1762_v46  ;;  %v1109_v41 = vor.u32 %v1108_v37, %v1104_v36 }
  0x3a   : > { %831 = vmatpush.bf16.msra.mxu1 %v1766_v54 }
  0x3b   : > { %888 = vmatpush.bf16.msra.mxu2 %v1770_v44 }
  0x3c   : > { %952 = vmatpush.bf16.msra.mxu3 %v1774_v55  ;;  %1550 = vmatmul.msk.bf16.vlgmr.msra.gmra.mxu0 %vm279_vm0, %v732_v6 }
  0x3d   : > { %1025 = vmatpush.bf16.msrb.mxu0 %v1781_v58  ;;  %1575 = vmatmul.msk.bf16.vlgmr.msra.gmra.mxu1 %vm279_vm0, %v796_v9 }
  0x3e   : > { %1078 = vmatpush.bf16.msrb.mxu1 %v1785_v59  ;;  %1600 = vmatmul.msk.bf16.vlgmr.msra.gmra.mxu2 %vm279_vm0, %v853_v7 }
  0x3f   : > { %1141 = vmatpush.bf16.msrb.mxu2 %v1789_v49  ;;  %1625 = vmatmul.msk.bf16.vlgmr.msra.gmra.mxu3 %vm279_vm0, %v917_v13 }
  0x40   : > { %1198 = vmatpush.bf16.msrb.mxu3 %v1793_v62 }
  0x41   : > { %1026 = vmatpush.bf16.msrb.mxu0 %v1780_v14 }
  0x42   : > { %1079 = vmatpush.bf16.msrb.mxu1 %v1784_v8 }
  0x43   : > { %1142 = vmatpush.bf16.msrb.mxu2 %v1788_v63 }
  0x44   : > { %1199 = vmatpush.bf16.msrb.mxu3 %v1792_v15 }
  0x45   : > { %1027 = vmatpush.bf16.msrb.mxu0 %v1779_v22 }
  0x46   : > { %1080 = vmatpush.bf16.msrb.mxu1 %v1783_v17 }
  0x47   : > { %1143 = vmatpush.bf16.msrb.mxu2 %v1787_v16 }
  0x48   : > { %1200 = vmatpush.bf16.msrb.mxu3 %v1791_v23 }
  0x49   : > { %1028 = vmatpush.bf16.msrb.mxu0 %v1778_v31 }
  0x4a   : > { %1081 = vmatpush.bf16.msrb.mxu1 %v1782_v26 }
  0x4b   : > { %1144 = vmatpush.bf16.msrb.mxu2 %v1786_v24 }
  0x4c   : > { %1201 = vmatpush.bf16.msrb.mxu3 %v1790_v33  ;;  %1650 = vmatmul.msk.bf16.vlgmr.msrb.gmra.mxu0 %vm279_vm0, %v993_v39 }
  0x4d   : > { %1675 = vmatmul.msk.bf16.vlgmr.msrb.gmra.mxu1 %vm279_vm0, %v1046_v40 }
  0x4e   : > { %1700 = vmatmul.msk.bf16.vlgmr.msrb.gmra.mxu2 %vm279_vm0, %v1109_v41 }
  0x4f   : > { %1725 = vmatmul.msk.bf16.vlgmr.msrb.gmra.mxu3 %vm279_vm0, %v1166_v42 }
  0x99   : > { %v292_v43 = vpop.f32.mrf.mxu0 }
  0x9a   : > { %v336_v44 = vpop.f32.mrf.mxu1 }
  0x9b   : > { %v337_v53 = vadd.f32 %v336_v44, %v292_v43 }
  0xa1   : > { %v391_v45 = vpop.f32.mrf.mxu2  ;;  %v294_v47 = vpop.f32.mrf.mxu0 }
  0xa2   : > { %v455_v46 = vpop.f32.mrf.mxu3  ;;  %v338_v48 = vpop.f32.mrf.mxu1  ;;  %v396_v54 = vadd.f32 %v391_v45, %v337_v53 }
  0xa3   : > { %v339_v60 = vadd.f32 %v338_v48, %v294_v47 }
  0xa4   : > { %v460_v56 = vadd.f32 %v455_v46, %v396_v54 }
  0xa9   : > { %v393_v49 = vpop.f32.mrf.mxu2  ;;  %v522_v51 = vpop.f32.mrf.mxu0 }
  0xaa   : > { %v457_v50 = vpop.f32.mrf.mxu3  ;;  %v579_v52 = vpop.f32.mrf.mxu1  ;;  %v527_v61 = vadd.f32 %v522_v51, %v460_v56  ;;  %v397_v62 = vadd.f32 %v393_v49, %v339_v60 }
  0xac   : > { %v584_v63 = vadd.f32 %v579_v52, %v527_v61  ;;  %v461_v1 = vadd.f32 %v457_v50, %v397_v62 }
  0xb1   : > { %v656_v55 = vpop.f32.mrf.mxu2  ;;  %v524_v58 = vpop.f32.mrf.mxu0 }
  0xb2   : > { %v709_v57 = vpop.f32.mrf.mxu3  ;;  %v581_v59 = vpop.f32.mrf.mxu1  ;;  %v661_v2 = vadd.f32 %v656_v55, %v584_v63  ;;  %v528_v6 = vadd.f32 %v524_v58, %v461_v1 }
  0xb4   : > { %v714_v7 = vadd.f32 %v709_v57, %v661_v2  ;;  %v585_v8 = vadd.f32 %v581_v59, %v528_v6 }
  0xb9   : > { %v658_v0 = vpop.f32.mrf.mxu2  ;;  %v769_v4 = vpop.f32.mrf.mxu0 }
  0xba   : > { %v711_v3 = vpop.f32.mrf.mxu3  ;;  %v833_v5 = vpop.f32.mrf.mxu1  ;;  %v774_v9 = vadd.f32 %v769_v4, %v714_v7  ;;  %v662_v11 = vadd.f32 %v658_v0, %v585_v8 }
  0xbc   : > { %v838_v15 = vadd.f32 %v833_v5, %v774_v9  ;;  %v715_v16 = vadd.f32 %v711_v3, %v662_v11 }
  0xc1   : > { %v890_v10 = vpop.f32.mrf.mxu2  ;;  %v771_v13 = vpop.f32.mrf.mxu0 }
  0xc2   : > { %v954_v12 = vpop.f32.mrf.mxu3  ;;  %v835_v14 = vpop.f32.mrf.mxu1  ;;  %v895_v17 = vadd.f32 %v890_v10, %v838_v15  ;;  %v775_v18 = vadd.f32 %v771_v13, %v715_v16 }
  0xc4   : > { %v959_v20 = vadd.f32 %v954_v12, %v895_v17  ;;  %v839_v23 = vadd.f32 %v835_v14, %v775_v18 }
  0xc9   : > { %v892_v19 = vpop.f32.mrf.mxu2  ;;  %v1030_v22 = vpop.f32.mrf.mxu0 }
  0xca   : > { %v956_v21 = vpop.f32.mrf.mxu3  ;;  %v1035_v24 = vadd.f32 %v1030_v22, %v959_v20  ;;  %v1083_v25 = vpop.f32.mrf.mxu1  ;;  %v896_v26 = vadd.f32 %v892_v19, %v839_v23 }
  0xcc   : > { %v1088_v27 = vadd.f32 %v1083_v25, %v1035_v24  ;;  %v960_v29 = vadd.f32 %v956_v21, %v896_v26 }
  0xd1   : > { %v1146_v28 = vpop.f32.mrf.mxu2  ;;  %v1032_v33 = vpop.f32.mrf.mxu0 }
  0xd2   : > { %v1151_v30 = vadd.f32 %v1146_v28, %v1088_v27  ;;  %v1203_v31 = vpop.f32.mrf.mxu3  ;;  %v1036_v35 = vadd.f32 %v1032_v33, %v960_v29  ;;  %v1085_v37 = vpop.f32.mrf.mxu1 }
  0xd4   : > { %v1208_v34 = vadd.f32 %v1203_v31, %v1151_v30  ;;  %v1089_v38 = vadd.f32 %v1085_v37, %v1036_v35 }
  0xd6   : > { %v1214_v36 = vadd.f32 %v1818_v32, %v1208_v34 }
  0xd8   : > { %1216 = vst [vmem:[%s221_s23] sm:$0xff] %v1214_v36 }
  0xd9   : > { %v1148_v39 = vpop.f32.mrf.mxu2 }
  0xda   : > { %v1152_v40 = vadd.f32 %v1148_v39, %v1089_v38  ;;  %v1205_v41 = vpop.f32.mrf.mxu3 }
  0xdc   : > { %v1209_v42 = vadd.f32 %v1205_v41, %v1152_v40 }
  0xde   : > { %v1215_v43 = vadd.f32 %v1818_v32, %v1209_v42 }
  0xe0   : > { %1217 = vst [vmem:[%s221_s23 + $0x8] sm:$0x3] %v1215_v43 }
  0xe1 PF: > { %s13_s14 = sadd.s32 1, %s1841_s14   ;;  %s2163_s12 = smov %s1837_s13 }
  0xe2   : > { %p10_p5 = scmp.ge.s32.totalorder %s13_s14, 4   ;;  %s2164_s13 = smov %s2166_s15 }
  0xe4   :  { %12 = sbr.rel (!%p10_p5) target bundleno = 2 (0x2), region = 83 }

</bundles_post_ra>
